<compile_context>
chip_gen: v6e
topology: v6e:2x2x1
jax: 0.10.0
libtpu: 0.0.40
codegen_flags: <defaults>
</compile_context>

<pallas_src>
import numpy as np
import jax
import jax.numpy as jnp
from jax.experimental import pallas as pl
from jax.experimental.pallas import tpu as pltpu

C1P = 8              # conv1 out-channels padded 6 -> 8
H1 = 14              # spatial size after pool1
C2 = 16              # conv2 out-channels
H2 = 5               # spatial size after pool2
FCP = 128            # fc feature padding (120 / 84 / 10 -> 128)
W1_COLS = H1 * C1P   # 112
W2_COLS = H2 * C2    # 80


# ------------------------------ fused kernel --------------------------------

def _lenet_kernel(x_ref, w1t_ref, b1_ref, w2t_ref, b2_ref,
                  wf1_ref, bf1_ref, wf2_ref, bf2_ref, wf3_ref, bf3_ref,
                  out_ref, h1_scr, h2_scr):
    f32 = jnp.float32

    # ---- conv1(5x5, pad=2) + maxpool(2x2) + relu, fused --------------------
    # x_ref[0, r, t, :] holds padded-image row 4*t + r.  For pooled row
    # py = 2*t + p2 and pooling phase (P, Q), conv row 2*py + P needs image rows
    # 4*t + s with s = 2*p2 + P + dy  ->  plane s % 4, contiguous rows s//4 : s//4+7.
    # Column window / channel packing is baked into the block-Toeplitz w1t.
    for p2 in (0, 1):                       # parity of the pooled output row
        best = None
        for P in (0, 1):                    # pooling phase: conv row parity
            for Q in (0, 1):                # pooling phase: conv col parity
                acc = None
                for dy in range(5):
                    s = 2 * p2 + P + dy
                    a = x_ref[0, s % 4, (s // 4):(s // 4) + 7, :]         # (7, 32)
                    t = jnp.dot(a, w1t_ref[dy, Q], preferred_element_type=f32)
                    acc = t if acc is None else acc + t                   # (7, 112)
                best = acc if best is None else jnp.maximum(best, acc)
        h1_scr[p2] = jnp.maximum(best + b1_ref[...], 0.0)                 # (7, 112)

    # ---- conv2(5x5, valid) + maxpool(2x2) + relu, fused ---------------------
    # h1_scr[p][t] is pooled row 2*t + p with layout [px * 8 + ci].
    best2 = None
    for P in (0, 1):
        for Q in (0, 1):
            acc = None
            for dy in range(5):
                u = P + dy
                a = h1_scr[u % 2, (u // 2):(u // 2) + 5, :]               # (5, 112)
                t = jnp.dot(a, w2t_ref[dy, Q], preferred_element_type=f32)
                acc = t if acc is None else acc + t                       # (5, 80)
            best2 = acc if best2 is None else jnp.maximum(best2, acc)
    h2_scr[...] = jnp.maximum(best2 + b2_ref[...], 0.0)                   # (5, 80)

    # ---- fc1 + relu (PyTorch NCHW flatten permutation baked into wf1) ------
    z = bf1_ref[...]                                                      # (1, 128)
    for h in range(5):
        z = z + jnp.dot(h2_scr[h:h + 1, :], wf1_ref[h], preferred_element_type=f32)
    z = jnp.maximum(z, 0.0)

    # ---- fc2 + relu ---------------------------------------------------------
    z = jnp.maximum(jnp.dot(z, wf2_ref[...], preferred_element_type=f32)
                    + bf2_ref[...], 0.0)

    # ---- fc3 + log_softmax (padded lanes carry -1e30 bias -> masked) -------
    logits = jnp.dot(z, wf3_ref[...], preferred_element_type=f32) + bf3_ref[...]
    m = jnp.max(logits, axis=-1, keepdims=True)
    y = logits - m
    out_ref[0] = y - jnp.log(jnp.sum(jnp.exp(y), axis=-1, keepdims=True))


# ------------------------------ host wrappers --------------------------------

@jax.jit
def lenet_forward(x_nchw, kp):
    N = x_nchw.shape[0]
    # pad to 32x32 (conv1 padding=2) and split rows by residue mod 4 so every
    # conv+pool phase in the kernel reads a contiguous slice (no strided access).
    xp = jnp.pad(x_nchw[:, 0], ((0, 0), (2, 2), (2, 2)))                  # (N, 32, 32)
    x_planes = jnp.transpose(xp.reshape(N, 8, 4, 32), (0, 2, 1, 3))       # (N, 4, 8, 32)

    out_pad = pl.pallas_call(
        _lenet_kernel,
        out_shape=jax.ShapeDtypeStruct((N, 1, FCP), jnp.float32),
        grid=(N,),
        in_specs=[
            pl.BlockSpec((1, 4, 8, 32), lambda n: (n, 0, 0, 0)),          # image planes
            pl.BlockSpec((5, 2, 32, W1_COLS), lambda n: (0, 0, 0, 0)),    # conv1 Toeplitz
            pl.BlockSpec((1, W1_COLS), lambda n: (0, 0)),                 # conv1 bias row
            pl.BlockSpec((5, 2, W1_COLS, W2_COLS), lambda n: (0, 0, 0, 0)),  # conv2 Toeplitz
            pl.BlockSpec((1, W2_COLS), lambda n: (0, 0)),                 # conv2 bias row
            pl.BlockSpec((5, W2_COLS, FCP), lambda n: (0, 0, 0)),         # fc1 (permuted, padded)
            pl.BlockSpec((1, FCP), lambda n: (0, 0)),                     # fc1 bias
            pl.BlockSpec((FCP, FCP), lambda n: (0, 0)),                   # fc2
            pl.BlockSpec((1, FCP), lambda n: (0, 0)),                     # fc2 bias
            pl.BlockSpec((FCP, FCP), lambda n: (0, 0)),                   # fc3
            pl.BlockSpec((1, FCP), lambda n: (0, 0)),                     # fc3 bias (+mask)
        ],
        out_specs=pl.BlockSpec((1, 1, FCP), lambda n: (n, 0, 0)),
        scratch_shapes=[
            pltpu.VMEM((2, 7, W1_COLS), jnp.float32),                     # h1 (row-parity split)
            pltpu.VMEM((H2, W2_COLS), jnp.float32),                       # h2
        ],
        compiler_params=pltpu.CompilerParams(
            dimension_semantics=("parallel",),
            vmem_limit_bytes=32 * 1024 * 1024),
    )(x_planes, kp["w1t"], kp["b1row"], kp["w2t"], kp["b2row"],
      kp["wf1b"], kp["bf1row"], kp["wf2p"], kp["bf2row"],
      kp["wf3p"], kp["bf3row"])
    return out_pad[:, 0, :10]


def init_params(key):
    """Parameters in PyTorch layout (Conv2d: OIHW, Linear: (out, in))."""
    ks = jax.random.split(key, 10)
    return {
        "w1": jax.random.normal(ks[0], (6, 1, 5, 5), jnp.float32) * 0.1,
        "b1": jax.random.normal(ks[1], (6,), jnp.float32) * 0.1,
        "w2": jax.random.normal(ks[2], (16, 6, 5, 5), jnp.float32) * 0.05,
        "b2": jax.random.normal(ks[3], (16,), jnp.float32) * 0.05,
        "wf1": jax.random.normal(ks[4], (120, 16 * 5 * 5), jnp.float32) * 0.05,
        "bf1": jax.random.normal(ks[5], (120,), jnp.float32) * 0.05,
        "wf2": jax.random.normal(ks[6], (84, 120), jnp.float32) * 0.05,
        "bf2": jax.random.normal(ks[7], (84,), jnp.float32) * 0.05,
        "wf3": jax.random.normal(ks[8], (10, 84), jnp.float32) * 0.05,
        "bf3": jax.random.normal(ks[9], (10,), jnp.float32) * 0.05,
    }


def prepare_kernel_params(tp):
    """One-time host-side repack: Toeplitz conv matrices, padded/permuted fc weights."""
    w1 = np.asarray(tp["w1"], np.float32)
    b1 = np.asarray(tp["b1"], np.float32)
    w2 = np.asarray(tp["w2"], np.float32)
    b2 = np.asarray(tp["b2"], np.float32)
    wf1 = np.asarray(tp["wf1"], np.float32)
    bf1 = np.asarray(tp["bf1"], np.float32)
    wf2 = np.asarray(tp["wf2"], np.float32)
    bf2 = np.asarray(tp["bf2"], np.float32)
    wf3 = np.asarray(tp["wf3"], np.float32)
    bf3 = np.asarray(tp["bf3"], np.float32)

    # conv1 block-Toeplitz: padded-input column ix -> output column px*8 + c,
    # one matrix per (tap row dy, pooled-column parity Q).
    w1t = np.zeros((5, 2, 32, W1_COLS), np.float32)
    for dy in range(5):
        for q in range(2):
            for px in range(H1):
                for dx in range(5):
                    ix = 2 * px + q + dx
                    w1t[dy, q, ix, px * C1P:px * C1P + 6] = w1[:, 0, dy, dx]
    b1row = np.zeros((1, W1_COLS), np.float32)
    for px in range(H1):
        b1row[0, px * C1P:px * C1P + 6] = b1

    # conv2 block-Toeplitz: h1 column x*8 + ci -> output column px*16 + co.
    w2t = np.zeros((5, 2, W1_COLS, W2_COLS), np.float32)
    for dy in range(5):
        for q in range(2):
            for px in range(H2):
                for dx in range(5):
                    x = 2 * px + q + dx
                    w2t[dy, q, x * C1P:x * C1P + 6, px * C2:(px + 1) * C2] = w2[:, :, dy, dx].T
    b2row = np.zeros((1, W2_COLS), np.float32)
    for px in range(H2):
        b2row[0, px * C2:(px + 1) * C2] = b2

    # fc1 with the PyTorch NCHW flatten (k = c*25 + h*5 + w) baked in,
    # grouped per spatial row h; output dim padded 120 -> 128.
    wf1b = np.zeros((5, W2_COLS, FCP), np.float32)
    for h in range(5):
        for w in range(5):
            for co in range(C2):
                wf1b[h, w * C2 + co, :120] = wf1[:, co * 25 + h * 5 + w]
    bf1row = np.zeros((1, FCP), np.float32)
    bf1row[0, :120] = bf1

    wf2p = np.zeros((FCP, FCP), np.float32)
    wf2p[:120, :84] = wf2.T
    bf2row = np.zeros((1, FCP), np.float32)
    bf2row[0, :84] = bf2

    wf3p = np.zeros((FCP, FCP), np.float32)
    wf3p[:84, :10] = wf3.T
    bf3row = np.full((1, FCP), -1e30, np.float32)   # mask padded logits
    bf3row[0, :10] = bf3

    packed = dict(w1t=w1t, b1row=b1row, w2t=w2t, b2row=b2row,
                  wf1b=wf1b, bf1row=bf1row, wf2p=wf2p, bf2row=bf2row,
                  wf3p=wf3p, bf3row=bf3row)
    return {k: jnp.asarray(v) for k, v in packed.items()}


def reference_forward(x_nchw, tp):
    """Plain-JAX reference matching the PyTorch module (for self-check)."""
    dn = ("NCHW", "OIHW", "NCHW")
    hp = jax.lax.Precision.HIGHEST
    y = jax.lax.conv_general_dilated(x_nchw, tp["w1"], (1, 1), ((2, 2), (2, 2)),
                                     dimension_numbers=dn, precision=hp)
    y = y + tp["b1"].reshape(1, -1, 1, 1)
    y = jax.lax.reduce_window(y, -jnp.inf, jax.lax.max, (1, 1, 2, 2), (1, 1, 2, 2), "VALID")
    y = jnp.maximum(y, 0.0)
    y = jax.lax.conv_general_dilated(y, tp["w2"], (1, 1), "VALID",
                                     dimension_numbers=dn, precision=hp)
    y = y + tp["b2"].reshape(1, -1, 1, 1)
    y = jax.lax.reduce_window(y, -jnp.inf, jax.lax.max, (1, 1, 2, 2), (1, 1, 2, 2), "VALID")
    y = jnp.maximum(y, 0.0)
    f = y.reshape(y.shape[0], -1)
    z = jnp.maximum(jnp.dot(f, tp["wf1"].T, precision=hp) + tp["bf1"], 0.0)
    z = jnp.maximum(jnp.dot(z, tp["wf2"].T, precision=hp) + tp["bf2"], 0.0)
    logits = jnp.dot(z, tp["wf3"].T, precision=hp) + tp["bf3"]
    return jax.nn.log_softmax(logits, axis=-1)


if __name__ == "__main__":
    key = jax.random.PRNGKey(0)
    k_x, k_p = jax.random.split(key)
    N = 2
    x = jax.random.normal(k_x, (N, 1, 28, 28), jnp.float32)   # MNIST-like input
    torch_params = init_params(k_p)
    kparams = prepare_kernel_params(torch_params)

    out = jax.block_until_ready(lenet_forward(x, kparams))
    assert out.shape == (N, 10), out.shape

    # log_softmax sanity: probabilities per row sum to ~1
    row_sums = jnp.sum(jnp.exp(out), axis=-1)
    assert bool(jnp.all(jnp.abs(row_sums - 1.0) < 1e-4)), row_sums

    # numerical check against plain-JAX reference of the PyTorch module
    ref = reference_forward(x, torch_params)
    max_err = jnp.max(jnp.abs(out - ref))
    assert bool(max_err < 5e-3), float(max_err)

    print("KERNEL_OK")
</pallas_src>

<mosaic_0001>
module attributes {stable_mosaic.version = 11 : i64} {
  func.func @_lenet_kernel(%arg0: i32, %arg1: memref<1x4x8x32xf32, #tpu.memory_space<vmem>>, %arg2: memref<5x2x32x112xf32, #tpu.memory_space<vmem>>, %arg3: memref<1x112xf32, #tpu.memory_space<vmem>>, %arg4: memref<5x2x112x80xf32, #tpu.memory_space<vmem>>, %arg5: memref<1x80xf32, #tpu.memory_space<vmem>>, %arg6: memref<5x80x128xf32, #tpu.memory_space<vmem>>, %arg7: memref<1x128xf32, #tpu.memory_space<vmem>>, %arg8: memref<128x128xf32, #tpu.memory_space<vmem>>, %arg9: memref<1x128xf32, #tpu.memory_space<vmem>>, %arg10: memref<128x128xf32, #tpu.memory_space<vmem>>, %arg11: memref<1x128xf32, #tpu.memory_space<vmem>>, %arg12: memref<1x1x128xf32, #tpu.memory_space<vmem>>, %arg13: memref<2x7x112xf32, #tpu.memory_space<vmem>>, %arg14: memref<5x80xf32, #tpu.memory_space<vmem>>) attributes {dimension_semantics = [#tpu.dimension_semantics<parallel>], iteration_bounds = array<i64: 2>, scalar_prefetch = 0 : i64, scratch_operands = 2 : i64, tpu.core_type = #tpu.core_type<tc>, window_params = [{transform_indices = @transform_0, window_bounds = array<i64: 1, 4, 8, 32>}, {pipeline_mode = #tpu.pipeline_mode<synchronous>, transform_indices = @transform_1, window_bounds = array<i64: 5, 2, 32, 112>}, {pipeline_mode = #tpu.pipeline_mode<synchronous>, transform_indices = @transform_2, window_bounds = array<i64: 1, 112>}, {pipeline_mode = #tpu.pipeline_mode<synchronous>, transform_indices = @transform_3, window_bounds = array<i64: 5, 2, 112, 80>}, {pipeline_mode = #tpu.pipeline_mode<synchronous>, transform_indices = @transform_4, window_bounds = array<i64: 1, 80>}, {pipeline_mode = #tpu.pipeline_mode<synchronous>, transform_indices = @transform_5, window_bounds = array<i64: 5, 80, 128>}, {pipeline_mode = #tpu.pipeline_mode<synchronous>, transform_indices = @transform_6, window_bounds = array<i64: 1, 128>}, {pipeline_mode = #tpu.pipeline_mode<synchronous>, transform_indices = @transform_7, window_bounds = array<i64: 128, 128>}, {pipeline_mode = #tpu.pipeline_mode<synchronous>, transform_indices = @transform_8, window_bounds = array<i64: 1, 128>}, {pipeline_mode = #tpu.pipeline_mode<synchronous>, transform_indices = @transform_9, window_bounds = array<i64: 128, 128>}, {pipeline_mode = #tpu.pipeline_mode<synchronous>, transform_indices = @transform_10, window_bounds = array<i64: 1, 128>}, {transform_indices = @transform_11, window_bounds = array<i64: 1, 1, 128>}]} {
    %c0 = arith.constant 0 : index
    %c0_0 = arith.constant 0 : index
    %c0_1 = arith.constant 0 : index
    %c0_2 = arith.constant 0 : index
    %0 = vector.load %arg1[%c0, %c0_0, %c0_1, %c0_2] : memref<1x4x8x32xf32, #tpu.memory_space<vmem>>, vector<1x1x7x32xf32>
    %1 = vector.shape_cast %0 : vector<1x1x7x32xf32> to vector<7x32xf32>
    %c0_3 = arith.constant 0 : index
    %c0_4 = arith.constant 0 : index
    %c0_5 = arith.constant 0 : index
    %c0_6 = arith.constant 0 : index
    %2 = vector.load %arg2[%c0_3, %c0_4, %c0_5, %c0_6] : memref<5x2x32x112xf32, #tpu.memory_space<vmem>>, vector<1x1x32x112xf32>
    %3 = vector.shape_cast %2 : vector<1x1x32x112xf32> to vector<32x112xf32>
    %cst = arith.constant dense<0.000000e+00> : vector<7x112xf32>
    %4 = tpu.matmul %1, %3, %cst {dimension_numbers = #tpu.dot_dimension_numbers<[1], [0], [0], [1], [0, 0, 1, 1], [], []>} : vector<7x32xf32>, vector<32x112xf32>, vector<7x112xf32> -> vector<7x112xf32>
    %c0_7 = arith.constant 0 : index
    %c1 = arith.constant 1 : index
    %c0_8 = arith.constant 0 : index
    %c0_9 = arith.constant 0 : index
    %5 = vector.load %arg1[%c0_7, %c1, %c0_8, %c0_9] : memref<1x4x8x32xf32, #tpu.memory_space<vmem>>, vector<1x1x7x32xf32>
    %6 = vector.shape_cast %5 : vector<1x1x7x32xf32> to vector<7x32xf32>
    %c1_10 = arith.constant 1 : index
    %c0_11 = arith.constant 0 : index
    %c0_12 = arith.constant 0 : index
    %c0_13 = arith.constant 0 : index
    %7 = vector.load %arg2[%c1_10, %c0_11, %c0_12, %c0_13] : memref<5x2x32x112xf32, #tpu.memory_space<vmem>>, vector<1x1x32x112xf32>
    %8 = vector.shape_cast %7 : vector<1x1x32x112xf32> to vector<32x112xf32>
    %cst_14 = arith.constant dense<0.000000e+00> : vector<7x112xf32>
    %9 = tpu.matmul %6, %8, %cst_14 {dimension_numbers = #tpu.dot_dimension_numbers<[1], [0], [0], [1], [0, 0, 1, 1], [], []>} : vector<7x32xf32>, vector<32x112xf32>, vector<7x112xf32> -> vector<7x112xf32>
    %10 = arith.addf %4, %9 : vector<7x112xf32>
    %c0_15 = arith.constant 0 : index
    %c2 = arith.constant 2 : index
    %c0_16 = arith.constant 0 : index
    %c0_17 = arith.constant 0 : index
    %11 = vector.load %arg1[%c0_15, %c2, %c0_16, %c0_17] : memref<1x4x8x32xf32, #tpu.memory_space<vmem>>, vector<1x1x7x32xf32>
    %12 = vector.shape_cast %11 : vector<1x1x7x32xf32> to vector<7x32xf32>
    %c2_18 = arith.constant 2 : index
    %c0_19 = arith.constant 0 : index
    %c0_20 = arith.constant 0 : index
    %c0_21 = arith.constant 0 : index
    %13 = vector.load %arg2[%c2_18, %c0_19, %c0_20, %c0_21] : memref<5x2x32x112xf32, #tpu.memory_space<vmem>>, vector<1x1x32x112xf32>
    %14 = vector.shape_cast %13 : vector<1x1x32x112xf32> to vector<32x112xf32>
    %cst_22 = arith.constant dense<0.000000e+00> : vector<7x112xf32>
    %15 = tpu.matmul %12, %14, %cst_22 {dimension_numbers = #tpu.dot_dimension_numbers<[1], [0], [0], [1], [0, 0, 1, 1], [], []>} : vector<7x32xf32>, vector<32x112xf32>, vector<7x112xf32> -> vector<7x112xf32>
    %16 = arith.addf %10, %15 : vector<7x112xf32>
    %c0_23 = arith.constant 0 : index
    %c3 = arith.constant 3 : index
    %c0_24 = arith.constant 0 : index
    %c0_25 = arith.constant 0 : index
    %17 = vector.load %arg1[%c0_23, %c3, %c0_24, %c0_25] : memref<1x4x8x32xf32, #tpu.memory_space<vmem>>, vector<1x1x7x32xf32>
    %18 = vector.shape_cast %17 : vector<1x1x7x32xf32> to vector<7x32xf32>
    %c3_26 = arith.constant 3 : index
    %c0_27 = arith.constant 0 : index
    %c0_28 = arith.constant 0 : index
    %c0_29 = arith.constant 0 : index
    %19 = vector.load %arg2[%c3_26, %c0_27, %c0_28, %c0_29] : memref<5x2x32x112xf32, #tpu.memory_space<vmem>>, vector<1x1x32x112xf32>
    %20 = vector.shape_cast %19 : vector<1x1x32x112xf32> to vector<32x112xf32>
    %cst_30 = arith.constant dense<0.000000e+00> : vector<7x112xf32>
    %21 = tpu.matmul %18, %20, %cst_30 {dimension_numbers = #tpu.dot_dimension_numbers<[1], [0], [0], [1], [0, 0, 1, 1], [], []>} : vector<7x32xf32>, vector<32x112xf32>, vector<7x112xf32> -> vector<7x112xf32>
    %22 = arith.addf %16, %21 : vector<7x112xf32>
    %c0_31 = arith.constant 0 : index
    %c0_32 = arith.constant 0 : index
    %c1_33 = arith.constant 1 : index
    %c0_34 = arith.constant 0 : index
    %23 = vector.load %arg1[%c0_31, %c0_32, %c1_33, %c0_34] : memref<1x4x8x32xf32, #tpu.memory_space<vmem>>, vector<1x1x7x32xf32>
    %24 = vector.shape_cast %23 : vector<1x1x7x32xf32> to vector<7x32xf32>
    %c4 = arith.constant 4 : index
    %c0_35 = arith.constant 0 : index
    %c0_36 = arith.constant 0 : index
    %c0_37 = arith.constant 0 : index
    %25 = vector.load %arg2[%c4, %c0_35, %c0_36, %c0_37] : memref<5x2x32x112xf32, #tpu.memory_space<vmem>>, vector<1x1x32x112xf32>
    %26 = vector.shape_cast %25 : vector<1x1x32x112xf32> to vector<32x112xf32>
    %cst_38 = arith.constant dense<0.000000e+00> : vector<7x112xf32>
    %27 = tpu.matmul %24, %26, %cst_38 {dimension_numbers = #tpu.dot_dimension_numbers<[1], [0], [0], [1], [0, 0, 1, 1], [], []>} : vector<7x32xf32>, vector<32x112xf32>, vector<7x112xf32> -> vector<7x112xf32>
    %28 = arith.addf %22, %27 : vector<7x112xf32>
    %c0_39 = arith.constant 0 : index
    %c0_40 = arith.constant 0 : index
    %c0_41 = arith.constant 0 : index
    %c0_42 = arith.constant 0 : index
    %29 = vector.load %arg1[%c0_39, %c0_40, %c0_41, %c0_42] : memref<1x4x8x32xf32, #tpu.memory_space<vmem>>, vector<1x1x7x32xf32>
    %30 = vector.shape_cast %29 : vector<1x1x7x32xf32> to vector<7x32xf32>
    %c0_43 = arith.constant 0 : index
    %c1_44 = arith.constant 1 : index
    %c0_45 = arith.constant 0 : index
    %c0_46 = arith.constant 0 : index
    %31 = vector.load %arg2[%c0_43, %c1_44, %c0_45, %c0_46] : memref<5x2x32x112xf32, #tpu.memory_space<vmem>>, vector<1x1x32x112xf32>
    %32 = vector.shape_cast %31 : vector<1x1x32x112xf32> to vector<32x112xf32>
    %cst_47 = arith.constant dense<0.000000e+00> : vector<7x112xf32>
    %33 = tpu.matmul %30, %32, %cst_47 {dimension_numbers = #tpu.dot_dimension_numbers<[1], [0], [0], [1], [0, 0, 1, 1], [], []>} : vector<7x32xf32>, vector<32x112xf32>, vector<7x112xf32> -> vector<7x112xf32>
    %c0_48 = arith.constant 0 : index
    %c1_49 = arith.constant 1 : index
    %c0_50 = arith.constant 0 : index
    %c0_51 = arith.constant 0 : index
    %34 = vector.load %arg1[%c0_48, %c1_49, %c0_50, %c0_51] : memref<1x4x8x32xf32, #tpu.memory_space<vmem>>, vector<1x1x7x32xf32>
    %35 = vector.shape_cast %34 : vector<1x1x7x32xf32> to vector<7x32xf32>
    %c1_52 = arith.constant 1 : index
    %c1_53 = arith.constant 1 : index
    %c0_54 = arith.constant 0 : index
    %c0_55 = arith.constant 0 : index
    %36 = vector.load %arg2[%c1_52, %c1_53, %c0_54, %c0_55] : memref<5x2x32x112xf32, #tpu.memory_space<vmem>>, vector<1x1x32x112xf32>
    %37 = vector.shape_cast %36 : vector<1x1x32x112xf32> to vector<32x112xf32>
    %cst_56 = arith.constant dense<0.000000e+00> : vector<7x112xf32>
    %38 = tpu.matmul %35, %37, %cst_56 {dimension_numbers = #tpu.dot_dimension_numbers<[1], [0], [0], [1], [0, 0, 1, 1], [], []>} : vector<7x32xf32>, vector<32x112xf32>, vector<7x112xf32> -> vector<7x112xf32>
    %39 = arith.addf %33, %38 : vector<7x112xf32>
    %c0_57 = arith.constant 0 : index
    %c2_58 = arith.constant 2 : index
    %c0_59 = arith.constant 0 : index
    %c0_60 = arith.constant 0 : index
    %40 = vector.load %arg1[%c0_57, %c2_58, %c0_59, %c0_60] : memref<1x4x8x32xf32, #tpu.memory_space<vmem>>, vector<1x1x7x32xf32>
    %41 = vector.shape_cast %40 : vector<1x1x7x32xf32> to vector<7x32xf32>
    %c2_61 = arith.constant 2 : index
    %c1_62 = arith.constant 1 : index
    %c0_63 = arith.constant 0 : index
    %c0_64 = arith.constant 0 : index
    %42 = vector.load %arg2[%c2_61, %c1_62, %c0_63, %c0_64] : memref<5x2x32x112xf32, #tpu.memory_space<vmem>>, vector<1x1x32x112xf32>
    %43 = vector.shape_cast %42 : vector<1x1x32x112xf32> to vector<32x112xf32>
    %cst_65 = arith.constant dense<0.000000e+00> : vector<7x112xf32>
    %44 = tpu.matmul %41, %43, %cst_65 {dimension_numbers = #tpu.dot_dimension_numbers<[1], [0], [0], [1], [0, 0, 1, 1], [], []>} : vector<7x32xf32>, vector<32x112xf32>, vector<7x112xf32> -> vector<7x112xf32>
    %45 = arith.addf %39, %44 : vector<7x112xf32>
    %c0_66 = arith.constant 0 : index
    %c3_67 = arith.constant 3 : index
    %c0_68 = arith.constant 0 : index
    %c0_69 = arith.constant 0 : index
    %46 = vector.load %arg1[%c0_66, %c3_67, %c0_68, %c0_69] : memref<1x4x8x32xf32, #tpu.memory_space<vmem>>, vector<1x1x7x32xf32>
    %47 = vector.shape_cast %46 : vector<1x1x7x32xf32> to vector<7x32xf32>
    %c3_70 = arith.constant 3 : index
    %c1_71 = arith.constant 1 : index
    %c0_72 = arith.constant 0 : index
    %c0_73 = arith.constant 0 : index
    %48 = vector.load %arg2[%c3_70, %c1_71, %c0_72, %c0_73] : memref<5x2x32x112xf32, #tpu.memory_space<vmem>>, vector<1x1x32x112xf32>
    %49 = vector.shape_cast %48 : vector<1x1x32x112xf32> to vector<32x112xf32>
    %cst_74 = arith.constant dense<0.000000e+00> : vector<7x112xf32>
    %50 = tpu.matmul %47, %49, %cst_74 {dimension_numbers = #tpu.dot_dimension_numbers<[1], [0], [0], [1], [0, 0, 1, 1], [], []>} : vector<7x32xf32>, vector<32x112xf32>, vector<7x112xf32> -> vector<7x112xf32>
    %51 = arith.addf %45, %50 : vector<7x112xf32>
    %c0_75 = arith.constant 0 : index
    %c0_76 = arith.constant 0 : index
    %c1_77 = arith.constant 1 : index
    %c0_78 = arith.constant 0 : index
    %52 = vector.load %arg1[%c0_75, %c0_76, %c1_77, %c0_78] : memref<1x4x8x32xf32, #tpu.memory_space<vmem>>, vector<1x1x7x32xf32>
    %53 = vector.shape_cast %52 : vector<1x1x7x32xf32> to vector<7x32xf32>
    %c4_79 = arith.constant 4 : index
    %c1_80 = arith.constant 1 : index
    %c0_81 = arith.constant 0 : index
    %c0_82 = arith.constant 0 : index
    %54 = vector.load %arg2[%c4_79, %c1_80, %c0_81, %c0_82] : memref<5x2x32x112xf32, #tpu.memory_space<vmem>>, vector<1x1x32x112xf32>
    %55 = vector.shape_cast %54 : vector<1x1x32x112xf32> to vector<32x112xf32>
    %cst_83 = arith.constant dense<0.000000e+00> : vector<7x112xf32>
    %56 = tpu.matmul %53, %55, %cst_83 {dimension_numbers = #tpu.dot_dimension_numbers<[1], [0], [0], [1], [0, 0, 1, 1], [], []>} : vector<7x32xf32>, vector<32x112xf32>, vector<7x112xf32> -> vector<7x112xf32>
    %57 = arith.addf %51, %56 : vector<7x112xf32>
    %58 = arith.maximumf %28, %57 : vector<7x112xf32>
    %c0_84 = arith.constant 0 : index
    %c1_85 = arith.constant 1 : index
    %c0_86 = arith.constant 0 : index
    %c0_87 = arith.constant 0 : index
    %59 = vector.load %arg1[%c0_84, %c1_85, %c0_86, %c0_87] : memref<1x4x8x32xf32, #tpu.memory_space<vmem>>, vector<1x1x7x32xf32>
    %60 = vector.shape_cast %59 : vector<1x1x7x32xf32> to vector<7x32xf32>
    %c0_88 = arith.constant 0 : index
    %c0_89 = arith.constant 0 : index
    %c0_90 = arith.constant 0 : index
    %c0_91 = arith.constant 0 : index
    %61 = vector.load %arg2[%c0_88, %c0_89, %c0_90, %c0_91] : memref<5x2x32x112xf32, #tpu.memory_space<vmem>>, vector<1x1x32x112xf32>
    %62 = vector.shape_cast %61 : vector<1x1x32x112xf32> to vector<32x112xf32>
    %cst_92 = arith.constant dense<0.000000e+00> : vector<7x112xf32>
    %63 = tpu.matmul %60, %62, %cst_92 {dimension_numbers = #tpu.dot_dimension_numbers<[1], [0], [0], [1], [0, 0, 1, 1], [], []>} : vector<7x32xf32>, vector<32x112xf32>, vector<7x112xf32> -> vector<7x112xf32>
    %c0_93 = arith.constant 0 : index
    %c2_94 = arith.constant 2 : index
    %c0_95 = arith.constant 0 : index
    %c0_96 = arith.constant 0 : index
    %64 = vector.load %arg1[%c0_93, %c2_94, %c0_95, %c0_96] : memref<1x4x8x32xf32, #tpu.memory_space<vmem>>, vector<1x1x7x32xf32>
    %65 = vector.shape_cast %64 : vector<1x1x7x32xf32> to vector<7x32xf32>
    %c1_97 = arith.constant 1 : index
    %c0_98 = arith.constant 0 : index
    %c0_99 = arith.constant 0 : index
    %c0_100 = arith.constant 0 : index
    %66 = vector.load %arg2[%c1_97, %c0_98, %c0_99, %c0_100] : memref<5x2x32x112xf32, #tpu.memory_space<vmem>>, vector<1x1x32x112xf32>
    %67 = vector.shape_cast %66 : vector<1x1x32x112xf32> to vector<32x112xf32>
    %cst_101 = arith.constant dense<0.000000e+00> : vector<7x112xf32>
    %68 = tpu.matmul %65, %67, %cst_101 {dimension_numbers = #tpu.dot_dimension_numbers<[1], [0], [0], [1], [0, 0, 1, 1], [], []>} : vector<7x32xf32>, vector<32x112xf32>, vector<7x112xf32> -> vector<7x112xf32>
    %69 = arith.addf %63, %68 : vector<7x112xf32>
    %c0_102 = arith.constant 0 : index
    %c3_103 = arith.constant 3 : index
    %c0_104 = arith.constant 0 : index
    %c0_105 = arith.constant 0 : index
    %70 = vector.load %arg1[%c0_102, %c3_103, %c0_104, %c0_105] : memref<1x4x8x32xf32, #tpu.memory_space<vmem>>, vector<1x1x7x32xf32>
    %71 = vector.shape_cast %70 : vector<1x1x7x32xf32> to vector<7x32xf32>
    %c2_106 = arith.constant 2 : index
    %c0_107 = arith.constant 0 : index
    %c0_108 = arith.constant 0 : index
    %c0_109 = arith.constant 0 : index
    %72 = vector.load %arg2[%c2_106, %c0_107, %c0_108, %c0_109] : memref<5x2x32x112xf32, #tpu.memory_space<vmem>>, vector<1x1x32x112xf32>
    %73 = vector.shape_cast %72 : vector<1x1x32x112xf32> to vector<32x112xf32>
    %cst_110 = arith.constant dense<0.000000e+00> : vector<7x112xf32>
    %74 = tpu.matmul %71, %73, %cst_110 {dimension_numbers = #tpu.dot_dimension_numbers<[1], [0], [0], [1], [0, 0, 1, 1], [], []>} : vector<7x32xf32>, vector<32x112xf32>, vector<7x112xf32> -> vector<7x112xf32>
    %75 = arith.addf %69, %74 : vector<7x112xf32>
    %c0_111 = arith.constant 0 : index
    %c0_112 = arith.constant 0 : index
    %c1_113 = arith.constant 1 : index
    %c0_114 = arith.constant 0 : index
    %76 = vector.load %arg1[%c0_111, %c0_112, %c1_113, %c0_114] : memref<1x4x8x32xf32, #tpu.memory_space<vmem>>, vector<1x1x7x32xf32>
    %77 = vector.shape_cast %76 : vector<1x1x7x32xf32> to vector<7x32xf32>
    %c3_115 = arith.constant 3 : index
    %c0_116 = arith.constant 0 : index
    %c0_117 = arith.constant 0 : index
    %c0_118 = arith.constant 0 : index
    %78 = vector.load %arg2[%c3_115, %c0_116, %c0_117, %c0_118] : memref<5x2x32x112xf32, #tpu.memory_space<vmem>>, vector<1x1x32x112xf32>
    %79 = vector.shape_cast %78 : vector<1x1x32x112xf32> to vector<32x112xf32>
    %cst_119 = arith.constant dense<0.000000e+00> : vector<7x112xf32>
    %80 = tpu.matmul %77, %79, %cst_119 {dimension_numbers = #tpu.dot_dimension_numbers<[1], [0], [0], [1], [0, 0, 1, 1], [], []>} : vector<7x32xf32>, vector<32x112xf32>, vector<7x112xf32> -> vector<7x112xf32>
    %81 = arith.addf %75, %80 : vector<7x112xf32>
    %c0_120 = arith.constant 0 : index
    %c1_121 = arith.constant 1 : index
    %c1_122 = arith.constant 1 : index
    %c0_123 = arith.constant 0 : index
    %82 = vector.load %arg1[%c0_120, %c1_121, %c1_122, %c0_123] : memref<1x4x8x32xf32, #tpu.memory_space<vmem>>, vector<1x1x7x32xf32>
    %83 = vector.shape_cast %82 : vector<1x1x7x32xf32> to vector<7x32xf32>
    %c4_124 = arith.constant 4 : index
    %c0_125 = arith.constant 0 : index
    %c0_126 = arith.constant 0 : index
    %c0_127 = arith.constant 0 : index
    %84 = vector.load %arg2[%c4_124, %c0_125, %c0_126, %c0_127] : memref<5x2x32x112xf32, #tpu.memory_space<vmem>>, vector<1x1x32x112xf32>
    %85 = vector.shape_cast %84 : vector<1x1x32x112xf32> to vector<32x112xf32>
    %cst_128 = arith.constant dense<0.000000e+00> : vector<7x112xf32>
    %86 = tpu.matmul %83, %85, %cst_128 {dimension_numbers = #tpu.dot_dimension_numbers<[1], [0], [0], [1], [0, 0, 1, 1], [], []>} : vector<7x32xf32>, vector<32x112xf32>, vector<7x112xf32> -> vector<7x112xf32>
    %87 = arith.addf %81, %86 : vector<7x112xf32>
    %88 = arith.maximumf %58, %87 : vector<7x112xf32>
    %c0_129 = arith.constant 0 : index
    %c1_130 = arith.constant 1 : index
    %c0_131 = arith.constant 0 : index
    %c0_132 = arith.constant 0 : index
    %89 = vector.load %arg1[%c0_129, %c1_130, %c0_131, %c0_132] : memref<1x4x8x32xf32, #tpu.memory_space<vmem>>, vector<1x1x7x32xf32>
    %90 = vector.shape_cast %89 : vector<1x1x7x32xf32> to vector<7x32xf32>
    %c0_133 = arith.constant 0 : index
    %c1_134 = arith.constant 1 : index
    %c0_135 = arith.constant 0 : index
    %c0_136 = arith.constant 0 : index
    %91 = vector.load %arg2[%c0_133, %c1_134, %c0_135, %c0_136] : memref<5x2x32x112xf32, #tpu.memory_space<vmem>>, vector<1x1x32x112xf32>
    %92 = vector.shape_cast %91 : vector<1x1x32x112xf32> to vector<32x112xf32>
    %cst_137 = arith.constant dense<0.000000e+00> : vector<7x112xf32>
    %93 = tpu.matmul %90, %92, %cst_137 {dimension_numbers = #tpu.dot_dimension_numbers<[1], [0], [0], [1], [0, 0, 1, 1], [], []>} : vector<7x32xf32>, vector<32x112xf32>, vector<7x112xf32> -> vector<7x112xf32>
    %c0_138 = arith.constant 0 : index
    %c2_139 = arith.constant 2 : index
    %c0_140 = arith.constant 0 : index
    %c0_141 = arith.constant 0 : index
    %94 = vector.load %arg1[%c0_138, %c2_139, %c0_140, %c0_141] : memref<1x4x8x32xf32, #tpu.memory_space<vmem>>, vector<1x1x7x32xf32>
    %95 = vector.shape_cast %94 : vector<1x1x7x32xf32> to vector<7x32xf32>
    %c1_142 = arith.constant 1 : index
    %c1_143 = arith.constant 1 : index
    %c0_144 = arith.constant 0 : index
    %c0_145 = arith.constant 0 : index
    %96 = vector.load %arg2[%c1_142, %c1_143, %c0_144, %c0_145] : memref<5x2x32x112xf32, #tpu.memory_space<vmem>>, vector<1x1x32x112xf32>
    %97 = vector.shape_cast %96 : vector<1x1x32x112xf32> to vector<32x112xf32>
    %cst_146 = arith.constant dense<0.000000e+00> : vector<7x112xf32>
    %98 = tpu.matmul %95, %97, %cst_146 {dimension_numbers = #tpu.dot_dimension_numbers<[1], [0], [0], [1], [0, 0, 1, 1], [], []>} : vector<7x32xf32>, vector<32x112xf32>, vector<7x112xf32> -> vector<7x112xf32>
    %99 = arith.addf %93, %98 : vector<7x112xf32>
    %c0_147 = arith.constant 0 : index
    %c3_148 = arith.constant 3 : index
    %c0_149 = arith.constant 0 : index
    %c0_150 = arith.constant 0 : index
    %100 = vector.load %arg1[%c0_147, %c3_148, %c0_149, %c0_150] : memref<1x4x8x32xf32, #tpu.memory_space<vmem>>, vector<1x1x7x32xf32>
    %101 = vector.shape_cast %100 : vector<1x1x7x32xf32> to vector<7x32xf32>
    %c2_151 = arith.constant 2 : index
    %c1_152 = arith.constant 1 : index
    %c0_153 = arith.constant 0 : index
    %c0_154 = arith.constant 0 : index
    %102 = vector.load %arg2[%c2_151, %c1_152, %c0_153, %c0_154] : memref<5x2x32x112xf32, #tpu.memory_space<vmem>>, vector<1x1x32x112xf32>
    %103 = vector.shape_cast %102 : vector<1x1x32x112xf32> to vector<32x112xf32>
    %cst_155 = arith.constant dense<0.000000e+00> : vector<7x112xf32>
    %104 = tpu.matmul %101, %103, %cst_155 {dimension_numbers = #tpu.dot_dimension_numbers<[1], [0], [0], [1], [0, 0, 1, 1], [], []>} : vector<7x32xf32>, vector<32x112xf32>, vector<7x112xf32> -> vector<7x112xf32>
    %105 = arith.addf %99, %104 : vector<7x112xf32>
    %c0_156 = arith.constant 0 : index
    %c0_157 = arith.constant 0 : index
    %c1_158 = arith.constant 1 : index
    %c0_159 = arith.constant 0 : index
    %106 = vector.load %arg1[%c0_156, %c0_157, %c1_158, %c0_159] : memref<1x4x8x32xf32, #tpu.memory_space<vmem>>, vector<1x1x7x32xf32>
    %107 = vector.shape_cast %106 : vector<1x1x7x32xf32> to vector<7x32xf32>
    %c3_160 = arith.constant 3 : index
    %c1_161 = arith.constant 1 : index
    %c0_162 = arith.constant 0 : index
    %c0_163 = arith.constant 0 : index
    %108 = vector.load %arg2[%c3_160, %c1_161, %c0_162, %c0_163] : memref<5x2x32x112xf32, #tpu.memory_space<vmem>>, vector<1x1x32x112xf32>
    %109 = vector.shape_cast %108 : vector<1x1x32x112xf32> to vector<32x112xf32>
    %cst_164 = arith.constant dense<0.000000e+00> : vector<7x112xf32>
    %110 = tpu.matmul %107, %109, %cst_164 {dimension_numbers = #tpu.dot_dimension_numbers<[1], [0], [0], [1], [0, 0, 1, 1], [], []>} : vector<7x32xf32>, vector<32x112xf32>, vector<7x112xf32> -> vector<7x112xf32>
    %111 = arith.addf %105, %110 : vector<7x112xf32>
    %c0_165 = arith.constant 0 : index
    %c1_166 = arith.constant 1 : index
    %c1_167 = arith.constant 1 : index
    %c0_168 = arith.constant 0 : index
    %112 = vector.load %arg1[%c0_165, %c1_166, %c1_167, %c0_168] : memref<1x4x8x32xf32, #tpu.memory_space<vmem>>, vector<1x1x7x32xf32>
    %113 = vector.shape_cast %112 : vector<1x1x7x32xf32> to vector<7x32xf32>
    %c4_169 = arith.constant 4 : index
    %c1_170 = arith.constant 1 : index
    %c0_171 = arith.constant 0 : index
    %c0_172 = arith.constant 0 : index
    %114 = vector.load %arg2[%c4_169, %c1_170, %c0_171, %c0_172] : memref<5x2x32x112xf32, #tpu.memory_space<vmem>>, vector<1x1x32x112xf32>
    %115 = vector.shape_cast %114 : vector<1x1x32x112xf32> to vector<32x112xf32>
    %cst_173 = arith.constant dense<0.000000e+00> : vector<7x112xf32>
    %116 = tpu.matmul %113, %115, %cst_173 {dimension_numbers = #tpu.dot_dimension_numbers<[1], [0], [0], [1], [0, 0, 1, 1], [], []>} : vector<7x32xf32>, vector<32x112xf32>, vector<7x112xf32> -> vector<7x112xf32>
    %117 = arith.addf %111, %116 : vector<7x112xf32>
    %118 = arith.maximumf %88, %117 : vector<7x112xf32>
    %c0_174 = arith.constant 0 : index
    %c0_175 = arith.constant 0 : index
    %119 = vector.load %arg3[%c0_174, %c0_175] : memref<1x112xf32, #tpu.memory_space<vmem>>, vector<1x112xf32>
    %120 = vector.broadcast %119 : vector<1x112xf32> to vector<7x112xf32>
    %121 = arith.addf %118, %120 : vector<7x112xf32>
    %cst_176 = arith.constant 0.000000e+00 : f32
    %122 = vector.broadcast %cst_176 : f32 to vector<7x112xf32>
    %123 = arith.maximumf %121, %122 : vector<7x112xf32>
    %c0_177 = arith.constant 0 : index
    %c0_178 = arith.constant 0 : index
    %c0_179 = arith.constant 0 : index
    %124 = vector.load %arg13[%c0_177, %c0_178, %c0_179] : memref<2x7x112xf32, #tpu.memory_space<vmem>>, vector<1x7x112xf32>
    %125 = vector.shape_cast %124 : vector<1x7x112xf32> to vector<7x112xf32>
    %126 = vector.shape_cast %123 : vector<7x112xf32> to vector<1x7x112xf32>
    tpu.vector_store %arg13[%c0_177, %c0_178, %c0_179], %126 {strides = array<i32>} : memref<2x7x112xf32, #tpu.memory_space<vmem>>, vector<1x7x112xf32>,
    %c0_180 = arith.constant 0 : index
    %c2_181 = arith.constant 2 : index
    %c0_182 = arith.constant 0 : index
    %c0_183 = arith.constant 0 : index
    %127 = vector.load %arg1[%c0_180, %c2_181, %c0_182, %c0_183] : memref<1x4x8x32xf32, #tpu.memory_space<vmem>>, vector<1x1x7x32xf32>
    %128 = vector.shape_cast %127 : vector<1x1x7x32xf32> to vector<7x32xf32>
    %c0_184 = arith.constant 0 : index
    %c0_185 = arith.constant 0 : index
    %c0_186 = arith.constant 0 : index
    %c0_187 = arith.constant 0 : index
    %129 = vector.load %arg2[%c0_184, %c0_185, %c0_186, %c0_187] : memref<5x2x32x112xf32, #tpu.memory_space<vmem>>, vector<1x1x32x112xf32>
    %130 = vector.shape_cast %129 : vector<1x1x32x112xf32> to vector<32x112xf32>
    %cst_188 = arith.constant dense<0.000000e+00> : vector<7x112xf32>
    %131 = tpu.matmul %128, %130, %cst_188 {dimension_numbers = #tpu.dot_dimension_numbers<[1], [0], [0], [1], [0, 0, 1, 1], [], []>} : vector<7x32xf32>, vector<32x112xf32>, vector<7x112xf32> -> vector<7x112xf32>
    %c0_189 = arith.constant 0 : index
    %c3_190 = arith.constant 3 : index
    %c0_191 = arith.constant 0 : index
    %c0_192 = arith.constant 0 : index
    %132 = vector.load %arg1[%c0_189, %c3_190, %c0_191, %c0_192] : memref<1x4x8x32xf32, #tpu.memory_space<vmem>>, vector<1x1x7x32xf32>
    %133 = vector.shape_cast %132 : vector<1x1x7x32xf32> to vector<7x32xf32>
    %c1_193 = arith.constant 1 : index
    %c0_194 = arith.constant 0 : index
    %c0_195 = arith.constant 0 : index
    %c0_196 = arith.constant 0 : index
    %134 = vector.load %arg2[%c1_193, %c0_194, %c0_195, %c0_196] : memref<5x2x32x112xf32, #tpu.memory_space<vmem>>, vector<1x1x32x112xf32>
    %135 = vector.shape_cast %134 : vector<1x1x32x112xf32> to vector<32x112xf32>
    %cst_197 = arith.constant dense<0.000000e+00> : vector<7x112xf32>
    %136 = tpu.matmul %133, %135, %cst_197 {dimension_numbers = #tpu.dot_dimension_numbers<[1], [0], [0], [1], [0, 0, 1, 1], [], []>} : vector<7x32xf32>, vector<32x112xf32>, vector<7x112xf32> -> vector<7x112xf32>
    %137 = arith.addf %131, %136 : vector<7x112xf32>
    %c0_198 = arith.constant 0 : index
    %c0_199 = arith.constant 0 : index
    %c1_200 = arith.constant 1 : index
    %c0_201 = arith.constant 0 : index
    %138 = vector.load %arg1[%c0_198, %c0_199, %c1_200, %c0_201] : memref<1x4x8x32xf32, #tpu.memory_space<vmem>>, vector<1x1x7x32xf32>
    %139 = vector.shape_cast %138 : vector<1x1x7x32xf32> to vector<7x32xf32>
    %c2_202 = arith.constant 2 : index
    %c0_203 = arith.constant 0 : index
    %c0_204 = arith.constant 0 : index
    %c0_205 = arith.constant 0 : index
    %140 = vector.load %arg2[%c2_202, %c0_203, %c0_204, %c0_205] : memref<5x2x32x112xf32, #tpu.memory_space<vmem>>, vector<1x1x32x112xf32>
    %141 = vector.shape_cast %140 : vector<1x1x32x112xf32> to vector<32x112xf32>
    %cst_206 = arith.constant dense<0.000000e+00> : vector<7x112xf32>
    %142 = tpu.matmul %139, %141, %cst_206 {dimension_numbers = #tpu.dot_dimension_numbers<[1], [0], [0], [1], [0, 0, 1, 1], [], []>} : vector<7x32xf32>, vector<32x112xf32>, vector<7x112xf32> -> vector<7x112xf32>
    %143 = arith.addf %137, %142 : vector<7x112xf32>
    %c0_207 = arith.constant 0 : index
    %c1_208 = arith.constant 1 : index
    %c1_209 = arith.constant 1 : index
    %c0_210 = arith.constant 0 : index
    %144 = vector.load %arg1[%c0_207, %c1_208, %c1_209, %c0_210] : memref<1x4x8x32xf32, #tpu.memory_space<vmem>>, vector<1x1x7x32xf32>
    %145 = vector.shape_cast %144 : vector<1x1x7x32xf32> to vector<7x32xf32>
    %c3_211 = arith.constant 3 : index
    %c0_212 = arith.constant 0 : index
    %c0_213 = arith.constant 0 : index
    %c0_214 = arith.constant 0 : index
    %146 = vector.load %arg2[%c3_211, %c0_212, %c0_213, %c0_214] : memref<5x2x32x112xf32, #tpu.memory_space<vmem>>, vector<1x1x32x112xf32>
    %147 = vector.shape_cast %146 : vector<1x1x32x112xf32> to vector<32x112xf32>
    %cst_215 = arith.constant dense<0.000000e+00> : vector<7x112xf32>
    %148 = tpu.matmul %145, %147, %cst_215 {dimension_numbers = #tpu.dot_dimension_numbers<[1], [0], [0], [1], [0, 0, 1, 1], [], []>} : vector<7x32xf32>, vector<32x112xf32>, vector<7x112xf32> -> vector<7x112xf32>
    %149 = arith.addf %143, %148 : vector<7x112xf32>
    %c0_216 = arith.constant 0 : index
    %c2_217 = arith.constant 2 : index
    %c1_218 = arith.constant 1 : index
    %c0_219 = arith.constant 0 : index
    %150 = vector.load %arg1[%c0_216, %c2_217, %c1_218, %c0_219] : memref<1x4x8x32xf32, #tpu.memory_space<vmem>>, vector<1x1x7x32xf32>
    %151 = vector.shape_cast %150 : vector<1x1x7x32xf32> to vector<7x32xf32>
    %c4_220 = arith.constant 4 : index
    %c0_221 = arith.constant 0 : index
    %c0_222 = arith.constant 0 : index
    %c0_223 = arith.constant 0 : index
    %152 = vector.load %arg2[%c4_220, %c0_221, %c0_222, %c0_223] : memref<5x2x32x112xf32, #tpu.memory_space<vmem>>, vector<1x1x32x112xf32>
    %153 = vector.shape_cast %152 : vector<1x1x32x112xf32> to vector<32x112xf32>
    %cst_224 = arith.constant dense<0.000000e+00> : vector<7x112xf32>
    %154 = tpu.matmul %151, %153, %cst_224 {dimension_numbers = #tpu.dot_dimension_numbers<[1], [0], [0], [1], [0, 0, 1, 1], [], []>} : vector<7x32xf32>, vector<32x112xf32>, vector<7x112xf32> -> vector<7x112xf32>
    %155 = arith.addf %149, %154 : vector<7x112xf32>
    %c0_225 = arith.constant 0 : index
    %c2_226 = arith.constant 2 : index
    %c0_227 = arith.constant 0 : index
    %c0_228 = arith.constant 0 : index
    %156 = vector.load %arg1[%c0_225, %c2_226, %c0_227, %c0_228] : memref<1x4x8x32xf32, #tpu.memory_space<vmem>>, vector<1x1x7x32xf32>
    %157 = vector.shape_cast %156 : vector<1x1x7x32xf32> to vector<7x32xf32>
    %c0_229 = arith.constant 0 : index
    %c1_230 = arith.constant 1 : index
    %c0_231 = arith.constant 0 : index
    %c0_232 = arith.constant 0 : index
    %158 = vector.load %arg2[%c0_229, %c1_230, %c0_231, %c0_232] : memref<5x2x32x112xf32, #tpu.memory_space<vmem>>, vector<1x1x32x112xf32>
    %159 = vector.shape_cast %158 : vector<1x1x32x112xf32> to vector<32x112xf32>
    %cst_233 = arith.constant dense<0.000000e+00> : vector<7x112xf32>
    %160 = tpu.matmul %157, %159, %cst_233 {dimension_numbers = #tpu.dot_dimension_numbers<[1], [0], [0], [1], [0, 0, 1, 1], [], []>} : vector<7x32xf32>, vector<32x112xf32>, vector<7x112xf32> -> vector<7x112xf32>
    %c0_234 = arith.constant 0 : index
    %c3_235 = arith.constant 3 : index
    %c0_236 = arith.constant 0 : index
    %c0_237 = arith.constant 0 : index
    %161 = vector.load %arg1[%c0_234, %c3_235, %c0_236, %c0_237] : memref<1x4x8x32xf32, #tpu.memory_space<vmem>>, vector<1x1x7x32xf32>
    %162 = vector.shape_cast %161 : vector<1x1x7x32xf32> to vector<7x32xf32>
    %c1_238 = arith.constant 1 : index
    %c1_239 = arith.constant 1 : index
    %c0_240 = arith.constant 0 : index
    %c0_241 = arith.constant 0 : index
    %163 = vector.load %arg2[%c1_238, %c1_239, %c0_240, %c0_241] : memref<5x2x32x112xf32, #tpu.memory_space<vmem>>, vector<1x1x32x112xf32>
    %164 = vector.shape_cast %163 : vector<1x1x32x112xf32> to vector<32x112xf32>
    %cst_242 = arith.constant dense<0.000000e+00> : vector<7x112xf32>
    %165 = tpu.matmul %162, %164, %cst_242 {dimension_numbers = #tpu.dot_dimension_numbers<[1], [0], [0], [1], [0, 0, 1, 1], [], []>} : vector<7x32xf32>, vector<32x112xf32>, vector<7x112xf32> -> vector<7x112xf32>
    %166 = arith.addf %160, %165 : vector<7x112xf32>
    %c0_243 = arith.constant 0 : index
    %c0_244 = arith.constant 0 : index
    %c1_245 = arith.constant 1 : index
    %c0_246 = arith.constant 0 : index
    %167 = vector.load %arg1[%c0_243, %c0_244, %c1_245, %c0_246] : memref<1x4x8x32xf32, #tpu.memory_space<vmem>>, vector<1x1x7x32xf32>
    %168 = vector.shape_cast %167 : vector<1x1x7x32xf32> to vector<7x32xf32>
    %c2_247 = arith.constant 2 : index
    %c1_248 = arith.constant 1 : index
    %c0_249 = arith.constant 0 : index
    %c0_250 = arith.constant 0 : index
    %169 = vector.load %arg2[%c2_247, %c1_248, %c0_249, %c0_250] : memref<5x2x32x112xf32, #tpu.memory_space<vmem>>, vector<1x1x32x112xf32>
    %170 = vector.shape_cast %169 : vector<1x1x32x112xf32> to vector<32x112xf32>
    %cst_251 = arith.constant dense<0.000000e+00> : vector<7x112xf32>
    %171 = tpu.matmul %168, %170, %cst_251 {dimension_numbers = #tpu.dot_dimension_numbers<[1], [0], [0], [1], [0, 0, 1, 1], [], []>} : vector<7x32xf32>, vector<32x112xf32>, vector<7x112xf32> -> vector<7x112xf32>
    %172 = arith.addf %166, %171 : vector<7x112xf32>
    %c0_252 = arith.constant 0 : index
    %c1_253 = arith.constant 1 : index
    %c1_254 = arith.constant 1 : index
    %c0_255 = arith.constant 0 : index
    %173 = vector.load %arg1[%c0_252, %c1_253, %c1_254, %c0_255] : memref<1x4x8x32xf32, #tpu.memory_space<vmem>>, vector<1x1x7x32xf32>
    %174 = vector.shape_cast %173 : vector<1x1x7x32xf32> to vector<7x32xf32>
    %c3_256 = arith.constant 3 : index
    %c1_257 = arith.constant 1 : index
    %c0_258 = arith.constant 0 : index
    %c0_259 = arith.constant 0 : index
    %175 = vector.load %arg2[%c3_256, %c1_257, %c0_258, %c0_259] : memref<5x2x32x112xf32, #tpu.memory_space<vmem>>, vector<1x1x32x112xf32>
    %176 = vector.shape_cast %175 : vector<1x1x32x112xf32> to vector<32x112xf32>
    %cst_260 = arith.constant dense<0.000000e+00> : vector<7x112xf32>
    %177 = tpu.matmul %174, %176, %cst_260 {dimension_numbers = #tpu.dot_dimension_numbers<[1], [0], [0], [1], [0, 0, 1, 1], [], []>} : vector<7x32xf32>, vector<32x112xf32>, vector<7x112xf32> -> vector<7x112xf32>
    %178 = arith.addf %172, %177 : vector<7x112xf32>
    %c0_261 = arith.constant 0 : index
    %c2_262 = arith.constant 2 : index
    %c1_263 = arith.constant 1 : index
    %c0_264 = arith.constant 0 : index
    %179 = vector.load %arg1[%c0_261, %c2_262, %c1_263, %c0_264] : memref<1x4x8x32xf32, #tpu.memory_space<vmem>>, vector<1x1x7x32xf32>
    %180 = vector.shape_cast %179 : vector<1x1x7x32xf32> to vector<7x32xf32>
    %c4_265 = arith.constant 4 : index
    %c1_266 = arith.constant 1 : index
    %c0_267 = arith.constant 0 : index
    %c0_268 = arith.constant 0 : index
    %181 = vector.load %arg2[%c4_265, %c1_266, %c0_267, %c0_268] : memref<5x2x32x112xf32, #tpu.memory_space<vmem>>, vector<1x1x32x112xf32>
    %182 = vector.shape_cast %181 : vector<1x1x32x112xf32> to vector<32x112xf32>
    %cst_269 = arith.constant dense<0.000000e+00> : vector<7x112xf32>
    %183 = tpu.matmul %180, %182, %cst_269 {dimension_numbers = #tpu.dot_dimension_numbers<[1], [0], [0], [1], [0, 0, 1, 1], [], []>} : vector<7x32xf32>, vector<32x112xf32>, vector<7x112xf32> -> vector<7x112xf32>
    %184 = arith.addf %178, %183 : vector<7x112xf32>
    %185 = arith.maximumf %155, %184 : vector<7x112xf32>
    %c0_270 = arith.constant 0 : index
    %c3_271 = arith.constant 3 : index
    %c0_272 = arith.constant 0 : index
    %c0_273 = arith.constant 0 : index
    %186 = vector.load %arg1[%c0_270, %c3_271, %c0_272, %c0_273] : memref<1x4x8x32xf32, #tpu.memory_space<vmem>>, vector<1x1x7x32xf32>
    %187 = vector.shape_cast %186 : vector<1x1x7x32xf32> to vector<7x32xf32>
    %c0_274 = arith.constant 0 : index
    %c0_275 = arith.constant 0 : index
    %c0_276 = arith.constant 0 : index
    %c0_277 = arith.constant 0 : index
    %188 = vector.load %arg2[%c0_274, %c0_275, %c0_276, %c0_277] : memref<5x2x32x112xf32, #tpu.memory_space<vmem>>, vector<1x1x32x112xf32>
    %189 = vector.shape_cast %188 : vector<1x1x32x112xf32> to vector<32x112xf32>
    %cst_278 = arith.constant dense<0.000000e+00> : vector<7x112xf32>
    %190 = tpu.matmul %187, %189, %cst_278 {dimension_numbers = #tpu.dot_dimension_numbers<[1], [0], [0], [1], [0, 0, 1, 1], [], []>} : vector<7x32xf32>, vector<32x112xf32>, vector<7x112xf32> -> vector<7x112xf32>
    %c0_279 = arith.constant 0 : index
    %c0_280 = arith.constant 0 : index
    %c1_281 = arith.constant 1 : index
    %c0_282 = arith.constant 0 : index
    %191 = vector.load %arg1[%c0_279, %c0_280, %c1_281, %c0_282] : memref<1x4x8x32xf32, #tpu.memory_space<vmem>>, vector<1x1x7x32xf32>
    %192 = vector.shape_cast %191 : vector<1x1x7x32xf32> to vector<7x32xf32>
    %c1_283 = arith.constant 1 : index
    %c0_284 = arith.constant 0 : index
    %c0_285 = arith.constant 0 : index
    %c0_286 = arith.constant 0 : index
    %193 = vector.load %arg2[%c1_283, %c0_284, %c0_285, %c0_286] : memref<5x2x32x112xf32, #tpu.memory_space<vmem>>, vector<1x1x32x112xf32>
    %194 = vector.shape_cast %193 : vector<1x1x32x112xf32> to vector<32x112xf32>
    %cst_287 = arith.constant dense<0.000000e+00> : vector<7x112xf32>
    %195 = tpu.matmul %192, %194, %cst_287 {dimension_numbers = #tpu.dot_dimension_numbers<[1], [0], [0], [1], [0, 0, 1, 1], [], []>} : vector<7x32xf32>, vector<32x112xf32>, vector<7x112xf32> -> vector<7x112xf32>
    %196 = arith.addf %190, %195 : vector<7x112xf32>
    %c0_288 = arith.constant 0 : index
    %c1_289 = arith.constant 1 : index
    %c1_290 = arith.constant 1 : index
    %c0_291 = arith.constant 0 : index
    %197 = vector.load %arg1[%c0_288, %c1_289, %c1_290, %c0_291] : memref<1x4x8x32xf32, #tpu.memory_space<vmem>>, vector<1x1x7x32xf32>
    %198 = vector.shape_cast %197 : vector<1x1x7x32xf32> to vector<7x32xf32>
    %c2_292 = arith.constant 2 : index
    %c0_293 = arith.constant 0 : index
    %c0_294 = arith.constant 0 : index
    %c0_295 = arith.constant 0 : index
    %199 = vector.load %arg2[%c2_292, %c0_293, %c0_294, %c0_295] : memref<5x2x32x112xf32, #tpu.memory_space<vmem>>, vector<1x1x32x112xf32>
    %200 = vector.shape_cast %199 : vector<1x1x32x112xf32> to vector<32x112xf32>
    %cst_296 = arith.constant dense<0.000000e+00> : vector<7x112xf32>
    %201 = tpu.matmul %198, %200, %cst_296 {dimension_numbers = #tpu.dot_dimension_numbers<[1], [0], [0], [1], [0, 0, 1, 1], [], []>} : vector<7x32xf32>, vector<32x112xf32>, vector<7x112xf32> -> vector<7x112xf32>
    %202 = arith.addf %196, %201 : vector<7x112xf32>
    %c0_297 = arith.constant 0 : index
    %c2_298 = arith.constant 2 : index
    %c1_299 = arith.constant 1 : index
    %c0_300 = arith.constant 0 : index
    %203 = vector.load %arg1[%c0_297, %c2_298, %c1_299, %c0_300] : memref<1x4x8x32xf32, #tpu.memory_space<vmem>>, vector<1x1x7x32xf32>
    %204 = vector.shape_cast %203 : vector<1x1x7x32xf32> to vector<7x32xf32>
    %c3_301 = arith.constant 3 : index
    %c0_302 = arith.constant 0 : index
    %c0_303 = arith.constant 0 : index
    %c0_304 = arith.constant 0 : index
    %205 = vector.load %arg2[%c3_301, %c0_302, %c0_303, %c0_304] : memref<5x2x32x112xf32, #tpu.memory_space<vmem>>, vector<1x1x32x112xf32>
    %206 = vector.shape_cast %205 : vector<1x1x32x112xf32> to vector<32x112xf32>
    %cst_305 = arith.constant dense<0.000000e+00> : vector<7x112xf32>
    %207 = tpu.matmul %204, %206, %cst_305 {dimension_numbers = #tpu.dot_dimension_numbers<[1], [0], [0], [1], [0, 0, 1, 1], [], []>} : vector<7x32xf32>, vector<32x112xf32>, vector<7x112xf32> -> vector<7x112xf32>
    %208 = arith.addf %202, %207 : vector<7x112xf32>
    %c0_306 = arith.constant 0 : index
    %c3_307 = arith.constant 3 : index
    %c1_308 = arith.constant 1 : index
    %c0_309 = arith.constant 0 : index
    %209 = vector.load %arg1[%c0_306, %c3_307, %c1_308, %c0_309] : memref<1x4x8x32xf32, #tpu.memory_space<vmem>>, vector<1x1x7x32xf32>
    %210 = vector.shape_cast %209 : vector<1x1x7x32xf32> to vector<7x32xf32>
    %c4_310 = arith.constant 4 : index
    %c0_311 = arith.constant 0 : index
    %c0_312 = arith.constant 0 : index
    %c0_313 = arith.constant 0 : index
    %211 = vector.load %arg2[%c4_310, %c0_311, %c0_312, %c0_313] : memref<5x2x32x112xf32, #tpu.memory_space<vmem>>, vector<1x1x32x112xf32>
    %212 = vector.shape_cast %211 : vector<1x1x32x112xf32> to vector<32x112xf32>
    %cst_314 = arith.constant dense<0.000000e+00> : vector<7x112xf32>
    %213 = tpu.matmul %210, %212, %cst_314 {dimension_numbers = #tpu.dot_dimension_numbers<[1], [0], [0], [1], [0, 0, 1, 1], [], []>} : vector<7x32xf32>, vector<32x112xf32>, vector<7x112xf32> -> vector<7x112xf32>
    %214 = arith.addf %208, %213 : vector<7x112xf32>
    %215 = arith.maximumf %185, %214 : vector<7x112xf32>
    %c0_315 = arith.constant 0 : index
    %c3_316 = arith.constant 3 : index
    %c0_317 = arith.constant 0 : index
    %c0_318 = arith.constant 0 : index
    %216 = vector.load %arg1[%c0_315, %c3_316, %c0_317, %c0_318] : memref<1x4x8x32xf32, #tpu.memory_space<vmem>>, vector<1x1x7x32xf32>
    %217 = vector.shape_cast %216 : vector<1x1x7x32xf32> to vector<7x32xf32>
    %c0_319 = arith.constant 0 : index
    %c1_320 = arith.constant 1 : index
    %c0_321 = arith.constant 0 : index
    %c0_322 = arith.constant 0 : index
    %218 = vector.load %arg2[%c0_319, %c1_320, %c0_321, %c0_322] : memref<5x2x32x112xf32, #tpu.memory_space<vmem>>, vector<1x1x32x112xf32>
    %219 = vector.shape_cast %218 : vector<1x1x32x112xf32> to vector<32x112xf32>
    %cst_323 = arith.constant dense<0.000000e+00> : vector<7x112xf32>
    %220 = tpu.matmul %217, %219, %cst_323 {dimension_numbers = #tpu.dot_dimension_numbers<[1], [0], [0], [1], [0, 0, 1, 1], [], []>} : vector<7x32xf32>, vector<32x112xf32>, vector<7x112xf32> -> vector<7x112xf32>
    %c0_324 = arith.constant 0 : index
    %c0_325 = arith.constant 0 : index
    %c1_326 = arith.constant 1 : index
    %c0_327 = arith.constant 0 : index
    %221 = vector.load %arg1[%c0_324, %c0_325, %c1_326, %c0_327] : memref<1x4x8x32xf32, #tpu.memory_space<vmem>>, vector<1x1x7x32xf32>
    %222 = vector.shape_cast %221 : vector<1x1x7x32xf32> to vector<7x32xf32>
    %c1_328 = arith.constant 1 : index
    %c1_329 = arith.constant 1 : index
    %c0_330 = arith.constant 0 : index
    %c0_331 = arith.constant 0 : index
    %223 = vector.load %arg2[%c1_328, %c1_329, %c0_330, %c0_331] : memref<5x2x32x112xf32, #tpu.memory_space<vmem>>, vector<1x1x32x112xf32>
    %224 = vector.shape_cast %223 : vector<1x1x32x112xf32> to vector<32x112xf32>
    %cst_332 = arith.constant dense<0.000000e+00> : vector<7x112xf32>
    %225 = tpu.matmul %222, %224, %cst_332 {dimension_numbers = #tpu.dot_dimension_numbers<[1], [0], [0], [1], [0, 0, 1, 1], [], []>} : vector<7x32xf32>, vector<32x112xf32>, vector<7x112xf32> -> vector<7x112xf32>
    %226 = arith.addf %220, %225 : vector<7x112xf32>
    %c0_333 = arith.constant 0 : index
    %c1_334 = arith.constant 1 : index
    %c1_335 = arith.constant 1 : index
    %c0_336 = arith.constant 0 : index
    %227 = vector.load %arg1[%c0_333, %c1_334, %c1_335, %c0_336] : memref<1x4x8x32xf32, #tpu.memory_space<vmem>>, vector<1x1x7x32xf32>
    %228 = vector.shape_cast %227 : vector<1x1x7x32xf32> to vector<7x32xf32>
    %c2_337 = arith.constant 2 : index
    %c1_338 = arith.constant 1 : index
    %c0_339 = arith.constant 0 : index
    %c0_340 = arith.constant 0 : index
    %229 = vector.load %arg2[%c2_337, %c1_338, %c0_339, %c0_340] : memref<5x2x32x112xf32, #tpu.memory_space<vmem>>, vector<1x1x32x112xf32>
    %230 = vector.shape_cast %229 : vector<1x1x32x112xf32> to vector<32x112xf32>
    %cst_341 = arith.constant dense<0.000000e+00> : vector<7x112xf32>
    %231 = tpu.matmul %228, %230, %cst_341 {dimension_numbers = #tpu.dot_dimension_numbers<[1], [0], [0], [1], [0, 0, 1, 1], [], []>} : vector<7x32xf32>, vector<32x112xf32>, vector<7x112xf32> -> vector<7x112xf32>
    %232 = arith.addf %226, %231 : vector<7x112xf32>
    %c0_342 = arith.constant 0 : index
    %c2_343 = arith.constant 2 : index
    %c1_344 = arith.constant 1 : index
    %c0_345 = arith.constant 0 : index
    %233 = vector.load %arg1[%c0_342, %c2_343, %c1_344, %c0_345] : memref<1x4x8x32xf32, #tpu.memory_space<vmem>>, vector<1x1x7x32xf32>
    %234 = vector.shape_cast %233 : vector<1x1x7x32xf32> to vector<7x32xf32>
    %c3_346 = arith.constant 3 : index
    %c1_347 = arith.constant 1 : index
    %c0_348 = arith.constant 0 : index
    %c0_349 = arith.constant 0 : index
    %235 = vector.load %arg2[%c3_346, %c1_347, %c0_348, %c0_349] : memref<5x2x32x112xf32, #tpu.memory_space<vmem>>, vector<1x1x32x112xf32>
    %236 = vector.shape_cast %235 : vector<1x1x32x112xf32> to vector<32x112xf32>
    %cst_350 = arith.constant dense<0.000000e+00> : vector<7x112xf32>
    %237 = tpu.matmul %234, %236, %cst_350 {dimension_numbers = #tpu.dot_dimension_numbers<[1], [0], [0], [1], [0, 0, 1, 1], [], []>} : vector<7x32xf32>, vector<32x112xf32>, vector<7x112xf32> -> vector<7x112xf32>
    %238 = arith.addf %232, %237 : vector<7x112xf32>
    %c0_351 = arith.constant 0 : index
    %c3_352 = arith.constant 3 : index
    %c1_353 = arith.constant 1 : index
    %c0_354 = arith.constant 0 : index
    %239 = vector.load %arg1[%c0_351, %c3_352, %c1_353, %c0_354] : memref<1x4x8x32xf32, #tpu.memory_space<vmem>>, vector<1x1x7x32xf32>
    %240 = vector.shape_cast %239 : vector<1x1x7x32xf32> to vector<7x32xf32>
    %c4_355 = arith.constant 4 : index
    %c1_356 = arith.constant 1 : index
    %c0_357 = arith.constant 0 : index
    %c0_358 = arith.constant 0 : index
    %241 = vector.load %arg2[%c4_355, %c1_356, %c0_357, %c0_358] : memref<5x2x32x112xf32, #tpu.memory_space<vmem>>, vector<1x1x32x112xf32>
    %242 = vector.shape_cast %241 : vector<1x1x32x112xf32> to vector<32x112xf32>
    %cst_359 = arith.constant dense<0.000000e+00> : vector<7x112xf32>
    %243 = tpu.matmul %240, %242, %cst_359 {dimension_numbers = #tpu.dot_dimension_numbers<[1], [0], [0], [1], [0, 0, 1, 1], [], []>} : vector<7x32xf32>, vector<32x112xf32>, vector<7x112xf32> -> vector<7x112xf32>
    %244 = arith.addf %238, %243 : vector<7x112xf32>
    %245 = arith.maximumf %215, %244 : vector<7x112xf32>
    %c0_360 = arith.constant 0 : index
    %c0_361 = arith.constant 0 : index
    %246 = vector.load %arg3[%c0_360, %c0_361] : memref<1x112xf32, #tpu.memory_space<vmem>>, vector<1x112xf32>
    %247 = vector.broadcast %246 : vector<1x112xf32> to vector<7x112xf32>
    %248 = arith.addf %245, %247 : vector<7x112xf32>
    %cst_362 = arith.constant 0.000000e+00 : f32
    %249 = vector.broadcast %cst_362 : f32 to vector<7x112xf32>
    %250 = arith.maximumf %248, %249 : vector<7x112xf32>
    %c1_363 = arith.constant 1 : index
    %c0_364 = arith.constant 0 : index
    %c0_365 = arith.constant 0 : index
    %251 = vector.load %arg13[%c1_363, %c0_364, %c0_365] : memref<2x7x112xf32, #tpu.memory_space<vmem>>, vector<1x7x112xf32>
    %252 = vector.shape_cast %251 : vector<1x7x112xf32> to vector<7x112xf32>
    %253 = vector.shape_cast %250 : vector<7x112xf32> to vector<1x7x112xf32>
    tpu.vector_store %arg13[%c1_363, %c0_364, %c0_365], %253 {strides = array<i32>} : memref<2x7x112xf32, #tpu.memory_space<vmem>>, vector<1x7x112xf32>,
    %c0_366 = arith.constant 0 : index
    %c0_367 = arith.constant 0 : index
    %c0_368 = arith.constant 0 : index
    %254 = vector.load %arg13[%c0_366, %c0_367, %c0_368] : memref<2x7x112xf32, #tpu.memory_space<vmem>>, vector<1x5x112xf32>
    %255 = vector.shape_cast %254 : vector<1x5x112xf32> to vector<5x112xf32>
    %c0_369 = arith.constant 0 : index
    %c0_370 = arith.constant 0 : index
    %c0_371 = arith.constant 0 : index
    %c0_372 = arith.constant 0 : index
    %256 = vector.load %arg4[%c0_369, %c0_370, %c0_371, %c0_372] : memref<5x2x112x80xf32, #tpu.memory_space<vmem>>, vector<1x1x112x80xf32>
    %257 = vector.shape_cast %256 : vector<1x1x112x80xf32> to vector<112x80xf32>
    %cst_373 = arith.constant dense<0.000000e+00> : vector<5x80xf32>
    %258 = tpu.matmul %255, %257, %cst_373 {dimension_numbers = #tpu.dot_dimension_numbers<[1], [0], [0], [1], [0, 0, 1, 1], [], []>} : vector<5x112xf32>, vector<112x80xf32>, vector<5x80xf32> -> vector<5x80xf32>
    %c1_374 = arith.constant 1 : index
    %c0_375 = arith.constant 0 : index
    %c0_376 = arith.constant 0 : index
    %259 = vector.load %arg13[%c1_374, %c0_375, %c0_376] : memref<2x7x112xf32, #tpu.memory_space<vmem>>, vector<1x5x112xf32>
    %260 = vector.shape_cast %259 : vector<1x5x112xf32> to vector<5x112xf32>
    %c1_377 = arith.constant 1 : index
    %c0_378 = arith.constant 0 : index
    %c0_379 = arith.constant 0 : index
    %c0_380 = arith.constant 0 : index
    %261 = vector.load %arg4[%c1_377, %c0_378, %c0_379, %c0_380] : memref<5x2x112x80xf32, #tpu.memory_space<vmem>>, vector<1x1x112x80xf32>
    %262 = vector.shape_cast %261 : vector<1x1x112x80xf32> to vector<112x80xf32>
    %cst_381 = arith.constant dense<0.000000e+00> : vector<5x80xf32>
    %263 = tpu.matmul %260, %262, %cst_381 {dimension_numbers = #tpu.dot_dimension_numbers<[1], [0], [0], [1], [0, 0, 1, 1], [], []>} : vector<5x112xf32>, vector<112x80xf32>, vector<5x80xf32> -> vector<5x80xf32>
    %264 = arith.addf %258, %263 : vector<5x80xf32>
    %c0_382 = arith.constant 0 : index
    %c1_383 = arith.constant 1 : index
    %c0_384 = arith.constant 0 : index
    %265 = vector.load %arg13[%c0_382, %c1_383, %c0_384] : memref<2x7x112xf32, #tpu.memory_space<vmem>>, vector<1x5x112xf32>
    %266 = vector.shape_cast %265 : vector<1x5x112xf32> to vector<5x112xf32>
    %c2_385 = arith.constant 2 : index
    %c0_386 = arith.constant 0 : index
    %c0_387 = arith.constant 0 : index
    %c0_388 = arith.constant 0 : index
    %267 = vector.load %arg4[%c2_385, %c0_386, %c0_387, %c0_388] : memref<5x2x112x80xf32, #tpu.memory_space<vmem>>, vector<1x1x112x80xf32>
    %268 = vector.shape_cast %267 : vector<1x1x112x80xf32> to vector<112x80xf32>
    %cst_389 = arith.constant dense<0.000000e+00> : vector<5x80xf32>
    %269 = tpu.matmul %266, %268, %cst_389 {dimension_numbers = #tpu.dot_dimension_numbers<[1], [0], [0], [1], [0, 0, 1, 1], [], []>} : vector<5x112xf32>, vector<112x80xf32>, vector<5x80xf32> -> vector<5x80xf32>
    %270 = arith.addf %264, %269 : vector<5x80xf32>
    %c1_390 = arith.constant 1 : index
    %c1_391 = arith.constant 1 : index
    %c0_392 = arith.constant 0 : index
    %271 = vector.load %arg13[%c1_390, %c1_391, %c0_392] : memref<2x7x112xf32, #tpu.memory_space<vmem>>, vector<1x5x112xf32>
    %272 = vector.shape_cast %271 : vector<1x5x112xf32> to vector<5x112xf32>
    %c3_393 = arith.constant 3 : index
    %c0_394 = arith.constant 0 : index
    %c0_395 = arith.constant 0 : index
    %c0_396 = arith.constant 0 : index
    %273 = vector.load %arg4[%c3_393, %c0_394, %c0_395, %c0_396] : memref<5x2x112x80xf32, #tpu.memory_space<vmem>>, vector<1x1x112x80xf32>
    %274 = vector.shape_cast %273 : vector<1x1x112x80xf32> to vector<112x80xf32>
    %cst_397 = arith.constant dense<0.000000e+00> : vector<5x80xf32>
    %275 = tpu.matmul %272, %274, %cst_397 {dimension_numbers = #tpu.dot_dimension_numbers<[1], [0], [0], [1], [0, 0, 1, 1], [], []>} : vector<5x112xf32>, vector<112x80xf32>, vector<5x80xf32> -> vector<5x80xf32>
    %276 = arith.addf %270, %275 : vector<5x80xf32>
    %c0_398 = arith.constant 0 : index
    %c2_399 = arith.constant 2 : index
    %c0_400 = arith.constant 0 : index
    %277 = vector.load %arg13[%c0_398, %c2_399, %c0_400] : memref<2x7x112xf32, #tpu.memory_space<vmem>>, vector<1x5x112xf32>
    %278 = vector.shape_cast %277 : vector<1x5x112xf32> to vector<5x112xf32>
    %c4_401 = arith.constant 4 : index
    %c0_402 = arith.constant 0 : index
    %c0_403 = arith.constant 0 : index
    %c0_404 = arith.constant 0 : index
    %279 = vector.load %arg4[%c4_401, %c0_402, %c0_403, %c0_404] : memref<5x2x112x80xf32, #tpu.memory_space<vmem>>, vector<1x1x112x80xf32>
    %280 = vector.shape_cast %279 : vector<1x1x112x80xf32> to vector<112x80xf32>
    %cst_405 = arith.constant dense<0.000000e+00> : vector<5x80xf32>
    %281 = tpu.matmul %278, %280, %cst_405 {dimension_numbers = #tpu.dot_dimension_numbers<[1], [0], [0], [1], [0, 0, 1, 1], [], []>} : vector<5x112xf32>, vector<112x80xf32>, vector<5x80xf32> -> vector<5x80xf32>
    %282 = arith.addf %276, %281 : vector<5x80xf32>
    %c0_406 = arith.constant 0 : index
    %c0_407 = arith.constant 0 : index
    %c0_408 = arith.constant 0 : index
    %283 = vector.load %arg13[%c0_406, %c0_407, %c0_408] : memref<2x7x112xf32, #tpu.memory_space<vmem>>, vector<1x5x112xf32>
    %284 = vector.shape_cast %283 : vector<1x5x112xf32> to vector<5x112xf32>
    %c0_409 = arith.constant 0 : index
    %c1_410 = arith.constant 1 : index
    %c0_411 = arith.constant 0 : index
    %c0_412 = arith.constant 0 : index
    %285 = vector.load %arg4[%c0_409, %c1_410, %c0_411, %c0_412] : memref<5x2x112x80xf32, #tpu.memory_space<vmem>>, vector<1x1x112x80xf32>
    %286 = vector.shape_cast %285 : vector<1x1x112x80xf32> to vector<112x80xf32>
    %cst_413 = arith.constant dense<0.000000e+00> : vector<5x80xf32>
    %287 = tpu.matmul %284, %286, %cst_413 {dimension_numbers = #tpu.dot_dimension_numbers<[1], [0], [0], [1], [0, 0, 1, 1], [], []>} : vector<5x112xf32>, vector<112x80xf32>, vector<5x80xf32> -> vector<5x80xf32>
    %c1_414 = arith.constant 1 : index
    %c0_415 = arith.constant 0 : index
    %c0_416 = arith.constant 0 : index
    %288 = vector.load %arg13[%c1_414, %c0_415, %c0_416] : memref<2x7x112xf32, #tpu.memory_space<vmem>>, vector<1x5x112xf32>
    %289 = vector.shape_cast %288 : vector<1x5x112xf32> to vector<5x112xf32>
    %c1_417 = arith.constant 1 : index
    %c1_418 = arith.constant 1 : index
    %c0_419 = arith.constant 0 : index
    %c0_420 = arith.constant 0 : index
    %290 = vector.load %arg4[%c1_417, %c1_418, %c0_419, %c0_420] : memref<5x2x112x80xf32, #tpu.memory_space<vmem>>, vector<1x1x112x80xf32>
    %291 = vector.shape_cast %290 : vector<1x1x112x80xf32> to vector<112x80xf32>
    %cst_421 = arith.constant dense<0.000000e+00> : vector<5x80xf32>
    %292 = tpu.matmul %289, %291, %cst_421 {dimension_numbers = #tpu.dot_dimension_numbers<[1], [0], [0], [1], [0, 0, 1, 1], [], []>} : vector<5x112xf32>, vector<112x80xf32>, vector<5x80xf32> -> vector<5x80xf32>
    %293 = arith.addf %287, %292 : vector<5x80xf32>
    %c0_422 = arith.constant 0 : index
    %c1_423 = arith.constant 1 : index
    %c0_424 = arith.constant 0 : index
    %294 = vector.load %arg13[%c0_422, %c1_423, %c0_424] : memref<2x7x112xf32, #tpu.memory_space<vmem>>, vector<1x5x112xf32>
    %295 = vector.shape_cast %294 : vector<1x5x112xf32> to vector<5x112xf32>
    %c2_425 = arith.constant 2 : index
    %c1_426 = arith.constant 1 : index
    %c0_427 = arith.constant 0 : index
    %c0_428 = arith.constant 0 : index
    %296 = vector.load %arg4[%c2_425, %c1_426, %c0_427, %c0_428] : memref<5x2x112x80xf32, #tpu.memory_space<vmem>>, vector<1x1x112x80xf32>
    %297 = vector.shape_cast %296 : vector<1x1x112x80xf32> to vector<112x80xf32>
    %cst_429 = arith.constant dense<0.000000e+00> : vector<5x80xf32>
    %298 = tpu.matmul %295, %297, %cst_429 {dimension_numbers = #tpu.dot_dimension_numbers<[1], [0], [0], [1], [0, 0, 1, 1], [], []>} : vector<5x112xf32>, vector<112x80xf32>, vector<5x80xf32> -> vector<5x80xf32>
    %299 = arith.addf %293, %298 : vector<5x80xf32>
    %c1_430 = arith.constant 1 : index
    %c1_431 = arith.constant 1 : index
    %c0_432 = arith.constant 0 : index
    %300 = vector.load %arg13[%c1_430, %c1_431, %c0_432] : memref<2x7x112xf32, #tpu.memory_space<vmem>>, vector<1x5x112xf32>
    %301 = vector.shape_cast %300 : vector<1x5x112xf32> to vector<5x112xf32>
    %c3_433 = arith.constant 3 : index
    %c1_434 = arith.constant 1 : index
    %c0_435 = arith.constant 0 : index
    %c0_436 = arith.constant 0 : index
    %302 = vector.load %arg4[%c3_433, %c1_434, %c0_435, %c0_436] : memref<5x2x112x80xf32, #tpu.memory_space<vmem>>, vector<1x1x112x80xf32>
    %303 = vector.shape_cast %302 : vector<1x1x112x80xf32> to vector<112x80xf32>
    %cst_437 = arith.constant dense<0.000000e+00> : vector<5x80xf32>
    %304 = tpu.matmul %301, %303, %cst_437 {dimension_numbers = #tpu.dot_dimension_numbers<[1], [0], [0], [1], [0, 0, 1, 1], [], []>} : vector<5x112xf32>, vector<112x80xf32>, vector<5x80xf32> -> vector<5x80xf32>
    %305 = arith.addf %299, %304 : vector<5x80xf32>
    %c0_438 = arith.constant 0 : index
    %c2_439 = arith.constant 2 : index
    %c0_440 = arith.constant 0 : index
    %306 = vector.load %arg13[%c0_438, %c2_439, %c0_440] : memref<2x7x112xf32, #tpu.memory_space<vmem>>, vector<1x5x112xf32>
    %307 = vector.shape_cast %306 : vector<1x5x112xf32> to vector<5x112xf32>
    %c4_441 = arith.constant 4 : index
    %c1_442 = arith.constant 1 : index
    %c0_443 = arith.constant 0 : index
    %c0_444 = arith.constant 0 : index
    %308 = vector.load %arg4[%c4_441, %c1_442, %c0_443, %c0_444] : memref<5x2x112x80xf32, #tpu.memory_space<vmem>>, vector<1x1x112x80xf32>
    %309 = vector.shape_cast %308 : vector<1x1x112x80xf32> to vector<112x80xf32>
    %cst_445 = arith.constant dense<0.000000e+00> : vector<5x80xf32>
    %310 = tpu.matmul %307, %309, %cst_445 {dimension_numbers = #tpu.dot_dimension_numbers<[1], [0], [0], [1], [0, 0, 1, 1], [], []>} : vector<5x112xf32>, vector<112x80xf32>, vector<5x80xf32> -> vector<5x80xf32>
    %311 = arith.addf %305, %310 : vector<5x80xf32>
    %312 = arith.maximumf %282, %311 : vector<5x80xf32>
    %c1_446 = arith.constant 1 : index
    %c0_447 = arith.constant 0 : index
    %c0_448 = arith.constant 0 : index
    %313 = vector.load %arg13[%c1_446, %c0_447, %c0_448] : memref<2x7x112xf32, #tpu.memory_space<vmem>>, vector<1x5x112xf32>
    %314 = vector.shape_cast %313 : vector<1x5x112xf32> to vector<5x112xf32>
    %c0_449 = arith.constant 0 : index
    %c0_450 = arith.constant 0 : index
    %c0_451 = arith.constant 0 : index
    %c0_452 = arith.constant 0 : index
    %315 = vector.load %arg4[%c0_449, %c0_450, %c0_451, %c0_452] : memref<5x2x112x80xf32, #tpu.memory_space<vmem>>, vector<1x1x112x80xf32>
    %316 = vector.shape_cast %315 : vector<1x1x112x80xf32> to vector<112x80xf32>
    %cst_453 = arith.constant dense<0.000000e+00> : vector<5x80xf32>
    %317 = tpu.matmul %314, %316, %cst_453 {dimension_numbers = #tpu.dot_dimension_numbers<[1], [0], [0], [1], [0, 0, 1, 1], [], []>} : vector<5x112xf32>, vector<112x80xf32>, vector<5x80xf32> -> vector<5x80xf32>
    %c0_454 = arith.constant 0 : index
    %c1_455 = arith.constant 1 : index
    %c0_456 = arith.constant 0 : index
    %318 = vector.load %arg13[%c0_454, %c1_455, %c0_456] : memref<2x7x112xf32, #tpu.memory_space<vmem>>, vector<1x5x112xf32>
    %319 = vector.shape_cast %318 : vector<1x5x112xf32> to vector<5x112xf32>
    %c1_457 = arith.constant 1 : index
    %c0_458 = arith.constant 0 : index
    %c0_459 = arith.constant 0 : index
    %c0_460 = arith.constant 0 : index
    %320 = vector.load %arg4[%c1_457, %c0_458, %c0_459, %c0_460] : memref<5x2x112x80xf32, #tpu.memory_space<vmem>>, vector<1x1x112x80xf32>
    %321 = vector.shape_cast %320 : vector<1x1x112x80xf32> to vector<112x80xf32>
    %cst_461 = arith.constant dense<0.000000e+00> : vector<5x80xf32>
    %322 = tpu.matmul %319, %321, %cst_461 {dimension_numbers = #tpu.dot_dimension_numbers<[1], [0], [0], [1], [0, 0, 1, 1], [], []>} : vector<5x112xf32>, vector<112x80xf32>, vector<5x80xf32> -> vector<5x80xf32>
    %323 = arith.addf %317, %322 : vector<5x80xf32>
    %c1_462 = arith.constant 1 : index
    %c1_463 = arith.constant 1 : index
    %c0_464 = arith.constant 0 : index
    %324 = vector.load %arg13[%c1_462, %c1_463, %c0_464] : memref<2x7x112xf32, #tpu.memory_space<vmem>>, vector<1x5x112xf32>
    %325 = vector.shape_cast %324 : vector<1x5x112xf32> to vector<5x112xf32>
    %c2_465 = arith.constant 2 : index
    %c0_466 = arith.constant 0 : index
    %c0_467 = arith.constant 0 : index
    %c0_468 = arith.constant 0 : index
    %326 = vector.load %arg4[%c2_465, %c0_466, %c0_467, %c0_468] : memref<5x2x112x80xf32, #tpu.memory_space<vmem>>, vector<1x1x112x80xf32>
    %327 = vector.shape_cast %326 : vector<1x1x112x80xf32> to vector<112x80xf32>
    %cst_469 = arith.constant dense<0.000000e+00> : vector<5x80xf32>
    %328 = tpu.matmul %325, %327, %cst_469 {dimension_numbers = #tpu.dot_dimension_numbers<[1], [0], [0], [1], [0, 0, 1, 1], [], []>} : vector<5x112xf32>, vector<112x80xf32>, vector<5x80xf32> -> vector<5x80xf32>
    %329 = arith.addf %323, %328 : vector<5x80xf32>
    %c0_470 = arith.constant 0 : index
    %c2_471 = arith.constant 2 : index
    %c0_472 = arith.constant 0 : index
    %330 = vector.load %arg13[%c0_470, %c2_471, %c0_472] : memref<2x7x112xf32, #tpu.memory_space<vmem>>, vector<1x5x112xf32>
    %331 = vector.shape_cast %330 : vector<1x5x112xf32> to vector<5x112xf32>
    %c3_473 = arith.constant 3 : index
    %c0_474 = arith.constant 0 : index
    %c0_475 = arith.constant 0 : index
    %c0_476 = arith.constant 0 : index
    %332 = vector.load %arg4[%c3_473, %c0_474, %c0_475, %c0_476] : memref<5x2x112x80xf32, #tpu.memory_space<vmem>>, vector<1x1x112x80xf32>
    %333 = vector.shape_cast %332 : vector<1x1x112x80xf32> to vector<112x80xf32>
    %cst_477 = arith.constant dense<0.000000e+00> : vector<5x80xf32>
    %334 = tpu.matmul %331, %333, %cst_477 {dimension_numbers = #tpu.dot_dimension_numbers<[1], [0], [0], [1], [0, 0, 1, 1], [], []>} : vector<5x112xf32>, vector<112x80xf32>, vector<5x80xf32> -> vector<5x80xf32>
    %335 = arith.addf %329, %334 : vector<5x80xf32>
    %c1_478 = arith.constant 1 : index
    %c2_479 = arith.constant 2 : index
    %c0_480 = arith.constant 0 : index
    %336 = vector.load %arg13[%c1_478, %c2_479, %c0_480] : memref<2x7x112xf32, #tpu.memory_space<vmem>>, vector<1x5x112xf32>
    %337 = vector.shape_cast %336 : vector<1x5x112xf32> to vector<5x112xf32>
    %c4_481 = arith.constant 4 : index
    %c0_482 = arith.constant 0 : index
    %c0_483 = arith.constant 0 : index
    %c0_484 = arith.constant 0 : index
    %338 = vector.load %arg4[%c4_481, %c0_482, %c0_483, %c0_484] : memref<5x2x112x80xf32, #tpu.memory_space<vmem>>, vector<1x1x112x80xf32>
    %339 = vector.shape_cast %338 : vector<1x1x112x80xf32> to vector<112x80xf32>
    %cst_485 = arith.constant dense<0.000000e+00> : vector<5x80xf32>
    %340 = tpu.matmul %337, %339, %cst_485 {dimension_numbers = #tpu.dot_dimension_numbers<[1], [0], [0], [1], [0, 0, 1, 1], [], []>} : vector<5x112xf32>, vector<112x80xf32>, vector<5x80xf32> -> vector<5x80xf32>
    %341 = arith.addf %335, %340 : vector<5x80xf32>
    %342 = arith.maximumf %312, %341 : vector<5x80xf32>
    %c1_486 = arith.constant 1 : index
    %c0_487 = arith.constant 0 : index
    %c0_488 = arith.constant 0 : index
    %343 = vector.load %arg13[%c1_486, %c0_487, %c0_488] : memref<2x7x112xf32, #tpu.memory_space<vmem>>, vector<1x5x112xf32>
    %344 = vector.shape_cast %343 : vector<1x5x112xf32> to vector<5x112xf32>
    %c0_489 = arith.constant 0 : index
    %c1_490 = arith.constant 1 : index
    %c0_491 = arith.constant 0 : index
    %c0_492 = arith.constant 0 : index
    %345 = vector.load %arg4[%c0_489, %c1_490, %c0_491, %c0_492] : memref<5x2x112x80xf32, #tpu.memory_space<vmem>>, vector<1x1x112x80xf32>
    %346 = vector.shape_cast %345 : vector<1x1x112x80xf32> to vector<112x80xf32>
    %cst_493 = arith.constant dense<0.000000e+00> : vector<5x80xf32>
    %347 = tpu.matmul %344, %346, %cst_493 {dimension_numbers = #tpu.dot_dimension_numbers<[1], [0], [0], [1], [0, 0, 1, 1], [], []>} : vector<5x112xf32>, vector<112x80xf32>, vector<5x80xf32> -> vector<5x80xf32>
    %c0_494 = arith.constant 0 : index
    %c1_495 = arith.constant 1 : index
    %c0_496 = arith.constant 0 : index
    %348 = vector.load %arg13[%c0_494, %c1_495, %c0_496] : memref<2x7x112xf32, #tpu.memory_space<vmem>>, vector<1x5x112xf32>
    %349 = vector.shape_cast %348 : vector<1x5x112xf32> to vector<5x112xf32>
    %c1_497 = arith.constant 1 : index
    %c1_498 = arith.constant 1 : index
    %c0_499 = arith.constant 0 : index
    %c0_500 = arith.constant 0 : index
    %350 = vector.load %arg4[%c1_497, %c1_498, %c0_499, %c0_500] : memref<5x2x112x80xf32, #tpu.memory_space<vmem>>, vector<1x1x112x80xf32>
    %351 = vector.shape_cast %350 : vector<1x1x112x80xf32> to vector<112x80xf32>
    %cst_501 = arith.constant dense<0.000000e+00> : vector<5x80xf32>
    %352 = tpu.matmul %349, %351, %cst_501 {dimension_numbers = #tpu.dot_dimension_numbers<[1], [0], [0], [1], [0, 0, 1, 1], [], []>} : vector<5x112xf32>, vector<112x80xf32>, vector<5x80xf32> -> vector<5x80xf32>
    %353 = arith.addf %347, %352 : vector<5x80xf32>
    %c1_502 = arith.constant 1 : index
    %c1_503 = arith.constant 1 : index
    %c0_504 = arith.constant 0 : index
    %354 = vector.load %arg13[%c1_502, %c1_503, %c0_504] : memref<2x7x112xf32, #tpu.memory_space<vmem>>, vector<1x5x112xf32>
    %355 = vector.shape_cast %354 : vector<1x5x112xf32> to vector<5x112xf32>
    %c2_505 = arith.constant 2 : index
    %c1_506 = arith.constant 1 : index
    %c0_507 = arith.constant 0 : index
    %c0_508 = arith.constant 0 : index
    %356 = vector.load %arg4[%c2_505, %c1_506, %c0_507, %c0_508] : memref<5x2x112x80xf32, #tpu.memory_space<vmem>>, vector<1x1x112x80xf32>
    %357 = vector.shape_cast %356 : vector<1x1x112x80xf32> to vector<112x80xf32>
    %cst_509 = arith.constant dense<0.000000e+00> : vector<5x80xf32>
    %358 = tpu.matmul %355, %357, %cst_509 {dimension_numbers = #tpu.dot_dimension_numbers<[1], [0], [0], [1], [0, 0, 1, 1], [], []>} : vector<5x112xf32>, vector<112x80xf32>, vector<5x80xf32> -> vector<5x80xf32>
    %359 = arith.addf %353, %358 : vector<5x80xf32>
    %c0_510 = arith.constant 0 : index
    %c2_511 = arith.constant 2 : index
    %c0_512 = arith.constant 0 : index
    %360 = vector.load %arg13[%c0_510, %c2_511, %c0_512] : memref<2x7x112xf32, #tpu.memory_space<vmem>>, vector<1x5x112xf32>
    %361 = vector.shape_cast %360 : vector<1x5x112xf32> to vector<5x112xf32>
    %c3_513 = arith.constant 3 : index
    %c1_514 = arith.constant 1 : index
    %c0_515 = arith.constant 0 : index
    %c0_516 = arith.constant 0 : index
    %362 = vector.load %arg4[%c3_513, %c1_514, %c0_515, %c0_516] : memref<5x2x112x80xf32, #tpu.memory_space<vmem>>, vector<1x1x112x80xf32>
    %363 = vector.shape_cast %362 : vector<1x1x112x80xf32> to vector<112x80xf32>
    %cst_517 = arith.constant dense<0.000000e+00> : vector<5x80xf32>
    %364 = tpu.matmul %361, %363, %cst_517 {dimension_numbers = #tpu.dot_dimension_numbers<[1], [0], [0], [1], [0, 0, 1, 1], [], []>} : vector<5x112xf32>, vector<112x80xf32>, vector<5x80xf32> -> vector<5x80xf32>
    %365 = arith.addf %359, %364 : vector<5x80xf32>
    %c1_518 = arith.constant 1 : index
    %c2_519 = arith.constant 2 : index
    %c0_520 = arith.constant 0 : index
    %366 = vector.load %arg13[%c1_518, %c2_519, %c0_520] : memref<2x7x112xf32, #tpu.memory_space<vmem>>, vector<1x5x112xf32>
    %367 = vector.shape_cast %366 : vector<1x5x112xf32> to vector<5x112xf32>
    %c4_521 = arith.constant 4 : index
    %c1_522 = arith.constant 1 : index
    %c0_523 = arith.constant 0 : index
    %c0_524 = arith.constant 0 : index
    %368 = vector.load %arg4[%c4_521, %c1_522, %c0_523, %c0_524] : memref<5x2x112x80xf32, #tpu.memory_space<vmem>>, vector<1x1x112x80xf32>
    %369 = vector.shape_cast %368 : vector<1x1x112x80xf32> to vector<112x80xf32>
    %cst_525 = arith.constant dense<0.000000e+00> : vector<5x80xf32>
    %370 = tpu.matmul %367, %369, %cst_525 {dimension_numbers = #tpu.dot_dimension_numbers<[1], [0], [0], [1], [0, 0, 1, 1], [], []>} : vector<5x112xf32>, vector<112x80xf32>, vector<5x80xf32> -> vector<5x80xf32>
    %371 = arith.addf %365, %370 : vector<5x80xf32>
    %372 = arith.maximumf %342, %371 : vector<5x80xf32>
    %c0_526 = arith.constant 0 : index
    %c0_527 = arith.constant 0 : index
    %373 = vector.load %arg5[%c0_526, %c0_527] : memref<1x80xf32, #tpu.memory_space<vmem>>, vector<1x80xf32>
    %374 = vector.broadcast %373 : vector<1x80xf32> to vector<5x80xf32>
    %375 = arith.addf %372, %374 : vector<5x80xf32>
    %cst_528 = arith.constant 0.000000e+00 : f32
    %376 = vector.broadcast %cst_528 : f32 to vector<5x80xf32>
    %377 = arith.maximumf %375, %376 : vector<5x80xf32>
    %c0_529 = arith.constant 0 : index
    %c0_530 = arith.constant 0 : index
    %378 = vector.load %arg14[%c0_529, %c0_530] : memref<5x80xf32, #tpu.memory_space<vmem>>, vector<5x80xf32>
    tpu.vector_store %arg14[%c0_529, %c0_530], %377 {strides = array<i32>} : memref<5x80xf32, #tpu.memory_space<vmem>>, vector<5x80xf32>,
    %c0_531 = arith.constant 0 : index
    %c0_532 = arith.constant 0 : index
    %379 = vector.load %arg7[%c0_531, %c0_532] : memref<1x128xf32, #tpu.memory_space<vmem>>, vector<1x128xf32>
    %c0_533 = arith.constant 0 : index
    %c0_534 = arith.constant 0 : index
    %380 = vector.load %arg14[%c0_533, %c0_534] : memref<5x80xf32, #tpu.memory_space<vmem>>, vector<1x80xf32>
    %c0_535 = arith.constant 0 : index
    %c0_536 = arith.constant 0 : index
    %c0_537 = arith.constant 0 : index
    %381 = vector.load %arg6[%c0_535, %c0_536, %c0_537] : memref<5x80x128xf32, #tpu.memory_space<vmem>>, vector<1x80x128xf32>
    %382 = vector.shape_cast %381 : vector<1x80x128xf32> to vector<80x128xf32>
    %cst_538 = arith.constant dense<0.000000e+00> : vector<1x128xf32>
    %383 = tpu.matmul %380, %382, %cst_538 {dimension_numbers = #tpu.dot_dimension_numbers<[1], [0], [0], [1], [0, 0, 1, 1], [], []>} : vector<1x80xf32>, vector<80x128xf32>, vector<1x128xf32> -> vector<1x128xf32>
    %384 = arith.addf %379, %383 : vector<1x128xf32>
    %c1_539 = arith.constant 1 : index
    %c0_540 = arith.constant 0 : index
    %385 = vector.load %arg14[%c1_539, %c0_540] : memref<5x80xf32, #tpu.memory_space<vmem>>, vector<1x80xf32>
    %c1_541 = arith.constant 1 : index
    %c0_542 = arith.constant 0 : index
    %c0_543 = arith.constant 0 : index
    %386 = vector.load %arg6[%c1_541, %c0_542, %c0_543] : memref<5x80x128xf32, #tpu.memory_space<vmem>>, vector<1x80x128xf32>
    %387 = vector.shape_cast %386 : vector<1x80x128xf32> to vector<80x128xf32>
    %cst_544 = arith.constant dense<0.000000e+00> : vector<1x128xf32>
    %388 = tpu.matmul %385, %387, %cst_544 {dimension_numbers = #tpu.dot_dimension_numbers<[1], [0], [0], [1], [0, 0, 1, 1], [], []>} : vector<1x80xf32>, vector<80x128xf32>, vector<1x128xf32> -> vector<1x128xf32>
    %389 = arith.addf %384, %388 : vector<1x128xf32>
    %c2_545 = arith.constant 2 : index
    %c0_546 = arith.constant 0 : index
    %390 = vector.load %arg14[%c2_545, %c0_546] : memref<5x80xf32, #tpu.memory_space<vmem>>, vector<1x80xf32>
    %c2_547 = arith.constant 2 : index
    %c0_548 = arith.constant 0 : index
    %c0_549 = arith.constant 0 : index
    %391 = vector.load %arg6[%c2_547, %c0_548, %c0_549] : memref<5x80x128xf32, #tpu.memory_space<vmem>>, vector<1x80x128xf32>
    %392 = vector.shape_cast %391 : vector<1x80x128xf32> to vector<80x128xf32>
    %cst_550 = arith.constant dense<0.000000e+00> : vector<1x128xf32>
    %393 = tpu.matmul %390, %392, %cst_550 {dimension_numbers = #tpu.dot_dimension_numbers<[1], [0], [0], [1], [0, 0, 1, 1], [], []>} : vector<1x80xf32>, vector<80x128xf32>, vector<1x128xf32> -> vector<1x128xf32>
    %394 = arith.addf %389, %393 : vector<1x128xf32>
    %c3_551 = arith.constant 3 : index
    %c0_552 = arith.constant 0 : index
    %395 = vector.load %arg14[%c3_551, %c0_552] : memref<5x80xf32, #tpu.memory_space<vmem>>, vector<1x80xf32>
    %c3_553 = arith.constant 3 : index
    %c0_554 = arith.constant 0 : index
    %c0_555 = arith.constant 0 : index
    %396 = vector.load %arg6[%c3_553, %c0_554, %c0_555] : memref<5x80x128xf32, #tpu.memory_space<vmem>>, vector<1x80x128xf32>
    %397 = vector.shape_cast %396 : vector<1x80x128xf32> to vector<80x128xf32>
    %cst_556 = arith.constant dense<0.000000e+00> : vector<1x128xf32>
    %398 = tpu.matmul %395, %397, %cst_556 {dimension_numbers = #tpu.dot_dimension_numbers<[1], [0], [0], [1], [0, 0, 1, 1], [], []>} : vector<1x80xf32>, vector<80x128xf32>, vector<1x128xf32> -> vector<1x128xf32>
    %399 = arith.addf %394, %398 : vector<1x128xf32>
    %c4_557 = arith.constant 4 : index
    %c0_558 = arith.constant 0 : index
    %400 = vector.load %arg14[%c4_557, %c0_558] : memref<5x80xf32, #tpu.memory_space<vmem>>, vector<1x80xf32>
    %c4_559 = arith.constant 4 : index
    %c0_560 = arith.constant 0 : index
    %c0_561 = arith.constant 0 : index
    %401 = vector.load %arg6[%c4_559, %c0_560, %c0_561] : memref<5x80x128xf32, #tpu.memory_space<vmem>>, vector<1x80x128xf32>
    %402 = vector.shape_cast %401 : vector<1x80x128xf32> to vector<80x128xf32>
    %cst_562 = arith.constant dense<0.000000e+00> : vector<1x128xf32>
    %403 = tpu.matmul %400, %402, %cst_562 {dimension_numbers = #tpu.dot_dimension_numbers<[1], [0], [0], [1], [0, 0, 1, 1], [], []>} : vector<1x80xf32>, vector<80x128xf32>, vector<1x128xf32> -> vector<1x128xf32>
    %404 = arith.addf %399, %403 : vector<1x128xf32>
    %cst_563 = arith.constant 0.000000e+00 : f32
    %405 = vector.broadcast %cst_563 : f32 to vector<1x128xf32>
    %406 = arith.maximumf %404, %405 : vector<1x128xf32>
    %c0_564 = arith.constant 0 : index
    %c0_565 = arith.constant 0 : index
    %407 = vector.load %arg8[%c0_564, %c0_565] : memref<128x128xf32, #tpu.memory_space<vmem>>, vector<128x128xf32>
    %cst_566 = arith.constant dense<0.000000e+00> : vector<1x128xf32>
    %408 = tpu.matmul %406, %407, %cst_566 {dimension_numbers = #tpu.dot_dimension_numbers<[1], [0], [0], [1], [0, 0, 1, 1], [], []>} : vector<1x128xf32>, vector<128x128xf32>, vector<1x128xf32> -> vector<1x128xf32>
    %c0_567 = arith.constant 0 : index
    %c0_568 = arith.constant 0 : index
    %409 = vector.load %arg9[%c0_567, %c0_568] : memref<1x128xf32, #tpu.memory_space<vmem>>, vector<1x128xf32>
    %410 = arith.addf %408, %409 : vector<1x128xf32>
    %cst_569 = arith.constant 0.000000e+00 : f32
    %411 = vector.broadcast %cst_569 : f32 to vector<1x128xf32>
    %412 = arith.maximumf %410, %411 : vector<1x128xf32>
    %c0_570 = arith.constant 0 : index
    %c0_571 = arith.constant 0 : index
    %413 = vector.load %arg10[%c0_570, %c0_571] : memref<128x128xf32, #tpu.memory_space<vmem>>, vector<128x128xf32>
    %cst_572 = arith.constant dense<0.000000e+00> : vector<1x128xf32>
    %414 = tpu.matmul %412, %413, %cst_572 {dimension_numbers = #tpu.dot_dimension_numbers<[1], [0], [0], [1], [0, 0, 1, 1], [], []>} : vector<1x128xf32>, vector<128x128xf32>, vector<1x128xf32> -> vector<1x128xf32>
    %c0_573 = arith.constant 0 : index
    %c0_574 = arith.constant 0 : index
    %415 = vector.load %arg11[%c0_573, %c0_574] : memref<1x128xf32, #tpu.memory_space<vmem>>, vector<1x128xf32>
    %416 = arith.addf %414, %415 : vector<1x128xf32>
    %cst_575 = arith.constant dense<0xFF800000> : vector<1xf32>
    %417 = vector.multi_reduction <maximumf>, %416, %cst_575 [1] : vector<1x128xf32> to vector<1xf32>
    %418 = vector.shape_cast %417 : vector<1xf32> to vector<1x1xf32>
    %419 = vector.broadcast %418 : vector<1x1xf32> to vector<1x128xf32>
    %420 = arith.subf %416, %419 : vector<1x128xf32>
    %421 = math.exp %420 : vector<1x128xf32>
    %cst_576 = arith.constant dense<0.000000e+00> : vector<1xf32>
    %422 = vector.multi_reduction <add>, %421, %cst_576 [1] : vector<1x128xf32> to vector<1xf32>
    %423 = vector.shape_cast %422 : vector<1xf32> to vector<1x1xf32>
    %424 = math.log %423 : vector<1x1xf32>
    %425 = vector.broadcast %424 : vector<1x1xf32> to vector<1x128xf32>
    %426 = arith.subf %420, %425 : vector<1x128xf32>
    %c0_577 = arith.constant 0 : index
    %c0_578 = arith.constant 0 : index
    %c0_579 = arith.constant 0 : index
    %427 = vector.load %arg12[%c0_577, %c0_578, %c0_579] : memref<1x1x128xf32, #tpu.memory_space<vmem>>, vector<1x1x128xf32>
    %428 = vector.shape_cast %427 : vector<1x1x128xf32> to vector<1x128xf32>
    %429 = vector.shape_cast %426 : vector<1x128xf32> to vector<1x1x128xf32>
    tpu.vector_store %arg12[%c0_577, %c0_578, %c0_579], %429 {strides = array<i32>} : memref<1x1x128xf32, #tpu.memory_space<vmem>>, vector<1x1x128xf32>,
    return
  }
  func.func @transform_0(%arg0: i32) -> (i32, i32, i32, i32) {
    %c0_i32 = arith.constant 0 : i32
    %c0_i32_0 = arith.constant 0 : i32
    %c0_i32_1 = arith.constant 0 : i32
    %c0_i32_2 = arith.constant 0 : i32
    return %arg0, %c0_i32, %c0_i32_0, %c0_i32_1 : i32, i32, i32, i32
  }
  func.func @transform_1(%arg0: i32) -> (i32, i32, i32, i32) {
    %c0_i32 = arith.constant 0 : i32
    %c0_i32_0 = arith.constant 0 : i32
    %c0_i32_1 = arith.constant 0 : i32
    %c0_i32_2 = arith.constant 0 : i32
    %c0_i32_3 = arith.constant 0 : i32
    return %c0_i32, %c0_i32_0, %c0_i32_1, %c0_i32_2 : i32, i32, i32, i32
  }
  func.func @transform_2(%arg0: i32) -> (i32, i32) {
    %c0_i32 = arith.constant 0 : i32
    %c0_i32_0 = arith.constant 0 : i32
    %c0_i32_1 = arith.constant 0 : i32
    return %c0_i32, %c0_i32_0 : i32, i32
  }
  func.func @transform_3(%arg0: i32) -> (i32, i32, i32, i32) {
    %c0_i32 = arith.constant 0 : i32
    %c0_i32_0 = arith.constant 0 : i32
    %c0_i32_1 = arith.constant 0 : i32
    %c0_i32_2 = arith.constant 0 : i32
    %c0_i32_3 = arith.constant 0 : i32
    return %c0_i32, %c0_i32_0, %c0_i32_1, %c0_i32_2 : i32, i32, i32, i32
  }
  func.func @transform_4(%arg0: i32) -> (i32, i32) {
    %c0_i32 = arith.constant 0 : i32
    %c0_i32_0 = arith.constant 0 : i32
    %c0_i32_1 = arith.constant 0 : i32
    return %c0_i32, %c0_i32_0 : i32, i32
  }
  func.func @transform_5(%arg0: i32) -> (i32, i32, i32) {
    %c0_i32 = arith.constant 0 : i32
    %c0_i32_0 = arith.constant 0 : i32
    %c0_i32_1 = arith.constant 0 : i32
    %c0_i32_2 = arith.constant 0 : i32
    return %c0_i32, %c0_i32_0, %c0_i32_1 : i32, i32, i32
  }
  func.func @transform_6(%arg0: i32) -> (i32, i32) {
    %c0_i32 = arith.constant 0 : i32
    %c0_i32_0 = arith.constant 0 : i32
    %c0_i32_1 = arith.constant 0 : i32
    return %c0_i32, %c0_i32_0 : i32, i32
  }
  func.func @transform_7(%arg0: i32) -> (i32, i32) {
    %c0_i32 = arith.constant 0 : i32
    %c0_i32_0 = arith.constant 0 : i32
    %c0_i32_1 = arith.constant 0 : i32
    return %c0_i32, %c0_i32_0 : i32, i32
  }
  func.func @transform_8(%arg0: i32) -> (i32, i32) {
    %c0_i32 = arith.constant 0 : i32
    %c0_i32_0 = arith.constant 0 : i32
    %c0_i32_1 = arith.constant 0 : i32
    return %c0_i32, %c0_i32_0 : i32, i32
  }
  func.func @transform_9(%arg0: i32) -> (i32, i32) {
    %c0_i32 = arith.constant 0 : i32
    %c0_i32_0 = arith.constant 0 : i32
    %c0_i32_1 = arith.constant 0 : i32
    return %c0_i32, %c0_i32_0 : i32, i32
  }
  func.func @transform_10(%arg0: i32) -> (i32, i32) {
    %c0_i32 = arith.constant 0 : i32
    %c0_i32_0 = arith.constant 0 : i32
    %c0_i32_1 = arith.constant 0 : i32
    return %c0_i32, %c0_i32_0 : i32, i32
  }
  func.func @transform_11(%arg0: i32) -> (i32, i32, i32) {
    %c0_i32 = arith.constant 0 : i32
    %c0_i32_0 = arith.constant 0 : i32
    %c0_i32_1 = arith.constant 0 : i32
    return %arg0, %c0_i32, %c0_i32_0 : i32, i32, i32
  }
}

</mosaic_0001>

<bundles_post_ra>
// kernel: lenet_forward.1
= control target key start
LH: loop header
LB: loop body
LE: loop exit
PB: predicated region body
PF: predicated region fallthrough
CT: control target
= control target key end

     0   :  { %s10547_s0 = inlined_call_operand.vmem [shape: f32[2,4,8,32], index: 0, kind: input, shape index: {}]   ;;  %s10548_s1 = inlined_call_operand.vmem [shape: f32[5,2,32,112], index: 1, kind: input, shape index: {}]   ;;  %s10549_s2 = inlined_call_operand.vmem [shape: f32[1,112], index: 2, kind: input, shape index: {}]   ;;  %s10550_s3 = inlined_call_operand.vmem [shape: f32[5,2,112,80], index: 3, kind: input, shape index: {}]   ;;  %s10551_s4 = inlined_call_operand.vmem [shape: f32[1,80], index: 4, kind: input, shape index: {}]   ;;  %s10552_s5 = inlined_call_operand.vmem [shape: f32[5,80,128], index: 5, kind: input, shape index: {}]   ;;  %s10553_s6 = inlined_call_operand.vmem [shape: f32[1,128], index: 6, kind: input, shape index: {}]   ;;  %s10554_s7 = inlined_call_operand.vmem [shape: f32[128,128], index: 7, kind: input, shape index: {}]   ;;  %s10555_s8 = inlined_call_operand.vmem [shape: f32[1,128], index: 8, kind: input, shape index: {}]   ;;  %s10556_s9 = inlined_call_operand.vmem [shape: f32[128,128], index: 9, kind: input, shape index: {}]   ;;  %s10557_s10 = inlined_call_operand.vmem [shape: f32[1,128], index: 10, kind: input, shape index: {}]   ;;  %s10558_s11 = inlined_call_operand.hbm [shape: f32[2,1,128], index: 11, kind: output, shape index: {}]  }
   0x1   :  { %10615 = sst [smem:[#allocation63_spill]] %s10547_s0 }
   0x2   :  { %10616 = sst [smem:[#allocation64_spill]] %s10548_s1 }
   0x3   :  { %16 = vsyncpa [#allocation5], 0 }
   0x4   :  { %18 = vsyncpa [#allocation5 + $0x1], 0  ;;  %s8025_s17 = smov 0   ;;  %s8027_s18 = smov 0  }
   0x5   :  { %s8029_s19 = smov 0   ;;  %s8031_s20 = smov 0  }
   0x6 LB: > { %s8046_s21 = sadd.s32 4294967295, %s7960_s20   ;;  %s5666_s22 = sadd.s32 4294967294, %s7960_s20   ;;  %s7960_s20 = sphi %s8031_s20, %s10736_s20   ;;  %s7956_s19 = sphi %s8029_s19, %s10735_s19   ;;  %s7952_s18 = sphi %s8027_s18, %s10734_s18   ;;  %s7948_s17 = sphi %s8025_s17, %s10733_s17  }
   0x7   : > { %s8050_s23 = sadd.s32 1, %s7960_s20   ;;  %s267_s24 = sadd.s32 1, %s7956_s19 }
   0x8   : > { %s264_s25 = ssub.s32 %s7960_s20, %s8050_s23  ;;  %p277_p0 = scmp.ne.s32.totalorder %s7956_s19, %s7952_s18 }
   0x9   : > { %p265_p1 = scmp.eq.s32.totalorder %s264_s25, 0  ;;  %p278_p2 = scmp.eq.s32.totalorder %s8046_s21, 1 }
   0xa   : > { %p283_p3 = scmp.ne.s32.totalorder %s7952_s18, %s7948_s17  ;;  %p284_p4 = scmp.eq.s32.totalorder %s5666_s22, 1 }
   0xb   : > { %s8061_s26 = scalar_select %p265_p1, %s7956_s19, %s267_s24  }
   0xc   : > { %p8063_p5 = por %p278_p2, %p277_p0  ;;  %p8067_p6 = por %p284_p4, %p283_p3 }
   0xd   : > { %p5669_p7 = scmp.ge.s32.totalorder %s7960_s20, 1  ;;  %p340_p8 = scmp.lt.s32.totalorder %s7960_s20, 3 }
   0xf   : > { %p341_p9 = pnand %p5669_p7, %p340_p8 }
  0x11   : > { %344 = sbr.rel (%p341_p9) target bundleno = 1875 (0x753), region = 64 }
  0x16   : > { %s10619_s1 = sld [smem:[#allocation64_spill]]  ;;  %p379_p10 = scmp.lt.s32.totalorder %s8046_s21, 1  ;;  %v7962_v1 = vmov 0.0   ;;  %vm7963_vm0 = vmmov 0   ;;  %vm396_vm1 = vcmask 261120   ;;  %v3391_v54 = vld [vmem:[%s10550_s3 + $0x68] sm:$0xff] }
  0x17   : > { %6580 = vmatprep.subr.mxu1 %v7962_v1  ;;  %6588 = vmatprep.mubr.msk.f32.mxu1 %vm7963_vm0, %v7962_v1  ;;  %s10620_s0 = sld [smem:[#allocation63_spill]]  ;;  %v3390_v56 = vld [vmem:[%s10550_s3 + $0x60] sm:$0xff]  ;;  %v3389_v57 = vld [vmem:[%s10550_s3 + $0x58] sm:$0xff]  ;;  %v3388_v59 = vld [vmem:[%s10550_s3 + $0x50] sm:$0xff]  ;;  %vm1885_vm2 = vcmask 915456   ;;  %vm3408_vm3 = vcmask 916480  }
  0x18   : > { %s380_s16 = scalar_select %p379_p10, %s8046_s21, 1  ;;  %6602 = vmatprep.subr.mxu0 %v7962_v1  ;;  %6610 = vmatprep.mubr.msk.f32.mxu0 %vm7963_vm0, %v7962_v1  ;;  %v3387_v62 = vld [vmem:[%s10550_s3 + $0x48] sm:$0xff]  ;;  %vm4975_vm4 = vcmask 651264   ;;  %vm4989_vm5 = vcmask 654336   ;;  %vm5584_vm6 = vcmask 1040384  }
  0x19   : > { %s5987_s12 = sshll.u32 %s8046_s21, 4 }
  0x1a   : > { %s5990_s30 = sshll.u32 %s380_s16, 5  ;;  %s5609_s24 = scalar_lea.hbm %s10558_s11, %s5987_s12 }
  0x1c   : > { %v8076_v0 = vld [vmem:[%s10619_s1 + $0x58] sm:$0xff]  ;;  %v8083_v2 = vld [vmem:[%s10619_s1 + $0x50] sm:$0xff]  ;;  %v8104_v5 = vld [vmem:[%s10619_s1 + $0x48] sm:$0xff] }
  0x1d   : > { %v8090_v3 = vld [vmem:[%s10619_s1 + $0x98] sm:$0xff]  ;;  %6581 = vmatpush3.msra.mxu1 %v8076_v0  ;;  %v8098_v4 = vld [vmem:[%s10619_s1 + $0x90] sm:$0xff]  ;;  %v8112_v6 = vld [vmem:[%s10619_s1 + $0x88] sm:$0xff]  ;;  %s8123_s25 = scalar_lea.vmem %s10620_s0, %s5990_s30  ;;  %s7964_s30 = smov [#allocation4]  }
  0x1e   : > { %6582 = vmatprep.subr.mxu1 %v7962_v1  ;;  %6603 = vmatpush3.msra.mxu0 %v8090_v3  ;;  %v8118_v7 = vld [vmem:[%s10619_s1 + $0x40] sm:$0xff]  ;;  %v8128_v8 = vld [vmem:[%s8123_s25 + $0x8] sm:$0x7f]  ;;  %v8135_v9 = vld [vmem:[%s10619_s1 + $0x18] sm:$0xff]  ;;  %s7904_s0 = sshll.u32 %s7964_s30, 4  ;;  %s7905_s0 = int_to_ptr.vmem [resolvable:$false] %s7904_s0 }
  0x1f   : > { %6583 = vmatpush3.msra.mxu1 %v8083_v2  ;;  %6604 = vmatprep.subr.mxu0 %v7962_v1  ;;  %v8143_v10 = vld [vmem:[%s10619_s1 + $0x80] sm:$0xff]  ;;  %v8151_v11 = vld [vmem:[%s10619_s1 + $0x10] sm:$0xff]  ;;  %v8160_v12 = vld [vmem:[%s10619_s1 + $0x8] sm:$0xff]  ;;  %s7906_s21 = scalar_lea.vmem %s7905_s0, 32 }
  0x20   : > { %6584 = vmatprep.subr.mxu1 %v7962_v1  ;;  %6605 = vmatpush3.msra.mxu0 %v8098_v4  ;;  %v8164_v13 = vld [vmem:[%s8123_s25 + $0x10] sm:$0x7f]  ;;  %v8172_v14 = vld [vmem:[%s10619_s1 + $0x118] sm:$0xff]  ;;  %v8178_v15 = vld [vmem:[%s10619_s1] sm:$0xff] }
  0x21   : > { %6585 = vmatpush3.msra.mxu1 %v8104_v5  ;;  %6606 = vmatprep.subr.mxu0 %v7962_v1  ;;  %v8183_v16 = vld [vmem:[%s8123_s25] sm:$0x7f]  ;;  %v8191_v17 = vld [vmem:[%s10619_s1 + $0xd8] sm:$0xff]  ;;  %v8197_v18 = vld [vmem:[%s10619_s1 + $0x110] sm:$0xff] }
  0x22   : > { %6586 = vmatprep.subr.mxu1 %v7962_v1  ;;  %6607 = vmatpush3.msra.mxu0 %v8112_v6  ;;  %v8207_v19 = vld [vmem:[%s10619_s1 + $0xd0] sm:$0xff]  ;;  %v8212_v20 = vld [vmem:[%s10619_s1 + $0x108] sm:$0xff]  ;;  %v8228_v22 = vld [vmem:[%s10619_s1 + $0x100] sm:$0xff] }
  0x23   : > { %6587 = vmatpush3.msra.mxu1 %v8118_v7  ;;  %6608 = vmatprep.subr.mxu0 %v7962_v1  ;;  %v8220_v21 = vld [vmem:[%s10619_s1 + $0xc8] sm:$0xff]  ;;  %v8234_v23 = vld [vmem:[%s10619_s1 + $0xc0] sm:$0xff]  ;;  %v8241_v24 = vld [vmem:[%s8123_s25 + $0x18] sm:$0x7f] }
  0x24   : > { %6589 = vmatmul.mubr.msk.f32.vlgmr.msra.gmra.mxu1 %vm396_vm1, %v8128_v8  ;;  %6591 = vmatprep.subr.mxu1 %v7962_v1  ;;  %v8248_v25 = vld [vmem:[%s10619_s1 + $0x78] sm:$0xff]  ;;  %v8254_v26 = vld [vmem:[%s8123_s25 + $0x1] sm:$0x7f]  ;;  %v8267_v28 = vld [vmem:[%s10619_s1 + $0x70] sm:$0xff] }
  0x25   : > { %6592 = vmatpush3.msra.mxu1 %v8135_v9  ;;  %6599 = vmatprep.mubr.msk.f32.mxu1 %vm7963_vm0, %v7962_v1  ;;  %v8262_v27 = vld [vmem:[%s10619_s1 + $0x38] sm:$0xff]  ;;  %v8277_v29 = vld [vmem:[%s10619_s1 + $0x30] sm:$0xff]  ;;  %v8282_v30 = vld [vmem:[%s10619_s1 + $0x68] sm:$0xff] }
  0x26   : > { %6593 = vmatprep.subr.mxu1 %v7962_v1  ;;  %6609 = vmatpush3.msra.mxu0 %v8143_v10  ;;  %v8291_v31 = vld [vmem:[%s10619_s1 + $0x28] sm:$0xff]  ;;  %v8296_v32 = vld [vmem:[%s10619_s1 + $0x60] sm:$0xff]  ;;  %v8315_v34 = vld [vmem:[%s10619_s1 + $0xb8] sm:$0xff] }
  0x27   : > { %6594 = vmatpush3.msra.mxu1 %v8151_v11  ;;  %6624 = vmatprep.subr.mxu0 %v7962_v1  ;;  %v8305_v33 = vld [vmem:[%s10619_s1 + $0x20] sm:$0xff]  ;;  %v8326_v35 = vld [vmem:[%s10619_s1 + $0xf8] sm:$0xff]  ;;  %v8331_v36 = vld [vmem:[%s10619_s1 + $0xb0] sm:$0xff] }
  0x28   : > { %6595 = vmatprep.subr.mxu1 %v7962_v1  ;;  %6611 = vmatmul.mubr.msk.f32.vlgmr.msra.gmra.mxu0 %vm396_vm1, %v8164_v13  ;;  %v8341_v37 = vld [vmem:[%s10619_s1 + $0xf0] sm:$0xff]  ;;  %v8346_v38 = vld [vmem:[%s10619_s1 + $0xa8] sm:$0xff]  ;;  %v8360_v40 = vld [vmem:[%s10619_s1 + $0xa0] sm:$0xff] }
  0x29   : > { %6596 = vmatpush3.msra.mxu1 %v8160_v12  ;;  %6625 = vmatpush3.msra.mxu0 %v8172_v14  ;;  %v8355_v39 = vld [vmem:[%s10619_s1 + $0xe8] sm:$0xff]  ;;  %v8369_v41 = vld [vmem:[%s10619_s1 + $0xe0] sm:$0xff]  ;;  %v8379_v42 = vld [vmem:[%s10619_s1 + $0x138] sm:$0xff] }
  0x2a   : > { %6597 = vmatprep.subr.mxu1 %v7962_v1  ;;  %6626 = vmatprep.subr.mxu0 %v7962_v1  ;;  %v8390_v43 = vld [vmem:[%s10619_s1 + $0x130] sm:$0xff]  ;;  %v8400_v44 = vld [vmem:[%s10619_s1 + $0x128] sm:$0xff]  ;;  %v8409_v45 = vld [vmem:[%s10619_s1 + $0x120] sm:$0xff] }
  0x2b   : > { %6598 = vmatpush3.msra.mxu1 %v8178_v15  ;;  %6627 = vmatpush3.msra.mxu0 %v8197_v18  ;;  %v5725_v46 = vld [vmem:[%s8123_s25 + $0x9] sm:$0x7f]  ;;  %v8543_v47 = vld [vmem:[%s8123_s25 + $0x18] sm:$0x7f]  ;;  %v5733_v48 = vld [vmem:[%s8123_s25 + $0x10] sm:$0x7f] }
  0x2c   : > { %6600 = vmatmul.mubr.msk.f32.vlgmr.msra.gmra.mxu1 %vm396_vm1, %v8183_v16  ;;  %6613 = vmatprep.subr.mxu1 %v7962_v1  ;;  %v8570_v49 = vld [vmem:[%s8123_s25 + $0x1] sm:$0x7f]  ;;  %v8589_v50 = vld [vmem:[%s8123_s25 + $0x9] sm:$0x7f]  ;;  %v8600_v51 = vld [vmem:[%s8123_s25 + $0x11] sm:$0x7f] }
  0x2d   : > { %6614 = vmatpush3.msra.mxu1 %v8191_v17  ;;  %6628 = vmatprep.subr.mxu0 %v7962_v1  ;;  %v5787_v52 = vld [vmem:[%s8123_s25 + $0x19] sm:$0x7f]  ;;  %s377_s25 = sand.u32 1, %s7952_s18  }
  0x2e   : > { %6615 = vmatprep.subr.mxu1 %v7962_v1  ;;  %6629 = vmatpush3.msra.mxu0 %v8212_v20  ;;  %s378_s13 = scalar_lea.vmem [#allocation4], %s377_s25  ;;  %s5599_s16 = scalar_lea.sflag [#allocation5], %s377_s25 }
  0x2f   : > { %6616 = vmatpush3.msra.mxu1 %v8207_v19  ;;  %6621 = vmatprep.mubr.msk.f32.mxu1 %vm7963_vm0, %v7962_v1  ;;  %s5611_s14 = sshll.u32 %s378_s13, 4  ;;  %s5612_s14 = int_to_ptr.vmem [resolvable:$true] %s5611_s14 }
  0x30   : > { %6617 = vmatprep.subr.mxu1 %v7962_v1  ;;  %6630 = vmatprep.subr.mxu0 %v7962_v1  ;;  %s7900_s29 = scalar_lea.vmem %s5612_s14, 16  ;;  %p7907_p0 = scmp.lt.s32.totalorder %s5612_s14, %s7905_s0 }
  0x31   : > { %6618 = vmatpush3.msra.mxu1 %v8220_v21  ;;  %6631 = vmatpush3.msra.mxu0 %v8228_v22  ;;  %p7901_p11 = scmp.ne.s32.totalorder %s5612_s14, %s7900_s29  ;;  %p7908_p1 = scmp.lt.s32.totalorder %s7906_s21, %s7900_s29 }
  0x32   : > { %6619 = vmatprep.subr.mxu1 %v7962_v1  ;;  %6632 = vmatprep.mubr.msk.f32.mxu0 %vm7963_vm0, %v7962_v1 }
  0x33   : > { %6620 = vmatpush3.msra.mxu1 %v8234_v23  ;;  %6646 = vmatprep.subr.mxu0 %v7962_v1  ;;  %p7902_p12 = pnand %p7901_p11, %p8063_p5  ;;  %p7909_p2 = por %p7908_p1, %p7907_p0 }
  0x34   : > { %6622 = vmatmul.mubr.msk.f32.vlgmr.msra.gmra.mxu1 %vm396_vm1, %v8241_v24  ;;  %6635 = vmatprep.subr.mxu1 %v7962_v1 }
  0x35   : > { %6636 = vmatpush3.msra.mxu1 %v8248_v25  ;;  %6633 = vmatmul.mubr.msk.f32.vlgmr.msra.gmra.mxu0 %vm396_vm1, %v8254_v26  ;;  %p7903_p13 = pneg %p7902_p12 }
  0x36   : > { %6637 = vmatprep.subr.mxu1 %v7962_v1  ;;  %6647 = vmatpush3.msra.mxu0 %v8262_v27 }
  0x37   : > { %6638 = vmatpush3.msra.mxu1 %v8267_v28  ;;  %6648 = vmatprep.subr.mxu0 %v7962_v1  ;;  %p7910_p3 = pnand %p7909_p2, %p7903_p13 }
  0x38   : > { %6639 = vmatprep.subr.mxu1 %v7962_v1  ;;  %6649 = vmatpush3.msra.mxu0 %v8277_v29 }
  0x39   : > { %6640 = vmatpush3.msra.mxu1 %v8282_v30  ;;  %6650 = vmatprep.subr.mxu0 %v7962_v1 }
  0x3a   : > { %6641 = vmatprep.subr.mxu1 %v7962_v1  ;;  %6651 = vmatpush3.msra.mxu0 %v8291_v31 }
  0x3b   : > { %6642 = vmatpush3.msra.mxu1 %v8296_v32  ;;  %6643 = vmatprep.mubr.msk.f32.mxu1 %vm7963_vm0, %v7962_v1 }
  0x3c   : > { %6652 = vmatprep.subr.mxu0 %v7962_v1  ;;  %6644 = vmatmul.mubr.msk.f32.vlgmr.msra.gmra.mxu1 %vm396_vm1, %v8128_v8 }
  0x3d   : > { %6653 = vmatpush3.msra.mxu0 %v8305_v33  ;;  %6654 = vmatprep.mubr.msk.f32.mxu0 %vm7963_vm0, %v7962_v1 }
  0x3e   : > { %6657 = vmatprep.subr.mxu1 %v7962_v1  ;;  %6655 = vmatmul.mubr.msk.f32.vlgmr.msra.gmra.mxu0 %vm396_vm1, %v8183_v16  ;;  %v3379_v16 = vld [vmem:[%s10550_s3 + $0x8] sm:$0xff] }
  0x3f   : > { %6658 = vmatpush3.msra.mxu1 %v8315_v34  ;;  %6668 = vmatprep.subr.mxu0 %v7962_v1 }
  0x40   : > { %6659 = vmatprep.subr.mxu1 %v7962_v1  ;;  %6669 = vmatpush3.msra.mxu0 %v8326_v35 }
  0x41   : > { %6660 = vmatpush3.msra.mxu1 %v8331_v36  ;;  %6670 = vmatprep.subr.mxu0 %v7962_v1 }
  0x42   : > { %6661 = vmatprep.subr.mxu1 %v7962_v1  ;;  %6671 = vmatpush3.msra.mxu0 %v8341_v37 }
  0x43   : > { %6662 = vmatpush3.msra.mxu1 %v8346_v38  ;;  %6672 = vmatprep.subr.mxu0 %v7962_v1 }
  0x44   : > { %6663 = vmatprep.subr.mxu1 %v7962_v1  ;;  %6673 = vmatpush3.msra.mxu0 %v8355_v39 }
  0x45   : > { %6664 = vmatpush3.msra.mxu1 %v8360_v40  ;;  %6665 = vmatprep.mubr.msk.f32.mxu1 %vm7963_vm0, %v7962_v1 }
  0x46   : > { %6674 = vmatprep.subr.mxu0 %v7962_v1  ;;  %6666 = vmatmul.mubr.msk.f32.vlgmr.msra.gmra.mxu1 %vm396_vm1, %v8164_v13 }
  0x47   : > { %6675 = vmatpush3.msra.mxu0 %v8369_v41  ;;  %6679 = vmatprep.subr.mxu1 %v7962_v1 }
  0x48   : > { %6676 = vmatprep.mubr.msk.f32.mxu0 %vm7963_vm0, %v7962_v1  ;;  %6680 = vmatpush3.msra.mxu1 %v8379_v42 }
  0x49   : > { %6690 = vmatprep.subr.mxu0 %v7962_v1  ;;  %6677 = vmatmul.mubr.msk.f32.vlgmr.msra.gmra.mxu0 %vm396_vm1, %v8241_v24 }
  0x4a   : > { %6681 = vmatprep.subr.mxu1 %v7962_v1  ;;  %6691 = vmatpush3.msra.mxu0 %v8076_v0 }
  0x4b   : > { %6682 = vmatpush3.msra.mxu1 %v8390_v43  ;;  %6692 = vmatprep.subr.mxu0 %v7962_v1 }
  0x4c   : > { %6683 = vmatprep.subr.mxu1 %v7962_v1  ;;  %6693 = vmatpush3.msra.mxu0 %v8083_v2 }
  0x4d   : > { %6684 = vmatpush3.msra.mxu1 %v8400_v44  ;;  %6694 = vmatprep.subr.mxu0 %v7962_v1 }
  0x4e   : > { %6685 = vmatprep.subr.mxu1 %v7962_v1  ;;  %6695 = vmatpush3.msra.mxu0 %v8104_v5 }
  0x4f   : > { %6686 = vmatpush3.msra.mxu1 %v8409_v45  ;;  %6687 = vmatprep.mubr.msk.f32.mxu1 %vm7963_vm0, %v7962_v1 }
  0x50   : > { %6696 = vmatprep.subr.mxu0 %v7962_v1  ;;  %6688 = vmatmul.mubr.msk.f32.vlgmr.msra.gmra.mxu1 %vm396_vm1, %v8254_v26 }
  0x51   : > { %6697 = vmatpush3.msra.mxu0 %v8118_v7  ;;  %6701 = vmatprep.subr.mxu1 %v7962_v1 }
  0x52   : > { %6698 = vmatprep.mubr.msk.f32.mxu0 %vm7963_vm0, %v7962_v1  ;;  %6702 = vmatpush3.msra.mxu1 %v8135_v9 }
  0x53   : > { %6712 = vmatprep.subr.mxu0 %v7962_v1  ;;  %6699 = vmatmul.mubr.msk.f32.vlgmr.msra.gmra.mxu0 %vm396_vm1, %v8164_v13 }
  0x54   : > { %6703 = vmatprep.subr.mxu1 %v7962_v1  ;;  %6713 = vmatpush3.msra.mxu0 %v8090_v3 }
  0x55   : > { %6704 = vmatpush3.msra.mxu1 %v8151_v11  ;;  %6714 = vmatprep.subr.mxu0 %v7962_v1 }
  0x56   : > { %6705 = vmatprep.subr.mxu1 %v7962_v1  ;;  %6715 = vmatpush3.msra.mxu0 %v8098_v4 }
  0x57   : > { %6706 = vmatpush3.msra.mxu1 %v8160_v12  ;;  %6716 = vmatprep.subr.mxu0 %v7962_v1 }
  0x58   : > { %6707 = vmatprep.subr.mxu1 %v7962_v1  ;;  %6717 = vmatpush3.msra.mxu0 %v8112_v6 }
  0x59   : > { %6708 = vmatpush3.msra.mxu1 %v8178_v15  ;;  %6709 = vmatprep.mubr.msk.f32.mxu1 %vm7963_vm0, %v7962_v1 }
  0x5a   : > { %6718 = vmatprep.subr.mxu0 %v7962_v1  ;;  %6710 = vmatmul.mubr.msk.f32.vlgmr.msra.gmra.mxu1 %vm396_vm1, %v8128_v8 }
  0x5b   : > { %6719 = vmatpush3.msra.mxu0 %v8143_v10  ;;  %6723 = vmatprep.subr.mxu1 %v7962_v1 }
  0x5c   : > { %6720 = vmatprep.mubr.msk.f32.mxu0 %vm7963_vm0, %v7962_v1  ;;  %6724 = vmatpush3.msra.mxu1 %v8191_v17 }
  0x5d   : > { %6734 = vmatprep.subr.mxu0 %v7962_v1  ;;  %6721 = vmatmul.mubr.msk.f32.vlgmr.msra.gmra.mxu0 %vm396_vm1, %v8241_v24 }
  0x5e   : > { %6725 = vmatprep.subr.mxu1 %v7962_v1  ;;  %6735 = vmatpush3.msra.mxu0 %v8172_v14 }
  0x5f   : > { %6726 = vmatpush3.msra.mxu1 %v8207_v19  ;;  %6736 = vmatprep.subr.mxu0 %v7962_v1 }
  0x60   : > { %6727 = vmatprep.subr.mxu1 %v7962_v1  ;;  %6737 = vmatpush3.msra.mxu0 %v8197_v18 }
  0x61   : > { %6728 = vmatpush3.msra.mxu1 %v8220_v21  ;;  %6738 = vmatprep.subr.mxu0 %v7962_v1 }
  0x62   : > { %6729 = vmatprep.subr.mxu1 %v7962_v1  ;;  %6739 = vmatpush3.msra.mxu0 %v8212_v20 }
  0x63   : > { %6730 = vmatpush3.msra.mxu1 %v8234_v23  ;;  %6731 = vmatprep.mubr.msk.f32.mxu1 %vm7963_vm0, %v7962_v1 }
  0x64   : > { %6740 = vmatprep.subr.mxu0 %v7962_v1  ;;  %6732 = vmatmul.mubr.msk.f32.vlgmr.msra.gmra.mxu1 %vm396_vm1, %v8254_v26 }
  0x65   : > { %6741 = vmatpush3.msra.mxu0 %v8228_v22  ;;  %6745 = vmatprep.subr.mxu1 %v7962_v1 }
  0x66   : > { %6742 = vmatprep.mubr.msk.f32.mxu0 %vm7963_vm0, %v7962_v1  ;;  %6746 = vmatpush3.msra.mxu1 %v8248_v25 }
  0x67   : > { %6756 = vmatprep.subr.mxu0 %v7962_v1  ;;  %6743 = vmatmul.mubr.msk.f32.vlgmr.msra.gmra.mxu0 %vm396_vm1, %v5725_v46 }
  0x68   : > { %6747 = vmatprep.subr.mxu1 %v7962_v1  ;;  %6757 = vmatpush3.msra.mxu0 %v8262_v27 }
  0x69   : > { %6748 = vmatpush3.msra.mxu1 %v8267_v28  ;;  %6758 = vmatprep.subr.mxu0 %v7962_v1 }
  0x6a   : > { %6749 = vmatprep.subr.mxu1 %v7962_v1  ;;  %6759 = vmatpush3.msra.mxu0 %v8277_v29 }
  0x6b   : > { %6750 = vmatpush3.msra.mxu1 %v8282_v30  ;;  %6760 = vmatprep.subr.mxu0 %v7962_v1 }
  0x6c   : > { %6751 = vmatprep.subr.mxu1 %v7962_v1  ;;  %6761 = vmatpush3.msra.mxu0 %v8291_v31 }
  0x6d   : > { %6752 = vmatpush3.msra.mxu1 %v8296_v32  ;;  %6753 = vmatprep.mubr.msk.f32.mxu1 %vm7963_vm0, %v7962_v1 }
  0x6e   : > { %6762 = vmatprep.subr.mxu0 %v7962_v1  ;;  %6754 = vmatmul.mubr.msk.f32.vlgmr.msra.gmra.mxu1 %vm396_vm1, %v8164_v13 }
  0x6f   : > { %6763 = vmatpush3.msra.mxu0 %v8305_v33  ;;  %6764 = vmatprep.mubr.msk.f32.mxu0 %vm7963_vm0, %v7962_v1 }
  0x70   : > { %6767 = vmatprep.subr.mxu1 %v7962_v1  ;;  %6765 = vmatmul.mubr.msk.f32.vlgmr.msra.gmra.mxu0 %vm396_vm1, %v8128_v8 }
  0x71   : > { %6768 = vmatpush3.msra.mxu1 %v8315_v34  ;;  %6778 = vmatprep.subr.mxu0 %v7962_v1 }
  0x72   : > { %6769 = vmatprep.subr.mxu1 %v7962_v1  ;;  %6779 = vmatpush3.msra.mxu0 %v8326_v35 }
  0x73   : > { %6770 = vmatpush3.msra.mxu1 %v8331_v36  ;;  %6780 = vmatprep.subr.mxu0 %v7962_v1 }
  0x74   : > { %6771 = vmatprep.subr.mxu1 %v7962_v1  ;;  %6781 = vmatpush3.msra.mxu0 %v8341_v37 }
  0x75   : > { %6772 = vmatpush3.msra.mxu1 %v8346_v38  ;;  %6782 = vmatprep.subr.mxu0 %v7962_v1 }
  0x76   : > { %6773 = vmatprep.subr.mxu1 %v7962_v1  ;;  %6783 = vmatpush3.msra.mxu0 %v8355_v39 }
  0x77   : > { %6774 = vmatpush3.msra.mxu1 %v8360_v40  ;;  %6775 = vmatprep.mubr.msk.f32.mxu1 %vm7963_vm0, %v7962_v1 }
  0x78   : > { %6784 = vmatprep.subr.mxu0 %v7962_v1  ;;  %6776 = vmatmul.mubr.msk.f32.vlgmr.msra.gmra.mxu1 %vm396_vm1, %v8241_v24 }
  0x79   : > { %6785 = vmatpush3.msra.mxu0 %v8369_v41  ;;  %6789 = vmatprep.subr.mxu1 %v7962_v1 }
  0x7a   : > { %6786 = vmatprep.mubr.msk.f32.mxu0 %vm7963_vm0, %v7962_v1  ;;  %6790 = vmatpush3.msra.mxu1 %v8379_v42 }
  0x7b   : > { %6800 = vmatprep.subr.mxu0 %v7962_v1  ;;  %6787 = vmatmul.mubr.msk.f32.vlgmr.msra.gmra.mxu0 %vm396_vm1, %v8254_v26 }
  0x7c   : > { %6791 = vmatprep.subr.mxu1 %v7962_v1  ;;  %6801 = vmatpush3.msra.mxu0 %v8076_v0 }
  0x7d   : > { %6792 = vmatpush3.msra.mxu1 %v8390_v43  ;;  %6802 = vmatprep.subr.mxu0 %v7962_v1 }
  0x7e   : > { %6793 = vmatprep.subr.mxu1 %v7962_v1  ;;  %6803 = vmatpush3.msra.mxu0 %v8083_v2 }
  0x7f   : > { %6794 = vmatpush3.msra.mxu1 %v8400_v44  ;;  %6804 = vmatprep.subr.mxu0 %v7962_v1 }
  0x80   : > { %6795 = vmatprep.subr.mxu1 %v7962_v1  ;;  %6805 = vmatpush3.msra.mxu0 %v8104_v5 }
  0x81   : > { %6796 = vmatpush3.msra.mxu1 %v8409_v45  ;;  %6797 = vmatprep.mubr.msk.f32.mxu1 %vm7963_vm0, %v7962_v1 }
  0x82   : > { %6806 = vmatprep.subr.mxu0 %v7962_v1  ;;  %6798 = vmatmul.mubr.msk.f32.vlgmr.msra.gmra.mxu1 %vm396_vm1, %v5725_v46  ;;  %v5800_v46 = vld [vmem:[%s10550_s3 + $0x108] sm:$0xff] }
  0x83   : > { %6807 = vmatpush3.msra.mxu0 %v8118_v7  ;;  %6811 = vmatprep.subr.mxu1 %v7962_v1 }
  0x84   : > { %6808 = vmatprep.mubr.msk.f32.mxu0 %vm7963_vm0, %v7962_v1  ;;  %6812 = vmatpush3.msra.mxu1 %v8135_v9 }
  0x85   : > { %6822 = vmatprep.subr.mxu0 %v7962_v1  ;;  %6809 = vmatmul.mubr.msk.f32.vlgmr.msra.gmra.mxu0 %vm396_vm1, %v8543_v47 }
  0x86   : > { %6813 = vmatprep.subr.mxu1 %v7962_v1  ;;  %6823 = vmatpush3.msra.mxu0 %v8090_v3 }
  0x87   : > { %6814 = vmatpush3.msra.mxu1 %v8151_v11  ;;  %6824 = vmatprep.subr.mxu0 %v7962_v1 }
  0x88   : > { %6815 = vmatprep.subr.mxu1 %v7962_v1  ;;  %6825 = vmatpush3.msra.mxu0 %v8098_v4 }
  0x89   : > { %6816 = vmatpush3.msra.mxu1 %v8160_v12  ;;  %6826 = vmatprep.subr.mxu0 %v7962_v1 }
  0x8a   : > { %6817 = vmatprep.subr.mxu1 %v7962_v1  ;;  %6827 = vmatpush3.msra.mxu0 %v8112_v6 }
  0x8b   : > { %6818 = vmatpush3.msra.mxu1 %v8178_v15  ;;  %6819 = vmatprep.mubr.msk.f32.mxu1 %vm7963_vm0, %v7962_v1 }
  0x8c   : > { %6828 = vmatprep.subr.mxu0 %v7962_v1  ;;  %6820 = vmatmul.mubr.msk.f32.vlgmr.msra.gmra.mxu1 %vm396_vm1, %v5733_v48 }
  0x8d   : > { %6829 = vmatpush3.msra.mxu0 %v8143_v10  ;;  %6833 = vmatprep.subr.mxu1 %v7962_v1 }
  0x8e   : > { %6830 = vmatprep.mubr.msk.f32.mxu0 %vm7963_vm0, %v7962_v1  ;;  %6834 = vmatpush3.msra.mxu1 %v8191_v17 }
  0x8f   : > { %6844 = vmatprep.subr.mxu0 %v7962_v1  ;;  %6831 = vmatmul.mubr.msk.f32.vlgmr.msra.gmra.mxu0 %vm396_vm1, %v8570_v49 }
  0x90   : > { %6835 = vmatprep.subr.mxu1 %v7962_v1  ;;  %6845 = vmatpush3.msra.mxu0 %v8172_v14 }
  0x91   : > { %6836 = vmatpush3.msra.mxu1 %v8207_v19  ;;  %6846 = vmatprep.subr.mxu0 %v7962_v1 }
  0x92   : > { %6837 = vmatprep.subr.mxu1 %v7962_v1  ;;  %6847 = vmatpush3.msra.mxu0 %v8197_v18 }
  0x93   : > { %6838 = vmatpush3.msra.mxu1 %v8220_v21  ;;  %6848 = vmatprep.subr.mxu0 %v7962_v1 }
  0x94   : > { %6839 = vmatprep.subr.mxu1 %v7962_v1  ;;  %6849 = vmatpush3.msra.mxu0 %v8212_v20 }
  0x95   : > { %6840 = vmatpush3.msra.mxu1 %v8234_v23  ;;  %6841 = vmatprep.mubr.msk.f32.mxu1 %vm7963_vm0, %v7962_v1 }
  0x96   : > { %6850 = vmatprep.subr.mxu0 %v7962_v1  ;;  %6842 = vmatmul.mubr.msk.f32.vlgmr.msra.gmra.mxu1 %vm396_vm1, %v8589_v50 }
  0x97   : > { %6851 = vmatpush3.msra.mxu0 %v8228_v22  ;;  %6855 = vmatprep.subr.mxu1 %v7962_v1 }
  0x98   : > { %6852 = vmatprep.mubr.msk.f32.mxu0 %vm7963_vm0, %v7962_v1  ;;  %6856 = vmatpush3.msra.mxu1 %v8248_v25 }
  0x99   : > { %6866 = vmatprep.subr.mxu0 %v7962_v1  ;;  %6853 = vmatmul.mubr.msk.f32.vlgmr.msra.gmra.mxu0 %vm396_vm1, %v8600_v51 }
  0x9a   : > { %6857 = vmatprep.subr.mxu1 %v7962_v1  ;;  %6867 = vmatpush3.msra.mxu0 %v8262_v27 }
  0x9b   : > { %6858 = vmatpush3.msra.mxu1 %v8267_v28  ;;  %6868 = vmatprep.subr.mxu0 %v7962_v1 }
  0x9c   : > { %6859 = vmatprep.subr.mxu1 %v7962_v1  ;;  %6869 = vmatpush3.msra.mxu0 %v8277_v29 }
  0x9d   : > { %6860 = vmatpush3.msra.mxu1 %v8282_v30  ;;  %6870 = vmatprep.subr.mxu0 %v7962_v1 }
  0x9e   : > { %6861 = vmatprep.subr.mxu1 %v7962_v1  ;;  %6871 = vmatpush3.msra.mxu0 %v8291_v31 }
  0x9f   : > { %6862 = vmatpush3.msra.mxu1 %v8296_v32  ;;  %6863 = vmatprep.mubr.msk.f32.mxu1 %vm7963_vm0, %v7962_v1 }
  0xa0   : > { %6872 = vmatprep.subr.mxu0 %v7962_v1  ;;  %6864 = vmatmul.mubr.msk.f32.vlgmr.msra.gmra.mxu1 %vm396_vm1, %v8543_v47 }
  0xa1   : > { %6873 = vmatpush3.msra.mxu0 %v8305_v33  ;;  %6874 = vmatprep.mubr.msk.f32.mxu0 %vm7963_vm0, %v7962_v1 }
  0xa2   : > { %6877 = vmatprep.subr.mxu1 %v7962_v1  ;;  %6875 = vmatmul.mubr.msk.f32.vlgmr.msra.gmra.mxu0 %vm396_vm1, %v5733_v48  ;;  %v5798_v48 = vld [vmem:[%s10550_s3 + $0xf8] sm:$0xff] }
  0xa3   : > { %6878 = vmatpush3.msra.mxu1 %v8315_v34  ;;  %6888 = vmatprep.subr.mxu0 %v7962_v1 }
  0xa4   : > { %6879 = vmatprep.subr.mxu1 %v7962_v1  ;;  %6889 = vmatpush3.msra.mxu0 %v8326_v35 }
  0xa5   : > { %6880 = vmatpush3.msra.mxu1 %v8331_v36  ;;  %6890 = vmatprep.subr.mxu0 %v7962_v1 }
  0xa6   : > { %6881 = vmatprep.subr.mxu1 %v7962_v1  ;;  %6891 = vmatpush3.msra.mxu0 %v8341_v37 }
  0xa7   : > { %6882 = vmatpush3.msra.mxu1 %v8346_v38  ;;  %6892 = vmatprep.subr.mxu0 %v7962_v1 }
  0xa8   : > { %6883 = vmatprep.subr.mxu1 %v7962_v1  ;;  %6893 = vmatpush3.msra.mxu0 %v8355_v39 }
  0xa9   : > { %6884 = vmatpush3.msra.mxu1 %v8360_v40  ;;  %6885 = vmatprep.mubr.msk.f32.mxu1 %vm7963_vm0, %v7962_v1 }
  0xaa   : > { %6894 = vmatprep.subr.mxu0 %v7962_v1  ;;  %6886 = vmatmul.mubr.msk.f32.vlgmr.msra.gmra.mxu1 %vm396_vm1, %v8570_v49 }
  0xab   : > { %6895 = vmatpush3.msra.mxu0 %v8369_v41  ;;  %6899 = vmatprep.subr.mxu1 %v7962_v1 }
  0xac   : > { %6896 = vmatprep.mubr.msk.f32.mxu0 %vm7963_vm0, %v7962_v1  ;;  %6900 = vmatpush3.msra.mxu1 %v8379_v42 }
  0xad   : > { %6910 = vmatprep.subr.mxu0 %v7962_v1  ;;  %6897 = vmatmul.mubr.msk.f32.vlgmr.msra.gmra.mxu0 %vm396_vm1, %v8589_v50 }
  0xae   : > { %6901 = vmatprep.subr.mxu1 %v7962_v1  ;;  %6911 = vmatpush3.msra.mxu0 %v8076_v0 }
  0xaf   : > { %6902 = vmatpush3.msra.mxu1 %v8390_v43  ;;  %6912 = vmatprep.subr.mxu0 %v7962_v1 }
  0xb0   : > { %6903 = vmatprep.subr.mxu1 %v7962_v1  ;;  %6913 = vmatpush3.msra.mxu0 %v8083_v2  ;;  %v3386_v2 = vld [vmem:[%s10550_s3 + $0x40] sm:$0xff] }
  0xb1   : > { %6904 = vmatpush3.msra.mxu1 %v8400_v44  ;;  %6914 = vmatprep.subr.mxu0 %v7962_v1 }
  0xb2   : > { %6905 = vmatprep.subr.mxu1 %v7962_v1  ;;  %6915 = vmatpush3.msra.mxu0 %v8104_v5  ;;  %v3384_v5 = vld [vmem:[%s10550_s3 + $0x30] sm:$0xff] }
  0xb3   : > { %6906 = vmatpush3.msra.mxu1 %v8409_v45  ;;  %6907 = vmatprep.mubr.msk.f32.mxu1 %vm7963_vm0, %v7962_v1 }
  0xb4   : > { %6916 = vmatprep.subr.mxu0 %v7962_v1  ;;  %6908 = vmatmul.mubr.msk.f32.vlgmr.msra.gmra.mxu1 %vm396_vm1, %v8600_v51 }
  0xb5   : > { %6917 = vmatpush3.msra.mxu0 %v8118_v7  ;;  %6921 = vmatprep.subr.mxu1 %v7962_v1  ;;  %v3383_v7 = vld [vmem:[%s10550_s3 + $0x28] sm:$0xff] }
  0xb6   : > { %6918 = vmatprep.mubr.msk.f32.mxu0 %vm7963_vm0, %v7962_v1  ;;  %6922 = vmatpush3.msra.mxu1 %v8135_v9 }
  0xb7   : > { %6932 = vmatprep.subr.mxu0 %v7962_v1  ;;  %6919 = vmatmul.mubr.msk.f32.vlgmr.msra.gmra.mxu0 %vm396_vm1, %v8570_v49 }
  0xb8   : > { %6923 = vmatprep.subr.mxu1 %v7962_v1  ;;  %6933 = vmatpush3.msra.mxu0 %v8090_v3 }
  0xb9   : > { %6924 = vmatpush3.msra.mxu1 %v8151_v11  ;;  %6934 = vmatprep.subr.mxu0 %v7962_v1  ;;  %v3382_v11 = vld [vmem:[%s10550_s3 + $0x20] sm:$0xff] }
  0xba   : > { %6925 = vmatprep.subr.mxu1 %v7962_v1  ;;  %6935 = vmatpush3.msra.mxu0 %v8098_v4  ;;  %v3385_v4 = vld [vmem:[%s10550_s3 + $0x38] sm:$0xff] }
  0xbb   : > { %6926 = vmatpush3.msra.mxu1 %v8160_v12  ;;  %6936 = vmatprep.subr.mxu0 %v7962_v1 }
  0xbc   : > { %6927 = vmatprep.subr.mxu1 %v7962_v1  ;;  %6937 = vmatpush3.msra.mxu0 %v8112_v6 }
  0xbd   : > { %6928 = vmatpush3.msra.mxu1 %v8178_v15  ;;  %6929 = vmatprep.mubr.msk.f32.mxu1 %vm7963_vm0, %v7962_v1  ;;  %v3380_v15 = vld [vmem:[%s10550_s3 + $0x10] sm:$0xff] }
  0xbe   : > { %6938 = vmatprep.subr.mxu0 %v7962_v1  ;;  %6930 = vmatmul.mubr.msk.f32.vlgmr.msra.gmra.mxu1 %vm396_vm1, %v8543_v47 }
  0xbf   : > { %6939 = vmatpush3.msra.mxu0 %v8143_v10  ;;  %6943 = vmatprep.subr.mxu1 %v7962_v1 }
  0xc0   : > { %6940 = vmatprep.mubr.msk.f32.mxu0 %vm7963_vm0, %v7962_v1  ;;  %6944 = vmatpush3.msra.mxu1 %v8191_v17 }
  0xc1   : > { %6954 = vmatprep.subr.mxu0 %v7962_v1  ;;  %6941 = vmatmul.mubr.msk.f32.vlgmr.msra.gmra.mxu0 %vm396_vm1, %v8589_v50 }
  0xc2   : > { %6945 = vmatprep.subr.mxu1 %v7962_v1  ;;  %6955 = vmatpush3.msra.mxu0 %v8172_v14  ;;  %v3381_v14 = vld [vmem:[%s10550_s3 + $0x18] sm:$0xff] }
  0xc3   : > { %6946 = vmatpush3.msra.mxu1 %v8207_v19  ;;  %6956 = vmatprep.subr.mxu0 %v7962_v1 }
  0xc4   : > { %6947 = vmatprep.subr.mxu1 %v7962_v1  ;;  %6957 = vmatpush3.msra.mxu0 %v8197_v18  ;;  %v3378_v18 = vld [vmem:[%s10550_s3] sm:$0xff] }
  0xc5   : > { %6948 = vmatpush3.msra.mxu1 %v8220_v21  ;;  %6958 = vmatprep.subr.mxu0 %v7962_v1 }
  0xc6   : > { %6949 = vmatprep.subr.mxu1 %v7962_v1  ;;  %6959 = vmatpush3.msra.mxu0 %v8212_v20 }
  0xc7   : > { %6950 = vmatpush3.msra.mxu1 %v8234_v23  ;;  %6951 = vmatprep.mubr.msk.f32.mxu1 %vm7963_vm0, %v7962_v1 }
  0xc8   : > { %6960 = vmatprep.subr.mxu0 %v7962_v1  ;;  %6952 = vmatmul.mubr.msk.f32.vlgmr.msra.gmra.mxu1 %vm396_vm1, %v8600_v51 }
  0xc9   : > { %6961 = vmatpush3.msra.mxu0 %v8228_v22  ;;  %6965 = vmatprep.subr.mxu1 %v7962_v1 }
  0xca   : > { %6962 = vmatprep.mubr.msk.f32.mxu0 %vm7963_vm0, %v7962_v1  ;;  %6966 = vmatpush3.msra.mxu1 %v8248_v25 }
  0xcb   : > { %6976 = vmatprep.subr.mxu0 %v7962_v1  ;;  %6963 = vmatmul.mubr.msk.f32.vlgmr.msra.gmra.mxu0 %vm396_vm1, %v5787_v52 }
  0xcc   : > { %6967 = vmatprep.subr.mxu1 %v7962_v1  ;;  %6977 = vmatpush3.msra.mxu0 %v8262_v27 }
  0xcd   : > { %6968 = vmatpush3.msra.mxu1 %v8267_v28  ;;  %6978 = vmatprep.subr.mxu0 %v7962_v1 }
  0xce   : > { %6969 = vmatprep.subr.mxu1 %v7962_v1  ;;  %6979 = vmatpush3.msra.mxu0 %v8277_v29 }
  0xcf   : > { %6970 = vmatpush3.msra.mxu1 %v8282_v30  ;;  %6980 = vmatprep.subr.mxu0 %v7962_v1  ;;  %v5808_v30 = vld [vmem:[%s10550_s3 + $0x148] sm:$0xff] }
  0xd0   : > { %6971 = vmatprep.subr.mxu1 %v7962_v1  ;;  %6981 = vmatpush3.msra.mxu0 %v8291_v31  ;;  %v5807_v31 = vld [vmem:[%s10550_s3 + $0x140] sm:$0xff] }
  0xd1   : > { %6972 = vmatpush3.msra.mxu1 %v8296_v32  ;;  %6973 = vmatprep.mubr.msk.f32.mxu1 %vm7963_vm0, %v7962_v1 }
  0xd2   : > { %6982 = vmatprep.subr.mxu0 %v7962_v1  ;;  %6974 = vmatmul.mubr.msk.f32.vlgmr.msra.gmra.mxu1 %vm396_vm1, %v8570_v49 }
  0xd3   : > { %6983 = vmatpush3.msra.mxu0 %v8305_v33  ;;  %6984 = vmatprep.mubr.msk.f32.mxu0 %vm7963_vm0, %v7962_v1 }
  0xd4   : > { %6987 = vmatprep.subr.mxu1 %v7962_v1  ;;  %6985 = vmatmul.mubr.msk.f32.vlgmr.msra.gmra.mxu0 %vm396_vm1, %v8543_v47  ;;  %v5799_v47 = vld [vmem:[%s10550_s3 + $0x100] sm:$0xff] }
  0xd5   : > { %6988 = vmatpush3.msra.mxu1 %v8315_v34  ;;  %6998 = vmatprep.subr.mxu0 %v7962_v1  ;;  %v5806_v34 = vld [vmem:[%s10550_s3 + $0x138] sm:$0xff] }
  0xd6   : > { %6989 = vmatprep.subr.mxu1 %v7962_v1  ;;  %6999 = vmatpush3.msra.mxu0 %v8326_v35 }
  0xd7   : > { %6990 = vmatpush3.msra.mxu1 %v8331_v36  ;;  %7000 = vmatprep.subr.mxu0 %v7962_v1 }
  0xd8   : > { %6991 = vmatprep.subr.mxu1 %v7962_v1  ;;  %7001 = vmatpush3.msra.mxu0 %v8341_v37  ;;  %v5805_v37 = vld [vmem:[%s10550_s3 + $0x130] sm:$0xff] }
  0xd9   : > { %6992 = vmatpush3.msra.mxu1 %v8346_v38  ;;  %7002 = vmatprep.subr.mxu0 %v7962_v1  ;;  %v5804_v38 = vld [vmem:[%s10550_s3 + $0x128] sm:$0xff] }
  0xda   : > { %6993 = vmatprep.subr.mxu1 %v7962_v1  ;;  %6995 = vmatprep.mubr.msk.f32.mxu1 %vm7963_vm0, %v7962_v1 }
  0xdb   : > { %6994 = vmatpush3.msra.mxu1 %v8360_v40  ;;  %7003 = vmatpush3.msra.mxu0 %v8355_v39  ;;  %v5803_v39 = vld [vmem:[%s10550_s3 + $0x120] sm:$0xff] }
  0xdc   : > { %6996 = vmatmul.mubr.msk.f32.vlgmr.msra.gmra.mxu1 %vm396_vm1, %v8589_v50  ;;  %7004 = vmatprep.subr.mxu0 %v7962_v1  ;;  %v5797_v50 = vld [vmem:[%s10550_s3 + $0xf0] sm:$0xff] }
  0xdd   : > { %7009 = vmatprep.subr.mxu1 %v7962_v1  ;;  %7005 = vmatpush3.msra.mxu0 %v8369_v41  ;;  %v5802_v41 = vld [vmem:[%s10550_s3 + $0x118] sm:$0xff] }
  0xde   : > { %7006 = vmatprep.mubr.msk.f32.mxu0 %vm7963_vm0, %v7962_v1  ;;  %7010 = vmatpush3.msra.mxu1 %v8379_v42 }
  0xdf   : > { %7007 = vmatmul.mubr.msk.f32.vlgmr.msra.gmra.mxu0 %vm396_vm1, %v8600_v51  ;;  %7011 = vmatprep.subr.mxu1 %v7962_v1  ;;  %v5796_v51 = vld [vmem:[%s10550_s3 + $0xe8] sm:$0xff] }
  0xe0   : > { %7017 = vmatprep.mubr.msk.f32.mxu1 %vm7963_vm0, %v7962_v1  ;;  %7012 = vmatpush3.msra.mxu1 %v8390_v43 }
  0xe1   : > { %7020 = vmatprep.subr.mxu0 %v7962_v1  ;;  %7013 = vmatprep.subr.mxu1 %v7962_v1 }
  0xe2   : > { %7048 = vmatprep.mubr.msk.f32.mxu0 %vm7963_vm0, %v7962_v1  ;;  %7014 = vmatpush3.msra.mxu1 %v8400_v44  ;;  %v5801_v44 = vld [vmem:[%s10550_s3 + $0x110] sm:$0xff] }
  0xe3   : > { %7015 = vmatprep.subr.mxu1 %v7962_v1  ;;  %7021 = vmatpush3.msra.mxu0 %v5808_v30 }
  0xe4   : > { %v466_v53 = vpop.f32.mrf.mxu1  ;;  %7016 = vmatpush3.msra.mxu1 %v8409_v45  ;;  %7022 = vmatprep.subr.mxu0 %v7962_v1 }
  0xe5   : > { %7018 = vmatmul.mubr.msk.f32.vlgmr.msra.gmra.mxu1 %vm396_vm1, %v5787_v52  ;;  %7051 = vmatprep.subr.mxu1 %v7962_v1 }
  0xe6   : > { %v6590_v55 = vpop.f32.mrf.mxu1  ;;  %7052 = vmatpush3.msra.mxu1 %v3391_v54  ;;  %7079 = vmatprep.mubr.msk.f32.mxu1 %vm7963_vm0, %v7962_v1  ;;  %v5795_v54 = vld [vmem:[%s10550_s3 + $0xe0] sm:$0xff] }
  0xe7   : > { %7053 = vmatprep.subr.mxu1 %v7962_v1  ;;  %7023 = vmatpush3.msra.mxu0 %v5807_v31  ;;  %v8955_v31 = vld [vmem:[%s10550_s3 + $0x2f0] sm:$0xff] }
  0xe8   : > { %v619_v58 = vpop.f32.mrf.mxu0  ;;  %7054 = vmatpush3.msra.mxu1 %v3390_v56  ;;  %7024 = vmatprep.subr.mxu0 %v7962_v1 }
  0xe9   : > { %7055 = vmatprep.subr.mxu1 %v7962_v1  ;;  %7025 = vmatpush3.msra.mxu0 %v5806_v34  ;;  %v8962_v34 = vld [vmem:[%s10550_s3 + $0x2e8] sm:$0xff] }
  0xea   : > { %v6612_v60 = vpop.f32.mrf.mxu0  ;;  %7056 = vmatpush3.msra.mxu1 %v3389_v57  ;;  %7026 = vmatprep.subr.mxu0 %v7962_v1 }
  0xeb   : > { %7057 = vmatprep.subr.mxu1 %v7962_v1  ;;  %7027 = vmatpush3.msra.mxu0 %v5805_v37  ;;  %v8971_v37 = vld [vmem:[%s10550_s3 + $0x2e0] sm:$0xff] }
  0xec   : > { %v539_v61 = vpop.f32.mrf.mxu1  ;;  %7058 = vmatpush3.msra.mxu1 %v3388_v59  ;;  %7028 = vmatprep.subr.mxu0 %v7962_v1 }
  0xed   : > { %v540_v63 = vadd.f32 %v539_v61, %v466_v53  ;;  %7059 = vmatprep.subr.mxu1 %v7962_v1  ;;  %7029 = vmatpush3.msra.mxu0 %v5804_v38  ;;  %v8978_v38 = vld [vmem:[%s10550_s3 + $0x2d8] sm:$0xff] }
  0xee   : > { %v6601_v0 = vpop.f32.mrf.mxu1  ;;  %7060 = vmatpush3.msra.mxu1 %v3387_v62  ;;  %7030 = vmatprep.subr.mxu0 %v7962_v1 }
  0xef   : > { %v623_v3 = vadd.f32 %v619_v58, %v540_v63  ;;  %7061 = vmatprep.subr.mxu1 %v7962_v1  ;;  %7031 = vmatpush3.msra.mxu0 %v5803_v39  ;;  %v8985_v39 = vld [vmem:[%s10550_s3 + $0x2d0] sm:$0xff] }
  0xf0   : > { %7062 = vmatpush3.msra.mxu1 %v3386_v2  ;;  %7032 = vmatprep.subr.mxu0 %v7962_v1 }
  0xf1   : > { %7063 = vmatprep.subr.mxu1 %v7962_v1  ;;  %7033 = vmatpush3.msra.mxu0 %v5802_v41  ;;  %v8992_v41 = vld [vmem:[%s10550_s3 + $0x2c8] sm:$0xff] }
  0xf2   : > { %7064 = vmatpush3.msra.mxu1 %v3385_v4  ;;  %7034 = vmatprep.subr.mxu0 %v7962_v1 }
  0xf3   : > { %7065 = vmatprep.subr.mxu1 %v7962_v1  ;;  %7035 = vmatpush3.msra.mxu0 %v5801_v44  ;;  %v8999_v44 = vld [vmem:[%s10550_s3 + $0x2c0] sm:$0xff] }
  0xf4   : > { %v700_v6 = vpop.f32.mrf.mxu1  ;;  %7066 = vmatpush3.msra.mxu1 %v3384_v5  ;;  %7036 = vmatprep.subr.mxu0 %v7962_v1 }
  0xf5   : > { %v704_v8 = vadd.f32 %v700_v6, %v623_v3  ;;  %v780_v10 = vpop.f32.mrf.mxu0  ;;  %7067 = vmatprep.subr.mxu1 %v7962_v1  ;;  %7037 = vmatpush3.msra.mxu0 %v5800_v46  ;;  %v9006_v46 = vld [vmem:[%s10550_s3 + $0x2b8] sm:$0xff] }
  0xf6   : > { %v6623_v9 = vpop.f32.mrf.mxu1  ;;  %7068 = vmatpush3.msra.mxu1 %v3383_v7  ;;  %7038 = vmatprep.subr.mxu0 %v7962_v1 }
  0xf7   : > { %v8828_v12 = vadd.f32 %v780_v10, %v704_v8  ;;  %v6634_v13 = vpop.f32.mrf.mxu0  ;;  %7069 = vmatprep.subr.mxu1 %v7962_v1  ;;  %7039 = vmatpush3.msra.mxu0 %v5799_v47  ;;  %v9013_v47 = vld [vmem:[%s10550_s3 + $0x2b0] sm:$0xff] }
  0xf8   : > { %7070 = vmatpush3.msra.mxu1 %v3382_v11  ;;  %7040 = vmatprep.subr.mxu0 %v7962_v1  ;;  %v8923_v13 = vld [vmem:[%s10549_s2] ss:$0 sm:$0xff] }
  0xf9   : > { %7071 = vmatprep.subr.mxu1 %v7962_v1  ;;  %7041 = vmatpush3.msra.mxu0 %v5798_v48  ;;  %v9020_v48 = vld [vmem:[%s10550_s3 + $0x2a8] sm:$0xff] }
  0xfa   : > { %7072 = vmatpush3.msra.mxu1 %v3381_v14  ;;  %7042 = vmatprep.subr.mxu0 %v7962_v1 }
  0xfb   : > { %7073 = vmatprep.subr.mxu1 %v7962_v1  ;;  %7043 = vmatpush3.msra.mxu0 %v5797_v50  ;;  %v9027_v50 = vld [vmem:[%s10550_s3 + $0x2a0] sm:$0xff] }
  0xfc   : > { %v8842_v17 = vpop.f32.mrf.mxu1  ;;  %7074 = vmatpush3.msra.mxu1 %v3380_v15  ;;  %7044 = vmatprep.subr.mxu0 %v7962_v1 }
  0xfd   : > { %7075 = vmatprep.subr.mxu1 %v7962_v1  ;;  %7045 = vmatpush3.msra.mxu0 %v5796_v51 }
  0xfe   : > { %v8848_v19 = vpop.f32.mrf.mxu0  ;;  %v6645_v20 = vpop.f32.mrf.mxu1  ;;  %7076 = vmatpush3.msra.mxu1 %v3379_v16  ;;  %7046 = vmatprep.subr.mxu0 %v7962_v1 }
  0xff   : > { %7077 = vmatprep.subr.mxu1 %v7962_v1  ;;  %7047 = vmatpush3.msra.mxu0 %v5795_v54  ;;  %v932_v56 = vadd.f32 %v8848_v19, %v8842_v17 }
 0x100   : > { %v6656_v21 = vpop.f32.mrf.mxu0  ;;  %7078 = vmatpush3.msra.mxu1 %v3378_v18  ;;  %7082 = vmatprep.subr.mxu0 %v7962_v1 }
 0x101   : > { %7113 = vmatprep.subr.mxu1 %v7962_v1 }
 0x106   : > { %v8852_v22 = vpop.f32.mrf.mxu1 }
 0x107   : > { %v1010_v58 = vadd.f32 %v8852_v22, %v932_v56 }
 0x108   : > { %v6667_v23 = vpop.f32.mrf.mxu1 }
 0x109   : > { %v8854_v24 = vpop.f32.mrf.mxu0 }
 0x10a   : > { %v1086_v62 = vadd.f32 %v8854_v24, %v1010_v58 }
 0x10b   : > { %v6678_v25 = vpop.f32.mrf.mxu0 }
 0x10c   : > { %v8930_v25 = vld [vmem:[%s10550_s3 + $0x308] sm:$0xff] }
 0x110   : > { %v8856_v26 = vpop.f32.mrf.mxu1 }
 0x111   : > { %v1162_v3 = vadd.f32 %v8856_v26, %v1086_v62 }
 0x112   : > { %v6689_v27 = vpop.f32.mrf.mxu1 }
 0x113   : > { %v1230_v28 = vpop.f32.mrf.mxu0  ;;  %v1163_v7 = vmax.f32 %v8828_v12, %v1162_v3  ;;  %v8939_v27 = vld [vmem:[%s10550_s3 + $0x300] sm:$0xff] }
 0x115   : > { %v6700_v29 = vpop.f32.mrf.mxu0 }
 0x11a   : > { %v1300_v32 = vpop.f32.mrf.mxu1 }
 0x11b   : > { %v1301_v57 = vadd.f32 %v1300_v32, %v1230_v28  ;;  %v8948_v28 = vld [vmem:[%s10550_s3 + $0x2f8] sm:$0xff] }
 0x11c   : > { %v6711_v33 = vpop.f32.mrf.mxu1 }
 0x11d   : > { %v1370_v35 = vpop.f32.mrf.mxu0 }
 0x11e   : > { %v1374_v60 = vadd.f32 %v1370_v35, %v1301_v57 }
 0x11f   : > { %v6722_v36 = vpop.f32.mrf.mxu0 }
 0x124   : > { %v1441_v40 = vpop.f32.mrf.mxu1 }
 0x125   : > { %v1445_v63 = vadd.f32 %v1441_v40, %v1374_v60 }
 0x126   : > { %v6733_v42 = vpop.f32.mrf.mxu1 }
 0x127   : > { %v1516_v43 = vpop.f32.mrf.mxu0 }
 0x128   : > { %v1520_v6 = vadd.f32 %v1516_v43, %v1445_v63 }
 0x129   : > { %v6744_v45 = vpop.f32.mrf.mxu0 }
 0x12a   : > { %v1521_v10 = vmax.f32 %v1163_v7, %v1520_v6 }
 0x12e   : > { %v1588_v49 = vpop.f32.mrf.mxu1 }
 0x130   : > { %v1658_v52 = vpop.f32.mrf.mxu0  ;;  %v6755_v53 = vpop.f32.mrf.mxu1 }
 0x131   : > { %v1659_v0 = vadd.f32 %v1658_v52, %v1588_v49 }
 0x132   : > { %v6766_v55 = vpop.f32.mrf.mxu0 }
 0x138   : > { %v1728_v59 = vpop.f32.mrf.mxu1 }
 0x139   : > { %v1732_v4 = vadd.f32 %v1728_v59, %v1659_v0 }
 0x13a   : > { %v6777_v61 = vpop.f32.mrf.mxu1 }
 0x13b   : > { %v1799_v2 = vpop.f32.mrf.mxu0 }
 0x13c   : > { %v1803_v8 = vadd.f32 %v1799_v2, %v1732_v4 }
 0x13d   : > { %v6788_v5 = vpop.f32.mrf.mxu0 }
 0x142   : > { %v1870_v9 = vpop.f32.mrf.mxu1 }
 0x143   : > { %v1874_v11 = vadd.f32 %v1870_v9, %v1803_v8 }
 0x144   : > { %v6799_v14 = vpop.f32.mrf.mxu1 }
 0x145   : > { %v1875_v15 = vmax.f32 %v1521_v10, %v1874_v11  ;;  %v1966_v16 = vpop.f32.mrf.mxu0 }
 0x147   : > { %v1883_v17 = vadd.f32 %v8923_v13, %v1875_v15  ;;  %v6810_v18 = vpop.f32.mrf.mxu0 }
 0x149   : > { %v1884_v19 = vmax.f32 %v1883_v17, 0.0 }
 0x14b   : > { %1886 = vst.msk [vmem:[#allocation2] sm:$0x7f] %vm1885_vm2, %v1884_v19 }
 0x14c   : > { %v2039_v12 = vpop.f32.mrf.mxu1 }
 0x14d   : > { %v2040_v20 = vadd.f32 %v2039_v12, %v1966_v16 }
 0x14e   : > { %v6821_v21 = vpop.f32.mrf.mxu1 }
 0x14f   : > { %v2117_v22 = vpop.f32.mrf.mxu0 }
 0x150   : > { %v2121_v23 = vadd.f32 %v2117_v22, %v2040_v20 }
 0x151   : > { %v6832_v24 = vpop.f32.mrf.mxu0 }
 0x152   : > { %v8932_v26 = vld [vmem:[#allocation2] sm:$0x1f] }
 0x153   : > { %7080 = vmatmul.mubr.msk.f32.vlgmr.msra.gmra.mxu1 %vm3408_vm3, %v8932_v26 }
 0x154   : > { %7114 = vmatpush3.msra.mxu1 %v8930_v25  ;;  %7141 = vmatprep.mubr.msk.f32.mxu1 %vm7963_vm0, %v7962_v1 }
 0x155   : > { %7115 = vmatprep.subr.mxu1 %v7962_v1 }
 0x156   : > { %v2196_v29 = vpop.f32.mrf.mxu1  ;;  %7116 = vmatpush3.msra.mxu1 %v8939_v27 }
 0x157   : > { %v2200_v30 = vadd.f32 %v2196_v29, %v2121_v23  ;;  %7117 = vmatprep.subr.mxu1 %v7962_v1 }
 0x158   : > { %v6843_v32 = vpop.f32.mrf.mxu1  ;;  %7118 = vmatpush3.msra.mxu1 %v8948_v28 }
 0x159   : > { %v2275_v33 = vpop.f32.mrf.mxu0  ;;  %7119 = vmatprep.subr.mxu1 %v7962_v1 }
 0x15a   : > { %v8964_v35 = vadd.f32 %v2275_v33, %v2200_v30  ;;  %7120 = vmatpush3.msra.mxu1 %v8955_v31 }
 0x15b   : > { %v6854_v36 = vpop.f32.mrf.mxu0  ;;  %7121 = vmatprep.subr.mxu1 %v7962_v1 }
 0x15c   : > { %7122 = vmatpush3.msra.mxu1 %v8962_v34 }
 0x15d   : > { %7123 = vmatprep.subr.mxu1 %v7962_v1 }
 0x15e   : > { %7124 = vmatpush3.msra.mxu1 %v8971_v37 }
 0x15f   : > { %7125 = vmatprep.subr.mxu1 %v7962_v1 }
 0x160   : > { %v2354_v40 = vpop.f32.mrf.mxu1  ;;  %7126 = vmatpush3.msra.mxu1 %v8978_v38 }
 0x161   : > { %7127 = vmatprep.subr.mxu1 %v7962_v1 }
 0x162   : > { %v2424_v42 = vpop.f32.mrf.mxu0  ;;  %v6865_v43 = vpop.f32.mrf.mxu1  ;;  %7128 = vmatpush3.msra.mxu1 %v8985_v39 }
 0x163   : > { %7129 = vmatprep.subr.mxu1 %v7962_v1  ;;  %v2425_v7 = vadd.f32 %v2424_v42, %v2354_v40  ;;  %v9039_v42 = vld [vmem:[%s10550_s3 + $0x228] sm:$0xff] }
 0x164   : > { %v6876_v45 = vpop.f32.mrf.mxu0  ;;  %7130 = vmatpush3.msra.mxu1 %v8992_v41 }
 0x165   : > { %7131 = vmatprep.subr.mxu1 %v7962_v1 }
 0x166   : > { %7132 = vmatpush3.msra.mxu1 %v8999_v44 }
 0x167   : > { %7133 = vmatprep.subr.mxu1 %v7962_v1 }
 0x168   : > { %7134 = vmatpush3.msra.mxu1 %v9006_v46 }
 0x169   : > { %7135 = vmatprep.subr.mxu1 %v7962_v1 }
 0x16a   : > { %v2498_v49 = vpop.f32.mrf.mxu1  ;;  %7136 = vmatpush3.msra.mxu1 %v9013_v47 }
 0x16b   : > { %7137 = vmatprep.subr.mxu1 %v7962_v1  ;;  %v2502_v9 = vadd.f32 %v2498_v49, %v2425_v7  ;;  %v9062_v49 = vld [vmem:[%s10550_s3 + $0x1b0] sm:$0xff]  ;;  %v9202_v7 = vld [vmem:[%s10550_s3 + $0x160] sm:$0xff] }
 0x16c   : > { %v6887_v51 = vpop.f32.mrf.mxu1  ;;  %7138 = vmatpush3.msra.mxu1 %v9020_v48 }
 0x16d   : > { %v2573_v52 = vpop.f32.mrf.mxu0  ;;  %7139 = vmatprep.subr.mxu1 %v7962_v1  ;;  %v9071_v51 = vld [vmem:[%s10550_s3 + $0x218] sm:$0xff] }
 0x16e   : > { %7140 = vmatpush3.msra.mxu1 %v9027_v50  ;;  %v2577_v15 = vadd.f32 %v2573_v52, %v2502_v9  ;;  %v9076_v52 = vld [vmem:[%s10550_s3 + $0x1a8] sm:$0xff]  ;;  %v9216_v9 = vld [vmem:[%s10550_s3 + $0x158] sm:$0xff] }
 0x16f   : > { %v6898_v53 = vpop.f32.mrf.mxu0  ;;  %7175 = vmatprep.subr.mxu1 %v7962_v1 }
 0x170   : > { %v9085_v53 = vld [vmem:[%s10550_s3 + $0x210] sm:$0xff] }
 0x174   : > { %v2648_v54 = vpop.f32.mrf.mxu1 }
 0x175   : > { %v2652_v19 = vadd.f32 %v2648_v54, %v2577_v15  ;;  %v9090_v54 = vld [vmem:[%s10550_s3 + $0x1a0] sm:$0xff]  ;;  %v9247_v15 = vld [vmem:[%s10550_s3 + $0x3e8] sm:$0xff] }
 0x176   : > { %v6909_v55 = vpop.f32.mrf.mxu1 }
 0x177   : > { %v2720_v56 = vpop.f32.mrf.mxu0  ;;  %v2653_v22 = vmax.f32 %v8964_v35, %v2652_v19  ;;  %v9044_v35 = vld [vmem:[%s10550_s3 + $0x1b8] sm:$0xff]  ;;  %v9099_v55 = vld [vmem:[%s10550_s3 + $0x208] sm:$0xff] }
 0x178   : > { %v9277_v19 = vld [vmem:[%s10550_s3 + $0x3d8] sm:$0xff] }
 0x179   : > { %v6920_v57 = vpop.f32.mrf.mxu0 }
 0x17a   : > { %v9113_v57 = vld [vmem:[%s10550_s3 + $0x200] sm:$0xff] }
 0x17e   : > { %v2790_v58 = vpop.f32.mrf.mxu1 }
 0x17f   : > { %v2791_v8 = vadd.f32 %v2790_v58, %v2720_v56  ;;  %v9104_v56 = vld [vmem:[%s10550_s3 + $0x198] sm:$0xff]  ;;  %v9118_v58 = vld [vmem:[%s10550_s3 + $0x190] sm:$0xff] }
 0x180   : > { %v6931_v59 = vpop.f32.mrf.mxu1 }
 0x181   : > { %v2860_v60 = vpop.f32.mrf.mxu0  ;;  %v9127_v59 = vld [vmem:[%s10550_s3 + $0x1f8] sm:$0xff] }
 0x182   : > { %v2864_v11 = vadd.f32 %v2860_v60, %v2791_v8  ;;  %v9132_v60 = vld [vmem:[%s10550_s3 + $0x188] sm:$0xff] }
 0x183   : > { %v6942_v61 = vpop.f32.mrf.mxu0  ;;  %v9211_v8 = vld [vmem:[%s10550_s3 + $0x1c8] sm:$0xff] }
 0x184   : > { %v9141_v61 = vld [vmem:[%s10550_s3 + $0x1f0] sm:$0xff] }
 0x188   : > { %v2931_v62 = vpop.f32.mrf.mxu1 }
 0x189   : > { %v2935_v16 = vadd.f32 %v2931_v62, %v2864_v11  ;;  %v9146_v62 = vld [vmem:[%s10550_s3 + $0x180] sm:$0xff]  ;;  %v9232_v11 = vld [vmem:[%s10550_s3 + $0x150] sm:$0xff] }
 0x18a   : > { %v6953_v63 = vpop.f32.mrf.mxu1 }
 0x18b   : > { %v3006_v0 = vpop.f32.mrf.mxu0  ;;  %v9155_v63 = vld [vmem:[%s10550_s3 + $0x1e8] sm:$0xff] }
 0x18c   : > { %v3010_v21 = vadd.f32 %v3006_v0, %v2935_v16  ;;  %v9160_v0 = vld [vmem:[%s10550_s3 + $0x178] sm:$0xff] }
 0x18d   : > { %v6964_v2 = vpop.f32.mrf.mxu0  ;;  %v9252_v16 = vld [vmem:[%s10550_s3 + $0x298] sm:$0xff] }
 0x18e   : > { %v3011_v29 = vmax.f32 %v2653_v22, %v3010_v21  ;;  %v9169_v2 = vld [vmem:[%s10550_s3 + $0x1e0] sm:$0xff]  ;;  %v9305_v22 = vld [vmem:[%s10550_s3 + $0x3c8] sm:$0xff] }
 0x18f   : > { %v9296_v21 = vld [vmem:[%s10550_s3 + $0x280] sm:$0xff] }
 0x192   : > { %v3078_v3 = vpop.f32.mrf.mxu1 }
 0x194   : > { %v3148_v4 = vpop.f32.mrf.mxu0  ;;  %v6975_v5 = vpop.f32.mrf.mxu1 }
 0x195   : > { %v3149_v17 = vadd.f32 %v3148_v4, %v3078_v3  ;;  %v9174_v3 = vld [vmem:[%s10550_s3 + $0x170] sm:$0xff]  ;;  %v9183_v4 = vld [vmem:[%s10550_s3 + $0x1d8] sm:$0xff]  ;;  %v9188_v5 = vld [vmem:[%s10550_s3 + $0x168] sm:$0xff] }
 0x196   : > { %v6986_v6 = vpop.f32.mrf.mxu0 }
 0x197   : > { %v9197_v6 = vld [vmem:[%s10550_s3 + $0x1d0] sm:$0xff] }
 0x19c   : > { %v3218_v10 = vpop.f32.mrf.mxu1 }
 0x19d   : > { %v3222_v12 = vadd.f32 %v3218_v10, %v3149_v17  ;;  %v9225_v10 = vld [vmem:[%s10550_s3 + $0x1c0] sm:$0xff] }
 0x19e   : > { %v6997_v14 = vpop.f32.mrf.mxu1  ;;  %v9263_v17 = vld [vmem:[%s10550_s3 + $0x3e0] sm:$0xff] }
 0x19f   : > { %v3289_v18 = vpop.f32.mrf.mxu0  ;;  %v9242_v14 = vld [vmem:[#allocation2 + $0x1] sm:$0x1f] }
 0x1a0   : > { %v3293_v23 = vadd.f32 %v3289_v18, %v3222_v12  ;;  %v9268_v18 = vld [vmem:[%s10550_s3 + $0x290] sm:$0xff]  ;;  %v9282_v12 = vld [vmem:[%s10550_s3 + $0x288] sm:$0xff] }
 0x1a1   : > { %v7008_v20 = vpop.f32.mrf.mxu0 }
 0x1a2   : > { %v9291_v20 = vld [vmem:[%s10550_s3 + $0x3d0] sm:$0xff] }
 0x1a5   : > { %v3360_v24 = vpop.f32.mrf.mxu1 }
 0x1a6   : > { %v3364_v30 = vadd.f32 %v3360_v24, %v3293_v23  ;;  %v9310_v23 = vld [vmem:[%s10550_s3 + $0x278] sm:$0xff]  ;;  %v9319_v24 = vld [vmem:[%s10550_s3 + $0x3c0] sm:$0xff] }
 0x1a7   : > { %v7019_v32 = vpop.f32.mrf.mxu1  ;;  %10621 = vst [vmem:[#allocation7_spill] sm:$0xff] %v9319_v24 }
 0x1a8   : > { %v3365_v33 = vmax.f32 %v3011_v29, %v3364_v30  ;;  %v9324_v29 = vld [vmem:[%s10550_s3 + $0x270] sm:$0xff]  ;;  %v9333_v30 = vld [vmem:[%s10550_s3 + $0x3b8] sm:$0xff]  ;;  %v9338_v32 = vld [vmem:[%s10550_s3 + $0x268] sm:$0xff] }
 0x1a9   : > { %10622 = vst [vmem:[#allocation8_spill] sm:$0xff] %v9324_v29  ;;  %10623 = vst [vmem:[#allocation9_spill] sm:$0xff] %v9333_v30 }
 0x1aa   : > { %v3373_v36 = vadd.f32 %v8923_v13, %v3365_v33  ;;  %v9057_v13 = vld [vmem:[%s10550_s3 + $0x220] sm:$0xff]  ;;  %10624 = vst [vmem:[#allocation10_spill] sm:$0xff] %v9338_v32  ;;  %v9347_v33 = vld [vmem:[%s10550_s3 + $0x3b0] sm:$0xff] }
 0x1ab   : > { %10625 = vst [vmem:[#allocation11_spill] sm:$0xff] %v9347_v33 }
 0x1ac   : > { %v3374_v40 = vmax.f32 %v3373_v36, 0.0  ;;  %v9352_v36 = vld [vmem:[%s10550_s3 + $0x260] sm:$0xff] }
 0x1ad   : > { %10626 = vst [vmem:[#allocation12_spill] sm:$0xff] %v9352_v36 }
 0x1ae   : > { %3376 = vst.msk [vmem:[#allocation2 + $0x8] sm:$0x7f] %vm1885_vm2, %v3374_v40  ;;  %v9361_v40 = vld [vmem:[%s10550_s3 + $0x3a8] sm:$0xff] }
 0x1af   : > { %10627 = vst [vmem:[#allocation13_spill] sm:$0xff] %v9361_v40 }
 0x1b5   : > { %v9046_v43 = vld [vmem:[#allocation2 + $0x8] sm:$0x1f] }
 0x1b6   : > { %v9048_v45 = vld [vmem:[#allocation2 + $0x9] sm:$0x1f]  ;;  %7049 = vmatmul.mubr.msk.f32.vlgmr.msra.gmra.mxu0 %vm3408_vm3, %v9046_v43 }
 0x1b7   : > { %7142 = vmatmul.mubr.msk.f32.vlgmr.msra.gmra.mxu1 %vm3408_vm3, %v9048_v45  ;;  %7083 = vmatpush3.msra.mxu0 %v9039_v42 }
 0x1b8   : > { %7176 = vmatpush3.msra.mxu1 %v9044_v35  ;;  %7084 = vmatprep.subr.mxu0 %v7962_v1 }
 0x1b9   : > { %7177 = vmatprep.subr.mxu1 %v7962_v1  ;;  %7085 = vmatpush3.msra.mxu0 %v9057_v13 }
 0x1ba   : > { %7178 = vmatpush3.msra.mxu1 %v9062_v49  ;;  %7086 = vmatprep.subr.mxu0 %v7962_v1 }
 0x1bb   : > { %7179 = vmatprep.subr.mxu1 %v7962_v1  ;;  %7087 = vmatpush3.msra.mxu0 %v9071_v51 }
 0x1bc   : > { %7180 = vmatpush3.msra.mxu1 %v9076_v52  ;;  %7088 = vmatprep.subr.mxu0 %v7962_v1 }
 0x1bd   : > { %7181 = vmatprep.subr.mxu1 %v7962_v1  ;;  %7089 = vmatpush3.msra.mxu0 %v9085_v53 }
 0x1be   : > { %7182 = vmatpush3.msra.mxu1 %v9090_v54  ;;  %7090 = vmatprep.subr.mxu0 %v7962_v1 }
 0x1bf   : > { %7183 = vmatprep.subr.mxu1 %v7962_v1  ;;  %7091 = vmatpush3.msra.mxu0 %v9099_v55 }
 0x1c0   : > { %7184 = vmatpush3.msra.mxu1 %v9104_v56  ;;  %7092 = vmatprep.subr.mxu0 %v7962_v1 }
 0x1c1   : > { %7185 = vmatprep.subr.mxu1 %v7962_v1  ;;  %7093 = vmatpush3.msra.mxu0 %v9113_v57 }
 0x1c2   : > { %7186 = vmatpush3.msra.mxu1 %v9118_v58  ;;  %7094 = vmatprep.subr.mxu0 %v7962_v1 }
 0x1c3   : > { %7187 = vmatprep.subr.mxu1 %v7962_v1  ;;  %7095 = vmatpush3.msra.mxu0 %v9127_v59 }
 0x1c4   : > { %7188 = vmatpush3.msra.mxu1 %v9132_v60  ;;  %7096 = vmatprep.subr.mxu0 %v7962_v1 }
 0x1c5   : > { %7189 = vmatprep.subr.mxu1 %v7962_v1  ;;  %7097 = vmatpush3.msra.mxu0 %v9141_v61 }
 0x1c6   : > { %7190 = vmatpush3.msra.mxu1 %v9146_v62  ;;  %7098 = vmatprep.subr.mxu0 %v7962_v1 }
 0x1c7   : > { %7191 = vmatprep.subr.mxu1 %v7962_v1  ;;  %7099 = vmatpush3.msra.mxu0 %v9155_v63 }
 0x1c8   : > { %7192 = vmatpush3.msra.mxu1 %v9160_v0  ;;  %7100 = vmatprep.subr.mxu0 %v7962_v1 }
 0x1c9   : > { %7193 = vmatprep.subr.mxu1 %v7962_v1  ;;  %7101 = vmatpush3.msra.mxu0 %v9169_v2 }
 0x1ca   : > { %7194 = vmatpush3.msra.mxu1 %v9174_v3  ;;  %7102 = vmatprep.subr.mxu0 %v7962_v1 }
 0x1cb   : > { %7195 = vmatprep.subr.mxu1 %v7962_v1  ;;  %7103 = vmatpush3.msra.mxu0 %v9183_v4 }
 0x1cc   : > { %7196 = vmatpush3.msra.mxu1 %v9188_v5  ;;  %7104 = vmatprep.subr.mxu0 %v7962_v1 }
 0x1cd   : > { %7197 = vmatprep.subr.mxu1 %v7962_v1  ;;  %7105 = vmatpush3.msra.mxu0 %v9197_v6 }
 0x1ce   : > { %7198 = vmatpush3.msra.mxu1 %v9202_v7  ;;  %7106 = vmatprep.subr.mxu0 %v7962_v1 }
 0x1cf   : > { %7199 = vmatprep.subr.mxu1 %v7962_v1  ;;  %7107 = vmatpush3.msra.mxu0 %v9211_v8 }
 0x1d0   : > { %7200 = vmatpush3.msra.mxu1 %v9216_v9  ;;  %7108 = vmatprep.subr.mxu0 %v7962_v1 }
 0x1d1   : > { %7201 = vmatprep.subr.mxu1 %v7962_v1  ;;  %7109 = vmatpush3.msra.mxu0 %v9225_v10 }
 0x1d2   : > { %7110 = vmatprep.mubr.msk.f32.mxu0 %vm7963_vm0, %v7962_v1  ;;  %7202 = vmatpush3.msra.mxu1 %v9232_v11 }
 0x1d3   : > { %7203 = vmatprep.mubr.msk.f32.mxu1 %vm7963_vm0, %v7962_v1  ;;  %7111 = vmatmul.mubr.msk.f32.vlgmr.msra.gmra.mxu0 %vm3408_vm3, %v9242_v14 }
 0x1d4   : > { %7144 = vmatprep.subr.mxu0 %v7962_v1  ;;  %7204 = vmatmul.mubr.msk.f32.vlgmr.msra.gmra.mxu1 %vm3408_vm3, %v9046_v43 }
 0x1d5   : > { %7237 = vmatprep.subr.mxu1 %v7962_v1  ;;  %7145 = vmatpush3.msra.mxu0 %v9247_v15 }
 0x1d6   : > { %7238 = vmatpush3.msra.mxu1 %v9252_v16  ;;  %7146 = vmatprep.subr.mxu0 %v7962_v1 }
 0x1d7   : > { %7239 = vmatprep.subr.mxu1 %v7962_v1  ;;  %7147 = vmatpush3.msra.mxu0 %v9263_v17 }
 0x1d8   : > { %7240 = vmatpush3.msra.mxu1 %v9268_v18  ;;  %7148 = vmatprep.subr.mxu0 %v7962_v1 }
 0x1d9   : > { %7241 = vmatprep.subr.mxu1 %v7962_v1  ;;  %7149 = vmatpush3.msra.mxu0 %v9277_v19 }
 0x1da   : > { %7242 = vmatpush3.msra.mxu1 %v9282_v12  ;;  %7150 = vmatprep.subr.mxu0 %v7962_v1 }
 0x1db   : > { %7243 = vmatprep.subr.mxu1 %v7962_v1  ;;  %7151 = vmatpush3.msra.mxu0 %v9291_v20 }
 0x1dc   : > { %7244 = vmatpush3.msra.mxu1 %v9296_v21  ;;  %7152 = vmatprep.subr.mxu0 %v7962_v1 }
 0x1dd   : > { %7245 = vmatprep.subr.mxu1 %v7962_v1  ;;  %7153 = vmatpush3.msra.mxu0 %v9305_v22 }
 0x1de   : > { %7246 = vmatpush3.msra.mxu1 %v9310_v23  ;;  %7154 = vmatprep.subr.mxu0 %v7962_v1 }
 0x1df   : > { %7247 = vmatprep.subr.mxu1 %v7962_v1  ;;  %7155 = vmatpush3.msra.mxu0 %v9319_v24  ;;  %v9488_v24 = vld [vmem:[%s10550_s3 + $0x448] sm:$0xff] }
 0x1e0   : > { %7248 = vmatpush3.msra.mxu1 %v9324_v29  ;;  %7156 = vmatprep.subr.mxu0 %v7962_v1  ;;  %v9366_v29 = vld [vmem:[%s10550_s3 + $0x258] sm:$0xff]  ;;  %10644 = vst [vmem:[#allocation30_spill] sm:$0xff] %v9488_v24 }
 0x1e1   : > { %7249 = vmatprep.subr.mxu1 %v7962_v1  ;;  %7157 = vmatpush3.msra.mxu0 %v9333_v30  ;;  %10628 = vst [vmem:[#allocation14_spill] sm:$0xff] %v9366_v29  ;;  %v9380_v30 = vld [vmem:[%s10550_s3 + $0x250] sm:$0xff] }
 0x1e2   : > { %7250 = vmatpush3.msra.mxu1 %v9338_v32  ;;  %7158 = vmatprep.subr.mxu0 %v7962_v1  ;;  %v9375_v32 = vld [vmem:[%s10550_s3 + $0x3a0] sm:$0xff]  ;;  %10630 = vst [vmem:[#allocation16_spill] sm:$0xff] %v9380_v30 }
 0x1e3   : > { %7251 = vmatprep.subr.mxu1 %v7962_v1  ;;  %7159 = vmatpush3.msra.mxu0 %v9347_v33  ;;  %10629 = vst [vmem:[#allocation15_spill] sm:$0xff] %v9375_v32  ;;  %v9394_v33 = vld [vmem:[%s10550_s3 + $0x248] sm:$0xff] }
 0x1e4   : > { %7252 = vmatpush3.msra.mxu1 %v9352_v36  ;;  %7160 = vmatprep.subr.mxu0 %v7962_v1  ;;  %v9389_v36 = vld [vmem:[%s10550_s3 + $0x398] sm:$0xff]  ;;  %10632 = vst [vmem:[#allocation18_spill] sm:$0xff] %v9394_v33 }
 0x1e5   : > { %7253 = vmatprep.subr.mxu1 %v7962_v1  ;;  %7161 = vmatpush3.msra.mxu0 %v9361_v40  ;;  %10631 = vst [vmem:[#allocation17_spill] sm:$0xff] %v9389_v36  ;;  %v9408_v40 = vld [vmem:[%s10550_s3 + $0x240] sm:$0xff] }
 0x1e6   : > { %7254 = vmatpush3.msra.mxu1 %v9366_v29  ;;  %7162 = vmatprep.subr.mxu0 %v7962_v1  ;;  %v9403_v29 = vld [vmem:[%s10550_s3 + $0x390] sm:$0xff]  ;;  %10634 = vst [vmem:[#allocation20_spill] sm:$0xff] %v9408_v40 }
 0x1e7   : > { %7255 = vmatprep.subr.mxu1 %v7962_v1  ;;  %7163 = vmatpush3.msra.mxu0 %v9375_v32  ;;  %10633 = vst [vmem:[#allocation19_spill] sm:$0xff] %v9403_v29  ;;  %v9422_v32 = vld [vmem:[%s10550_s3 + $0x238] sm:$0xff] }
 0x1e8   : > { %7256 = vmatpush3.msra.mxu1 %v9380_v30  ;;  %7164 = vmatprep.subr.mxu0 %v7962_v1  ;;  %v9417_v30 = vld [vmem:[%s10550_s3 + $0x388] sm:$0xff]  ;;  %10636 = vst [vmem:[#allocation22_spill] sm:$0xff] %v9422_v32 }
 0x1e9   : > { %7257 = vmatprep.subr.mxu1 %v7962_v1  ;;  %7165 = vmatpush3.msra.mxu0 %v9389_v36  ;;  %10635 = vst [vmem:[#allocation21_spill] sm:$0xff] %v9417_v30  ;;  %v9438_v36 = vld [vmem:[%s10550_s3 + $0x230] sm:$0xff] }
 0x1ea   : > { %7258 = vmatpush3.msra.mxu1 %v9394_v33  ;;  %7166 = vmatprep.subr.mxu0 %v7962_v1  ;;  %v9431_v33 = vld [vmem:[%s10550_s3 + $0x380] sm:$0xff]  ;;  %10638 = vst [vmem:[#allocation24_spill] sm:$0xff] %v9438_v36 }
 0x1eb   : > { %7259 = vmatprep.subr.mxu1 %v7962_v1  ;;  %7167 = vmatpush3.msra.mxu0 %v9403_v29  ;;  %10637 = vst [vmem:[#allocation23_spill] sm:$0xff] %v9431_v33  ;;  %v9483_v29 = vld [vmem:[%s10550_s3 + $0xc8] sm:$0xff] }
 0x1ec   : > { %7260 = vmatpush3.msra.mxu1 %v9408_v40  ;;  %7168 = vmatprep.subr.mxu0 %v7962_v1  ;;  %v9458_v40 = vld [vmem:[%s10550_s3 + $0x458] sm:$0xff]  ;;  %10643 = vst [vmem:[#allocation29_spill] sm:$0xff] %v9483_v29 }
 0x1ed   : > { %7261 = vmatprep.subr.mxu1 %v7962_v1  ;;  %7169 = vmatpush3.msra.mxu0 %v9417_v30  ;;  %v9453_v30 = vld [vmem:[%s10550_s3 + $0xd8] sm:$0xff]  ;;  %10640 = vst [vmem:[#allocation26_spill] sm:$0xff] %v9458_v40 }
 0x1ee   : > { %7262 = vmatpush3.msra.mxu1 %v9422_v32  ;;  %7170 = vmatprep.subr.mxu0 %v7962_v1  ;;  %v9448_v32 = vld [vmem:[#allocation2 + $0x2] sm:$0x1f]  ;;  %10639 = vst [vmem:[#allocation25_spill] sm:$0xff] %v9453_v30 }
 0x1ef   : > { %7263 = vmatprep.subr.mxu1 %v7962_v1  ;;  %7171 = vmatpush3.msra.mxu0 %v9431_v33  ;;  %v9474_v33 = vld [vmem:[%s10550_s3 + $0x450] sm:$0xff] }
 0x1f0   : > { %7172 = vmatprep.mubr.msk.f32.mxu0 %vm7963_vm0, %v7962_v1  ;;  %7264 = vmatpush3.msra.mxu1 %v9438_v36  ;;  %v9469_v36 = vld [vmem:[%s10550_s3 + $0xd0] sm:$0xff]  ;;  %10642 = vst [vmem:[#allocation28_spill] sm:$0xff] %v9474_v33 }
 0x1f1   : > { %7265 = vmatprep.mubr.msk.f32.mxu1 %vm7963_vm0, %v7962_v1  ;;  %7173 = vmatmul.mubr.msk.f32.vlgmr.msra.gmra.mxu0 %vm3408_vm3, %v9448_v32  ;;  %10641 = vst [vmem:[#allocation27_spill] sm:$0xff] %v9469_v36 }
 0x1f2   : > { %7206 = vmatprep.subr.mxu0 %v7962_v1  ;;  %7266 = vmatmul.mubr.msk.f32.vlgmr.msra.gmra.mxu1 %vm3408_vm3, %v9242_v14 }
 0x1f3   : > { %7299 = vmatprep.subr.mxu1 %v7962_v1  ;;  %7207 = vmatpush3.msra.mxu0 %v9453_v30  ;;  %v9502_v30 = vld [vmem:[%s10550_s3 + $0x440] sm:$0xff] }
 0x1f4   : > { %7300 = vmatpush3.msra.mxu1 %v9458_v40  ;;  %7208 = vmatprep.subr.mxu0 %v7962_v1  ;;  %v9497_v40 = vld [vmem:[%s10550_s3 + $0xc0] sm:$0xff]  ;;  %10646 = vst [vmem:[#allocation32_spill] sm:$0xff] %v9502_v30 }
 0x1f5   : > { %7301 = vmatprep.subr.mxu1 %v7962_v1  ;;  %7209 = vmatpush3.msra.mxu0 %v9469_v36  ;;  %10645 = vst [vmem:[#allocation31_spill] sm:$0xff] %v9497_v40  ;;  %v9516_v36 = vld [vmem:[%s10550_s3 + $0x438] sm:$0xff] }
 0x1f6   : > { %7302 = vmatpush3.msra.mxu1 %v9474_v33  ;;  %7210 = vmatprep.subr.mxu0 %v7962_v1  ;;  %v9511_v33 = vld [vmem:[%s10550_s3 + $0xb8] sm:$0xff]  ;;  %10648 = vst [vmem:[#allocation34_spill] sm:$0xff] %v9516_v36 }
 0x1f7   : > { %7303 = vmatprep.subr.mxu1 %v7962_v1  ;;  %7211 = vmatpush3.msra.mxu0 %v9483_v29  ;;  %10647 = vst [vmem:[#allocation33_spill] sm:$0xff] %v9511_v33  ;;  %v9530_v29 = vld [vmem:[%s10550_s3 + $0x430] sm:$0xff] }
 0x1f8   : > { %7304 = vmatpush3.msra.mxu1 %v9488_v24  ;;  %7212 = vmatprep.subr.mxu0 %v7962_v1  ;;  %v9525_v24 = vld [vmem:[%s10550_s3 + $0xb0] sm:$0xff]  ;;  %10650 = vst [vmem:[#allocation36_spill] sm:$0xff] %v9530_v29 }
 0x1f9   : > { %7305 = vmatprep.subr.mxu1 %v7962_v1  ;;  %7213 = vmatpush3.msra.mxu0 %v9497_v40  ;;  %10649 = vst [vmem:[#allocation35_spill] sm:$0xff] %v9525_v24  ;;  %v9544_v40 = vld [vmem:[%s10550_s3 + $0x428] sm:$0xff] }
 0x1fa   : > { %7306 = vmatpush3.msra.mxu1 %v9502_v30  ;;  %7214 = vmatprep.subr.mxu0 %v7962_v1  ;;  %v9539_v30 = vld [vmem:[%s10550_s3 + $0xa8] sm:$0xff]  ;;  %10652 = vst [vmem:[#allocation38_spill] sm:$0xff] %v9544_v40 }
 0x1fb   : > { %7307 = vmatprep.subr.mxu1 %v7962_v1  ;;  %7215 = vmatpush3.msra.mxu0 %v9511_v33  ;;  %10651 = vst [vmem:[#allocation37_spill] sm:$0xff] %v9539_v30  ;;  %v9558_v33 = vld [vmem:[%s10550_s3 + $0x420] sm:$0xff] }
 0x1fc   : > { %7308 = vmatpush3.msra.mxu1 %v9516_v36  ;;  %7216 = vmatprep.subr.mxu0 %v7962_v1  ;;  %v9553_v36 = vld [vmem:[%s10550_s3 + $0xa0] sm:$0xff]  ;;  %10654 = vst [vmem:[#allocation40_spill] sm:$0xff] %v9558_v33 }
 0x1fd   : > { %7309 = vmatprep.subr.mxu1 %v7962_v1  ;;  %7217 = vmatpush3.msra.mxu0 %v9525_v24  ;;  %10653 = vst [vmem:[#allocation39_spill] sm:$0xff] %v9553_v36  ;;  %v9572_v24 = vld [vmem:[%s10550_s3 + $0x418] sm:$0xff] }
 0x1fe   : > { %7310 = vmatpush3.msra.mxu1 %v9530_v29  ;;  %7218 = vmatprep.subr.mxu0 %v7962_v1  ;;  %v9567_v29 = vld [vmem:[%s10550_s3 + $0x98] sm:$0xff]  ;;  %10656 = vst [vmem:[#allocation42_spill] sm:$0xff] %v9572_v24 }
 0x1ff   : > { %7311 = vmatprep.subr.mxu1 %v7962_v1  ;;  %7219 = vmatpush3.msra.mxu0 %v9539_v30  ;;  %10655 = vst [vmem:[#allocation41_spill] sm:$0xff] %v9567_v29  ;;  %v9586_v30 = vld [vmem:[%s10550_s3 + $0x410] sm:$0xff] }
 0x200   : > { %7312 = vmatpush3.msra.mxu1 %v9544_v40  ;;  %7220 = vmatprep.subr.mxu0 %v7962_v1  ;;  %v9581_v40 = vld [vmem:[%s10550_s3 + $0x90] sm:$0xff]  ;;  %10658 = vst [vmem:[#allocation44_spill] sm:$0xff] %v9586_v30 }
 0x201   : > { %7313 = vmatprep.subr.mxu1 %v7962_v1  ;;  %7221 = vmatpush3.msra.mxu0 %v9553_v36  ;;  %10657 = vst [vmem:[#allocation43_spill] sm:$0xff] %v9581_v40  ;;  %v9600_v36 = vld [vmem:[%s10550_s3 + $0x408] sm:$0xff] }
 0x202   : > { %7314 = vmatpush3.msra.mxu1 %v9558_v33  ;;  %7222 = vmatprep.subr.mxu0 %v7962_v1  ;;  %v9595_v33 = vld [vmem:[%s10550_s3 + $0x88] sm:$0xff]  ;;  %10660 = vst [vmem:[#allocation46_spill] sm:$0xff] %v9600_v36 }
 0x203   : > { %7315 = vmatprep.subr.mxu1 %v7962_v1  ;;  %7223 = vmatpush3.msra.mxu0 %v9567_v29  ;;  %10659 = vst [vmem:[#allocation45_spill] sm:$0xff] %v9595_v33  ;;  %v9614_v29 = vld [vmem:[%s10550_s3 + $0x400] sm:$0xff] }
 0x204   : > { %7316 = vmatpush3.msra.mxu1 %v9572_v24  ;;  %7224 = vmatprep.subr.mxu0 %v7962_v1  ;;  %v9609_v24 = vld [vmem:[%s10550_s3 + $0x80] sm:$0xff]  ;;  %10661 = vst [vmem:[#allocation47_spill] sm:$0xff] %v9614_v29 }
 0x205   : > { %7317 = vmatprep.subr.mxu1 %v7962_v1  ;;  %7225 = vmatpush3.msra.mxu0 %v9581_v40  ;;  %v9628_v40 = vld [vmem:[%s10550_s3 + $0x3f8] sm:$0xff] }
 0x206   : > { %7318 = vmatpush3.msra.mxu1 %v9586_v30  ;;  %7226 = vmatprep.subr.mxu0 %v7962_v1  ;;  %v9623_v30 = vld [vmem:[%s10550_s3 + $0x78] sm:$0xff]  ;;  %10663 = vst [vmem:[#allocation49_spill] sm:$0xff] %v9628_v40 }
 0x207   : > { %7319 = vmatprep.subr.mxu1 %v7962_v1  ;;  %7227 = vmatpush3.msra.mxu0 %v9595_v33  ;;  %10662 = vst [vmem:[#allocation48_spill] sm:$0xff] %v9623_v30  ;;  %v9644_v33 = vld [vmem:[%s10550_s3 + $0x3f0] sm:$0xff] }
 0x208   : > { %7320 = vmatpush3.msra.mxu1 %v9600_v36  ;;  %7228 = vmatprep.subr.mxu0 %v7962_v1  ;;  %v9637_v36 = vld [vmem:[%s10550_s3 + $0x70] sm:$0xff]  ;;  %10665 = vst [vmem:[#allocation51_spill] sm:$0xff] %v9644_v33 }
 0x209   : > { %7321 = vmatprep.subr.mxu1 %v7962_v1  ;;  %7229 = vmatpush3.msra.mxu0 %v9609_v24  ;;  %10664 = vst [vmem:[#allocation50_spill] sm:$0xff] %v9637_v36 }
 0x20a   : > { %7322 = vmatpush3.msra.mxu1 %v9614_v29  ;;  %7230 = vmatprep.subr.mxu0 %v7962_v1 }
 0x20b   : > { %7323 = vmatprep.subr.mxu1 %v7962_v1  ;;  %7231 = vmatpush3.msra.mxu0 %v9623_v30 }
 0x20c   : > { %7324 = vmatpush3.msra.mxu1 %v9628_v40  ;;  %7232 = vmatprep.subr.mxu0 %v7962_v1  ;;  %v9657_v40 = vld [vmem:[%s10550_s3 + $0x378] sm:$0xff] }
 0x20d   : > { %7325 = vmatprep.subr.mxu1 %v7962_v1  ;;  %7233 = vmatpush3.msra.mxu0 %v9637_v36  ;;  %10666 = vst [vmem:[#allocation52_spill] sm:$0xff] %v9657_v40  ;;  %v7870_v36 = vld [vmem:[%s10550_s3 + $0x68] sm:$0xff] }
 0x20e   : > { %7234 = vmatprep.mubr.msk.f32.mxu0 %vm7963_vm0, %v7962_v1  ;;  %7326 = vmatpush3.msra.mxu1 %v9644_v33  ;;  %v9668_v33 = vld [vmem:[%s10550_s3 + $0x370] sm:$0xff] }
 0x20f   : > { %7327 = vmatprep.mubr.msk.f32.mxu1 %vm7963_vm0, %v7962_v1  ;;  %7235 = vmatmul.mubr.msk.f32.vlgmr.msra.gmra.mxu0 %vm3408_vm3, %v8932_v26  ;;  %10667 = vst [vmem:[#allocation53_spill] sm:$0xff] %v9668_v33  ;;  %v9679_v26 = vld [vmem:[%s10550_s3 + $0x368] sm:$0xff] }
 0x210   : > { %7268 = vmatprep.subr.mxu0 %v7962_v1  ;;  %7328 = vmatmul.mubr.msk.f32.vlgmr.msra.gmra.mxu1 %vm3408_vm3, %v9448_v32  ;;  %10668 = vst [vmem:[#allocation54_spill] sm:$0xff] %v9679_v26 }
 0x211   : > { %7361 = vmatprep.subr.mxu1 %v7962_v1  ;;  %7269 = vmatpush3.msra.mxu0 %v9657_v40  ;;  %v7871_v40 = vld [vmem:[%s10550_s3 + $0x60] sm:$0xff] }
 0x212   : > { %7362 = vmatpush3.msra.mxu1 %v7870_v36  ;;  %7270 = vmatprep.subr.mxu0 %v7962_v1  ;;  %v9692_v36 = vld [vmem:[%s10550_s3 + $0x360] sm:$0xff] }
 0x213   : > { %7363 = vmatprep.subr.mxu1 %v7962_v1  ;;  %7271 = vmatpush3.msra.mxu0 %v9668_v33  ;;  %v9685_v30 = vpop.f32.mrf.mxu1  ;;  %v7872_v33 = vld [vmem:[%s10550_s3 + $0x58] sm:$0xff] }
 0x214   : > { %7364 = vmatpush3.msra.mxu1 %v7871_v40  ;;  %7272 = vmatprep.subr.mxu0 %v7962_v1  ;;  %v9703_v40 = vld [vmem:[%s10550_s3 + $0x358] sm:$0xff] }
 0x215   : > { %7365 = vmatprep.subr.mxu1 %v7962_v1  ;;  %7273 = vmatpush3.msra.mxu0 %v9679_v26  ;;  %v7081_v29 = vpop.f32.mrf.mxu1  ;;  %10669 = vst [vmem:[#allocation55_spill] sm:$0xff] %v9703_v40  ;;  %v7873_v26 = vld [vmem:[%s10550_s3 + $0x50] sm:$0xff] }
 0x216   : > { %7366 = vmatpush3.msra.mxu1 %v7872_v33  ;;  %7274 = vmatprep.subr.mxu0 %v7962_v1  ;;  %v9714_v29 = vld [vmem:[%s10550_s3 + $0x350] sm:$0xff]  ;;  %v7874_v33 = vld [vmem:[%s10550_s3 + $0x48] sm:$0xff] }
 0x217   : > { %7367 = vmatprep.subr.mxu1 %v7962_v1  ;;  %7275 = vmatpush3.msra.mxu0 %v9692_v36  ;;  %10670 = vst [vmem:[#allocation56_spill] sm:$0xff] %v9714_v29 }
 0x218   : > { %7368 = vmatpush3.msra.mxu1 %v7873_v26  ;;  %7276 = vmatprep.subr.mxu0 %v7962_v1  ;;  %v9725_v26 = vld [vmem:[%s10550_s3 + $0x348] sm:$0xff] }
 0x219   : > { %7369 = vmatprep.subr.mxu1 %v7962_v1  ;;  %7277 = vmatpush3.msra.mxu0 %v9703_v40  ;;  %10671 = vst [vmem:[#allocation57_spill] sm:$0xff] %v9725_v26  ;;  %v7875_v40 = vld [vmem:[%s10550_s3 + $0x40] sm:$0xff] }
 0x21a   : > { %7370 = vmatpush3.msra.mxu1 %v7874_v33  ;;  %7278 = vmatprep.subr.mxu0 %v7962_v1  ;;  %v9736_v33 = vld [vmem:[%s10550_s3 + $0x340] sm:$0xff] }
 0x21b   : > { %7371 = vmatprep.subr.mxu1 %v7962_v1  ;;  %7279 = vmatpush3.msra.mxu0 %v9714_v29  ;;  %10672 = vst [vmem:[#allocation58_spill] sm:$0xff] %v9736_v33  ;;  %v7876_v29 = vld [vmem:[%s10550_s3 + $0x38] sm:$0xff] }
 0x21c   : > { %7372 = vmatpush3.msra.mxu1 %v7875_v40  ;;  %7280 = vmatprep.subr.mxu0 %v7962_v1  ;;  %v9747_v40 = vld [vmem:[%s10550_s3 + $0x338] sm:$0xff] }
 0x21d   : > { %7373 = vmatprep.subr.mxu1 %v7962_v1  ;;  %7281 = vmatpush3.msra.mxu0 %v9725_v26  ;;  %10673 = vst [vmem:[#allocation59_spill] sm:$0xff] %v9747_v40  ;;  %v7877_v26 = vld [vmem:[%s10550_s3 + $0x30] sm:$0xff] }
 0x21e   : > { %7374 = vmatpush3.msra.mxu1 %v7876_v29  ;;  %7282 = vmatprep.subr.mxu0 %v7962_v1  ;;  %v9758_v29 = vld [vmem:[%s10550_s3 + $0x330] sm:$0xff] }
 0x21f   : > { %7375 = vmatprep.subr.mxu1 %v7962_v1  ;;  %7283 = vmatpush3.msra.mxu0 %v9736_v33  ;;  %10674 = vst [vmem:[#allocation60_spill] sm:$0xff] %v9758_v29  ;;  %v7878_v33 = vld [vmem:[%s10550_s3 + $0x28] sm:$0xff] }
 0x220   : > { %7376 = vmatpush3.msra.mxu1 %v7877_v26  ;;  %7284 = vmatprep.subr.mxu0 %v7962_v1  ;;  %v9769_v26 = vld [vmem:[%s10550_s3 + $0x328] sm:$0xff] }
 0x221   : > { %7377 = vmatprep.subr.mxu1 %v7962_v1  ;;  %7285 = vmatpush3.msra.mxu0 %v9747_v40  ;;  %10675 = vst [vmem:[#allocation61_spill] sm:$0xff] %v9769_v26  ;;  %v7879_v40 = vld [vmem:[%s10550_s3 + $0x20] sm:$0xff] }
 0x222   : > { %7378 = vmatpush3.msra.mxu1 %v7878_v33  ;;  %7286 = vmatprep.subr.mxu0 %v7962_v1  ;;  %v9780_v33 = vld [vmem:[%s10550_s3 + $0x320] sm:$0xff] }
 0x223   : > { %7379 = vmatprep.subr.mxu1 %v7962_v1  ;;  %7287 = vmatpush3.msra.mxu0 %v9758_v29  ;;  %10676 = vst [vmem:[#allocation62_spill] sm:$0xff] %v9780_v33  ;;  %v7880_v29 = vld [vmem:[%s10550_s3 + $0x18] sm:$0xff] }
 0x224   : > { %7380 = vmatpush3.msra.mxu1 %v7879_v40  ;;  %7288 = vmatprep.subr.mxu0 %v7962_v1  ;;  %v9791_v40 = vld [vmem:[%s10550_s3 + $0x318] sm:$0xff] }
 0x225   : > { %7381 = vmatprep.subr.mxu1 %v7962_v1  ;;  %7289 = vmatpush3.msra.mxu0 %v9769_v26  ;;  %v7881_v26 = vld [vmem:[%s10550_s3 + $0x10] sm:$0xff] }
 0x226   : > { %7382 = vmatpush3.msra.mxu1 %v7880_v29  ;;  %7290 = vmatprep.subr.mxu0 %v7962_v1  ;;  %v9802_v29 = vld [vmem:[%s10550_s3 + $0x310] sm:$0xff] }
 0x227   : > { %7383 = vmatprep.subr.mxu1 %v7962_v1  ;;  %7291 = vmatpush3.msra.mxu0 %v9780_v33  ;;  %v7882_v33 = vld [vmem:[%s10550_s3 + $0x8] sm:$0xff] }
 0x228   : > { %7384 = vmatpush3.msra.mxu1 %v7881_v26  ;;  %7292 = vmatprep.subr.mxu0 %v7962_v1  ;;  %v7883_v26 = vld [vmem:[%s10550_s3] sm:$0xff] }
 0x229   : > { %7385 = vmatprep.subr.mxu1 %v7962_v1  ;;  %7293 = vmatpush3.msra.mxu0 %v9791_v40 }
 0x22a   : > { %7386 = vmatpush3.msra.mxu1 %v7882_v33  ;;  %7294 = vmatprep.subr.mxu0 %v7962_v1  ;;  %v7884_v33 = vld [vmem:[%s10550_s3 + $0x148] sm:$0xff] }
 0x22b   : > { %7387 = vmatprep.subr.mxu1 %v7962_v1  ;;  %7295 = vmatpush3.msra.mxu0 %v9802_v29 }
 0x22c   : > { %7296 = vmatprep.mubr.msk.f32.mxu0 %vm7963_vm0, %v7962_v1  ;;  %7388 = vmatpush3.msra.mxu1 %v7883_v26  ;;  %v7885_v26 = vld [vmem:[%s10550_s3 + $0x140] sm:$0xff] }
 0x22d   : > { %7389 = vmatprep.mubr.msk.f32.mxu1 %vm7963_vm0, %v7962_v1  ;;  %7297 = vmatmul.mubr.msk.f32.vlgmr.msra.gmra.mxu0 %vm3408_vm3, %v9048_v45 }
 0x22e   : > { %7330 = vmatprep.subr.mxu0 %v7962_v1  ;;  %7390 = vmatmul.mubr.msk.f32.vlgmr.msra.gmra.mxu1 %vm3408_vm3, %v9046_v43  ;;  %v7886_v43 = vld [vmem:[%s10550_s3 + $0x138] sm:$0xff] }
 0x22f   : > { %7423 = vmatprep.subr.mxu1 %v7962_v1  ;;  %7331 = vmatpush3.msra.mxu0 %v7884_v33 }
 0x230   : > { %7424 = vmatpush3.msra.mxu1 %v8930_v25  ;;  %7332 = vmatprep.subr.mxu0 %v7962_v1  ;;  %v7887_v25 = vld [vmem:[%s10550_s3 + $0x130] sm:$0xff] }
 0x231   : > { %7425 = vmatprep.subr.mxu1 %v7962_v1  ;;  %7333 = vmatpush3.msra.mxu0 %v7885_v26  ;;  %v10709_v26 = vld [vmem:[#allocation39_spill] sm:$0xff] }
 0x232   : > { %7426 = vmatpush3.msra.mxu1 %v8939_v27  ;;  %7334 = vmatprep.subr.mxu0 %v7962_v1  ;;  %v7888_v27 = vld [vmem:[%s10550_s3 + $0x128] sm:$0xff] }
 0x233   : > { %7427 = vmatprep.subr.mxu1 %v7962_v1  ;;  %7335 = vmatpush3.msra.mxu0 %v7886_v43  ;;  %v10710_v43 = vld [vmem:[#allocation40_spill] sm:$0xff] }
 0x234   : > { %7428 = vmatpush3.msra.mxu1 %v8948_v28  ;;  %7336 = vmatprep.subr.mxu0 %v7962_v1  ;;  %v7889_v28 = vld [vmem:[%s10550_s3 + $0x120] sm:$0xff] }
 0x235   : > { %7429 = vmatprep.subr.mxu1 %v7962_v1  ;;  %7337 = vmatpush3.msra.mxu0 %v7887_v25  ;;  %v10711_v25 = vld [vmem:[#allocation41_spill] sm:$0xff] }
 0x236   : > { %7430 = vmatpush3.msra.mxu1 %v8955_v31  ;;  %7338 = vmatprep.subr.mxu0 %v7962_v1  ;;  %v7890_v31 = vld [vmem:[%s10550_s3 + $0x118] sm:$0xff] }
 0x237   : > { %7431 = vmatprep.subr.mxu1 %v7962_v1  ;;  %7339 = vmatpush3.msra.mxu0 %v7888_v27  ;;  %v10712_v27 = vld [vmem:[#allocation42_spill] sm:$0xff] }
 0x238   : > { %7432 = vmatpush3.msra.mxu1 %v8962_v34  ;;  %7340 = vmatprep.subr.mxu0 %v7962_v1  ;;  %v7891_v34 = vld [vmem:[%s10550_s3 + $0x110] sm:$0xff] }
 0x239   : > { %7433 = vmatprep.subr.mxu1 %v7962_v1  ;;  %7341 = vmatpush3.msra.mxu0 %v7889_v28  ;;  %v10713_v28 = vld [vmem:[#allocation43_spill] sm:$0xff] }
 0x23a   : > { %7434 = vmatpush3.msra.mxu1 %v8971_v37  ;;  %7342 = vmatprep.subr.mxu0 %v7962_v1  ;;  %v7892_v37 = vld [vmem:[%s10550_s3 + $0x108] sm:$0xff] }
 0x23b   : > { %7435 = vmatprep.subr.mxu1 %v7962_v1  ;;  %7343 = vmatpush3.msra.mxu0 %v7890_v31  ;;  %v10714_v31 = vld [vmem:[#allocation44_spill] sm:$0xff] }
 0x23c   : > { %7436 = vmatpush3.msra.mxu1 %v8978_v38  ;;  %7344 = vmatprep.subr.mxu0 %v7962_v1  ;;  %v7893_v38 = vld [vmem:[%s10550_s3 + $0x100] sm:$0xff] }
 0x23d   : > { %7437 = vmatprep.subr.mxu1 %v7962_v1  ;;  %7345 = vmatpush3.msra.mxu0 %v7891_v34  ;;  %v10715_v34 = vld [vmem:[#allocation45_spill] sm:$0xff] }
 0x23e   : > { %7438 = vmatpush3.msra.mxu1 %v8985_v39  ;;  %7346 = vmatprep.subr.mxu0 %v7962_v1  ;;  %v7894_v39 = vld [vmem:[%s10550_s3 + $0xf8] sm:$0xff] }
 0x23f   : > { %7439 = vmatprep.subr.mxu1 %v7962_v1  ;;  %7347 = vmatpush3.msra.mxu0 %v7892_v37  ;;  %v10716_v37 = vld [vmem:[#allocation46_spill] sm:$0xff] }
 0x240   : > { %7440 = vmatpush3.msra.mxu1 %v8992_v41  ;;  %7348 = vmatprep.subr.mxu0 %v7962_v1  ;;  %v7895_v41 = vld [vmem:[%s10550_s3 + $0xf0] sm:$0xff] }
 0x241   : > { %7441 = vmatprep.subr.mxu1 %v7962_v1  ;;  %7349 = vmatpush3.msra.mxu0 %v7893_v38  ;;  %v10717_v38 = vld [vmem:[#allocation47_spill] sm:$0xff] }
 0x242   : > { %7442 = vmatpush3.msra.mxu1 %v8999_v44  ;;  %7350 = vmatprep.subr.mxu0 %v7962_v1  ;;  %v7896_v44 = vld [vmem:[%s10550_s3 + $0xe8] sm:$0xff] }
 0x243   : > { %7443 = vmatprep.subr.mxu1 %v7962_v1  ;;  %7351 = vmatpush3.msra.mxu0 %v7894_v39  ;;  %v10718_v39 = vld [vmem:[#allocation48_spill] sm:$0xff] }
 0x244   : > { %7444 = vmatpush3.msra.mxu1 %v9006_v46  ;;  %7352 = vmatprep.subr.mxu0 %v7962_v1  ;;  %v7897_v46 = vld [vmem:[%s10550_s3 + $0xe0] sm:$0xff] }
 0x245   : > { %7445 = vmatprep.subr.mxu1 %v7962_v1  ;;  %7353 = vmatpush3.msra.mxu0 %v7895_v41  ;;  %v10719_v41 = vld [vmem:[#allocation49_spill] sm:$0xff] }
 0x246   : > { %7446 = vmatpush3.msra.mxu1 %v9013_v47  ;;  %7354 = vmatprep.subr.mxu0 %v7962_v1  ;;  %v10677_v47 = vld [vmem:[#allocation7_spill] sm:$0xff] }
 0x247   : > { %7447 = vmatprep.subr.mxu1 %v7962_v1  ;;  %7355 = vmatpush3.msra.mxu0 %v7896_v44  ;;  %v10720_v44 = vld [vmem:[#allocation50_spill] sm:$0xff] }
 0x248   : > { %7448 = vmatpush3.msra.mxu1 %v9020_v48  ;;  %7356 = vmatprep.subr.mxu0 %v7962_v1  ;;  %v10678_v48 = vld [vmem:[#allocation8_spill] sm:$0xff] }
 0x249   : > { %7449 = vmatprep.subr.mxu1 %v7962_v1  ;;  %7357 = vmatpush3.msra.mxu0 %v7897_v46  ;;  %v7899_v46 = vld [vmem:[#allocation2 + $0x8] sm:$0x1f] }
 0x24a   : > { %7358 = vmatprep.mubr.msk.f32.mxu0 %vm7963_vm0, %v7962_v1  ;;  %7450 = vmatpush3.msra.mxu1 %v9027_v50 }
 0x24b   : > { %7451 = vmatprep.mubr.msk.f32.mxu1 %vm7963_vm0, %v7962_v1  ;;  %7359 = vmatmul.mubr.msk.f32.vlgmr.msra.gmra.mxu0 %vm3408_vm3, %v9242_v14 }
 0x24c   : > { %7392 = vmatprep.subr.mxu0 %v7962_v1  ;;  %7452 = vmatmul.mubr.msk.f32.vlgmr.msra.gmra.mxu1 %vm3408_vm3, %v9448_v32 }
 0x24d   : > { %7485 = vmatprep.subr.mxu1 %v7962_v1  ;;  %7393 = vmatpush3.msra.mxu0 %v9039_v42 }
 0x24e   : > { %7486 = vmatpush3.msra.mxu1 %v9044_v35  ;;  %7394 = vmatprep.subr.mxu0 %v7962_v1  ;;  %v10679_v35 = vld [vmem:[#allocation9_spill] sm:$0xff] }
 0x24f   : > { %7487 = vmatprep.subr.mxu1 %v7962_v1  ;;  %7395 = vmatpush3.msra.mxu0 %v9057_v13 }
 0x250   : > { %7488 = vmatpush3.msra.mxu1 %v9062_v49  ;;  %7396 = vmatprep.subr.mxu0 %v7962_v1 }
 0x251   : > { %7489 = vmatprep.subr.mxu1 %v7962_v1  ;;  %7397 = vmatpush3.msra.mxu0 %v9071_v51  ;;  %v10681_v51 = vld [vmem:[#allocation11_spill] sm:$0xff] }
 0x252   : > { %7490 = vmatpush3.msra.mxu1 %v9076_v52  ;;  %7398 = vmatprep.subr.mxu0 %v7962_v1  ;;  %v10682_v52 = vld [vmem:[#allocation12_spill] sm:$0xff] }
 0x253   : > { %7491 = vmatprep.subr.mxu1 %v7962_v1  ;;  %7399 = vmatpush3.msra.mxu0 %v9085_v53  ;;  %v10683_v53 = vld [vmem:[#allocation13_spill] sm:$0xff] }
 0x254   : > { %7492 = vmatpush3.msra.mxu1 %v9090_v54  ;;  %7400 = vmatprep.subr.mxu0 %v7962_v1  ;;  %v10684_v54 = vld [vmem:[#allocation14_spill] sm:$0xff] }
 0x255   : > { %7493 = vmatprep.subr.mxu1 %v7962_v1  ;;  %7401 = vmatpush3.msra.mxu0 %v9099_v55  ;;  %v10685_v55 = vld [vmem:[#allocation15_spill] sm:$0xff] }
 0x256   : > { %7494 = vmatpush3.msra.mxu1 %v9104_v56  ;;  %7402 = vmatprep.subr.mxu0 %v7962_v1  ;;  %v10686_v56 = vld [vmem:[#allocation16_spill] sm:$0xff] }
 0x257   : > { %7495 = vmatprep.subr.mxu1 %v7962_v1  ;;  %7403 = vmatpush3.msra.mxu0 %v9113_v57  ;;  %v10687_v57 = vld [vmem:[#allocation17_spill] sm:$0xff] }
 0x258   : > { %7496 = vmatpush3.msra.mxu1 %v9118_v58  ;;  %7404 = vmatprep.subr.mxu0 %v7962_v1  ;;  %v10688_v58 = vld [vmem:[#allocation18_spill] sm:$0xff] }
 0x259   : > { %7497 = vmatprep.subr.mxu1 %v7962_v1  ;;  %7405 = vmatpush3.msra.mxu0 %v9127_v59  ;;  %v10689_v59 = vld [vmem:[#allocation19_spill] sm:$0xff] }
 0x25a   : > { %7498 = vmatpush3.msra.mxu1 %v9132_v60  ;;  %7406 = vmatprep.subr.mxu0 %v7962_v1  ;;  %v10690_v60 = vld [vmem:[#allocation20_spill] sm:$0xff] }
 0x25b   : > { %7499 = vmatprep.subr.mxu1 %v7962_v1  ;;  %7407 = vmatpush3.msra.mxu0 %v9141_v61  ;;  %v10691_v61 = vld [vmem:[#allocation21_spill] sm:$0xff] }
 0x25c   : > { %7500 = vmatpush3.msra.mxu1 %v9146_v62  ;;  %7408 = vmatprep.subr.mxu0 %v7962_v1  ;;  %v10692_v62 = vld [vmem:[#allocation22_spill] sm:$0xff] }
 0x25d   : > { %7501 = vmatprep.subr.mxu1 %v7962_v1  ;;  %7409 = vmatpush3.msra.mxu0 %v9155_v63  ;;  %v10693_v63 = vld [vmem:[#allocation23_spill] sm:$0xff] }
 0x25e   : > { %7502 = vmatpush3.msra.mxu1 %v9160_v0  ;;  %7410 = vmatprep.subr.mxu0 %v7962_v1  ;;  %v10694_v0 = vld [vmem:[#allocation24_spill] sm:$0xff] }
 0x25f   : > { %7503 = vmatprep.subr.mxu1 %v7962_v1  ;;  %7411 = vmatpush3.msra.mxu0 %v9169_v2  ;;  %v10040_v2 = vld [vmem:[#allocation2 + $0xa] sm:$0x1f] }
 0x260   : > { %7504 = vmatpush3.msra.mxu1 %v9174_v3  ;;  %7412 = vmatprep.subr.mxu0 %v7962_v1  ;;  %v7898_v3 = vld [vmem:[#allocation2 + $0x9] sm:$0x1f] }
 0x261   : > { %7505 = vmatprep.subr.mxu1 %v7962_v1  ;;  %7413 = vmatpush3.msra.mxu0 %v9183_v4  ;;  %v10695_v4 = vld [vmem:[#allocation25_spill] sm:$0xff] }
 0x262   : > { %7506 = vmatpush3.msra.mxu1 %v9188_v5  ;;  %7414 = vmatprep.subr.mxu0 %v7962_v1  ;;  %v10696_v5 = vld [vmem:[#allocation26_spill] sm:$0xff] }
 0x263   : > { %7507 = vmatprep.subr.mxu1 %v7962_v1  ;;  %7415 = vmatpush3.msra.mxu0 %v9197_v6  ;;  %v10697_v6 = vld [vmem:[#allocation27_spill] sm:$0xff] }
 0x264   : > { %7508 = vmatpush3.msra.mxu1 %v9202_v7  ;;  %7416 = vmatprep.subr.mxu0 %v7962_v1  ;;  %v10698_v7 = vld [vmem:[#allocation28_spill] sm:$0xff] }
 0x265   : > { %7509 = vmatprep.subr.mxu1 %v7962_v1  ;;  %7417 = vmatpush3.msra.mxu0 %v9211_v8  ;;  %v10699_v8 = vld [vmem:[#allocation29_spill] sm:$0xff] }
 0x266   : > { %7510 = vmatpush3.msra.mxu1 %v9216_v9  ;;  %7418 = vmatprep.subr.mxu0 %v7962_v1  ;;  %v10700_v9 = vld [vmem:[#allocation30_spill] sm:$0xff] }
 0x267   : > { %7511 = vmatprep.subr.mxu1 %v7962_v1  ;;  %7419 = vmatpush3.msra.mxu0 %v9225_v10  ;;  %v10701_v10 = vld [vmem:[#allocation31_spill] sm:$0xff] }
 0x268   : > { %7420 = vmatprep.mubr.msk.f32.mxu0 %vm7963_vm0, %v7962_v1  ;;  %7512 = vmatpush3.msra.mxu1 %v9232_v11  ;;  %v10702_v11 = vld [vmem:[#allocation32_spill] sm:$0xff] }
 0x269   : > { %7513 = vmatprep.mubr.msk.f32.mxu1 %vm7963_vm0, %v7962_v1  ;;  %7421 = vmatmul.mubr.msk.f32.vlgmr.msra.gmra.mxu0 %vm3408_vm3, %v9048_v45  ;;  %v10680_v45 = vld [vmem:[#allocation10_spill] sm:$0xff] }
 0x26a   : > { %7454 = vmatprep.subr.mxu0 %v7962_v1  ;;  %7514 = vmatmul.mubr.msk.f32.vlgmr.msra.gmra.mxu1 %vm3408_vm3, %v9242_v14  ;;  %v10703_v14 = vld [vmem:[#allocation33_spill] sm:$0xff] }
 0x26b   : > { %7547 = vmatprep.subr.mxu1 %v7962_v1  ;;  %7455 = vmatpush3.msra.mxu0 %v9247_v15  ;;  %v10704_v15 = vld [vmem:[#allocation34_spill] sm:$0xff] }
 0x26c   : > { %7548 = vmatpush3.msra.mxu1 %v9252_v16  ;;  %7456 = vmatprep.subr.mxu0 %v7962_v1 }
 0x26d   : > { %7549 = vmatprep.subr.mxu1 %v7962_v1  ;;  %7457 = vmatpush3.msra.mxu0 %v9263_v17  ;;  %v10705_v17 = vld [vmem:[#allocation35_spill] sm:$0xff] }
 0x26e   : > { %7550 = vmatpush3.msra.mxu1 %v9268_v18  ;;  %7458 = vmatprep.subr.mxu0 %v7962_v1  ;;  %v10706_v18 = vld [vmem:[#allocation36_spill] sm:$0xff] }
 0x26f   : > { %7551 = vmatprep.subr.mxu1 %v7962_v1  ;;  %7459 = vmatpush3.msra.mxu0 %v9277_v19 }
 0x270   : > { %7552 = vmatpush3.msra.mxu1 %v9282_v12  ;;  %7460 = vmatprep.subr.mxu0 %v7962_v1 }
 0x271   : > { %7553 = vmatprep.subr.mxu1 %v7962_v1  ;;  %7461 = vmatpush3.msra.mxu0 %v9291_v20 }
 0x272   : > { %7554 = vmatpush3.msra.mxu1 %v9296_v21  ;;  %7462 = vmatprep.subr.mxu0 %v7962_v1  ;;  %v10707_v21 = vld [vmem:[#allocation37_spill] sm:$0xff] }
 0x273   : > { %7555 = vmatprep.subr.mxu1 %v7962_v1  ;;  %7463 = vmatpush3.msra.mxu0 %v9305_v22  ;;  %v10708_v22 = vld [vmem:[#allocation38_spill] sm:$0xff] }
 0x274   : > { %7556 = vmatpush3.msra.mxu1 %v9310_v23  ;;  %7464 = vmatprep.subr.mxu0 %v7962_v1 }
 0x275   : > { %7557 = vmatprep.subr.mxu1 %v7962_v1  ;;  %7465 = vmatpush3.msra.mxu0 %v10677_v47  ;;  %v10722_v47 = vld [vmem:[#allocation52_spill] sm:$0xff] }
 0x276   : > { %7558 = vmatpush3.msra.mxu1 %v10678_v48  ;;  %7466 = vmatprep.subr.mxu0 %v7962_v1  ;;  %v3478_v50 = vpop.f32.mrf.mxu0  ;;  %v10723_v48 = vld [vmem:[#allocation53_spill] sm:$0xff] }
 0x277   : > { %7559 = vmatprep.subr.mxu1 %v7962_v1  ;;  %v10004_v42 = vpop.f32.mrf.mxu1  ;;  %7467 = vmatpush3.msra.mxu0 %v10679_v35  ;;  %v3552_v16 = vadd.f32 %v9685_v30, %v3478_v50  ;;  %v10724_v50 = vld [vmem:[#allocation54_spill] sm:$0xff]  ;;  %v10726_v35 = vld [vmem:[#allocation56_spill] sm:$0xff] }
 0x278   : > { %7560 = vmatpush3.msra.mxu1 %v10680_v45  ;;  %7468 = vmatprep.subr.mxu0 %v7962_v1  ;;  %v7050_v13 = vpop.f32.mrf.mxu0 }
 0x279   : > { %7561 = vmatprep.subr.mxu1 %v7962_v1  ;;  %v7143_v49 = vpop.f32.mrf.mxu1  ;;  %7469 = vmatpush3.msra.mxu0 %v10681_v51  ;;  %v10727_v13 = vld [vmem:[#allocation57_spill] sm:$0xff] }
 0x27a   : > { %7562 = vmatpush3.msra.mxu1 %v10682_v52  ;;  %7470 = vmatprep.subr.mxu0 %v7962_v1 }
 0x27b   : > { %7563 = vmatprep.subr.mxu1 %v7962_v1  ;;  %7471 = vmatpush3.msra.mxu0 %v10683_v53 }
 0x27c   : > { %7564 = vmatpush3.msra.mxu1 %v10684_v54  ;;  %7472 = vmatprep.subr.mxu0 %v7962_v1  ;;  %v10729_v54 = vld [vmem:[#allocation59_spill] sm:$0xff] }
 0x27d   : > { %7565 = vmatprep.subr.mxu1 %v7962_v1  ;;  %7473 = vmatpush3.msra.mxu0 %v10685_v55  ;;  %v10730_v55 = vld [vmem:[#allocation60_spill] sm:$0xff] }
 0x27e   : > { %7566 = vmatpush3.msra.mxu1 %v10686_v56  ;;  %7474 = vmatprep.subr.mxu0 %v7962_v1  ;;  %v10731_v56 = vld [vmem:[#allocation61_spill] sm:$0xff] }
 0x27f   : > { %7567 = vmatprep.subr.mxu1 %v7962_v1  ;;  %7475 = vmatpush3.msra.mxu0 %v10687_v57  ;;  %v10732_v57 = vld [vmem:[#allocation62_spill] sm:$0xff] }
 0x280   : > { %7568 = vmatpush3.msra.mxu1 %v10688_v58  ;;  %7476 = vmatprep.subr.mxu0 %v7962_v1 }
 0x281   : > { %7569 = vmatprep.subr.mxu1 %v7962_v1  ;;  %7477 = vmatpush3.msra.mxu0 %v10689_v59 }
 0x282   : > { %7570 = vmatpush3.msra.mxu1 %v10690_v60  ;;  %7478 = vmatprep.subr.mxu0 %v7962_v1 }
 0x283   : > { %7571 = vmatprep.subr.mxu1 %v7962_v1  ;;  %7479 = vmatpush3.msra.mxu0 %v10691_v61 }
 0x284   : > { %7572 = vmatpush3.msra.mxu1 %v10692_v62  ;;  %7480 = vmatprep.subr.mxu0 %v7962_v1 }
 0x285   : > { %7573 = vmatprep.subr.mxu1 %v7962_v1  ;;  %7481 = vmatpush3.msra.mxu0 %v10693_v63 }
 0x286   : > { %7482 = vmatprep.mubr.msk.f32.mxu0 %vm7963_vm0, %v7962_v1  ;;  %7574 = vmatpush3.msra.mxu1 %v10694_v0 }
 0x287   : > { %7575 = vmatprep.mubr.msk.f32.mxu1 %vm7963_vm0, %v7962_v1  ;;  %7483 = vmatmul.mubr.msk.f32.vlgmr.msra.gmra.mxu0 %vm3408_vm3, %v10040_v2 }
 0x288   : > { %7516 = vmatprep.subr.mxu0 %v7962_v1  ;;  %7576 = vmatmul.mubr.msk.f32.vlgmr.msra.gmra.mxu1 %vm3408_vm3, %v7898_v3 }
 0x289   : > { %7609 = vmatprep.subr.mxu1 %v7962_v1  ;;  %7517 = vmatpush3.msra.mxu0 %v10695_v4 }
 0x28a   : > { %7610 = vmatpush3.msra.mxu1 %v10696_v5  ;;  %7518 = vmatprep.subr.mxu0 %v7962_v1 }
 0x28b   : > { %7611 = vmatprep.subr.mxu1 %v7962_v1  ;;  %7519 = vmatpush3.msra.mxu0 %v10697_v6 }
 0x28c   : > { %7612 = vmatpush3.msra.mxu1 %v10698_v7  ;;  %7520 = vmatprep.subr.mxu0 %v7962_v1  ;;  %v4987_v7 = vld [vmem:[%s10552_s5 + $0x40] sm:$0xff] }
 0x28d   : > { %7613 = vmatprep.subr.mxu1 %v7962_v1  ;;  %7521 = vmatpush3.msra.mxu0 %v10699_v8  ;;  %v5951_v8 = vld [vmem:[%s10552_s5 + $0x90] sm:$0xff] }
 0x28e   : > { %7614 = vmatpush3.msra.mxu1 %v10700_v9  ;;  %7522 = vmatprep.subr.mxu0 %v7962_v1  ;;  %v4986_v9 = vld [vmem:[%s10552_s5 + $0x38] sm:$0xff] }
 0x28f   : > { %7615 = vmatprep.subr.mxu1 %v7962_v1  ;;  %7523 = vmatpush3.msra.mxu0 %v10701_v10  ;;  %v5950_v10 = vld [vmem:[%s10552_s5 + $0x88] sm:$0xff] }
 0x290   : > { %7616 = vmatpush3.msra.mxu1 %v10702_v11  ;;  %7524 = vmatprep.subr.mxu0 %v7962_v1  ;;  %v4985_v11 = vld [vmem:[%s10552_s5 + $0x30] sm:$0xff] }
 0x291   : > { %7617 = vmatprep.subr.mxu1 %v7962_v1  ;;  %7525 = vmatpush3.msra.mxu0 %v10703_v14  ;;  %v5949_v14 = vld [vmem:[%s10552_s5 + $0x80] sm:$0xff] }
 0x292   : > { %7618 = vmatpush3.msra.mxu1 %v10704_v15  ;;  %7526 = vmatprep.subr.mxu0 %v7962_v1  ;;  %v4984_v15 = vld [vmem:[%s10552_s5 + $0x28] sm:$0xff] }
 0x293   : > { %7619 = vmatprep.subr.mxu1 %v7962_v1  ;;  %7527 = vmatpush3.msra.mxu0 %v10705_v17  ;;  %v3640_v19 = vpop.f32.mrf.mxu0  ;;  %v4983_v17 = vld [vmem:[%s10552_s5 + $0x20] sm:$0xff] }
 0x294   : > { %7620 = vmatpush3.msra.mxu1 %v10706_v18  ;;  %7528 = vmatprep.subr.mxu0 %v7962_v1  ;;  %v3644_v12 = vadd.f32 %v3640_v19, %v3552_v16  ;;  %v10072_v20 = vpop.f32.mrf.mxu1  ;;  %v5948_v16 = vld [vmem:[%s10552_s5 + $0x78] sm:$0xff]  ;;  %v5947_v18 = vld [vmem:[%s10552_s5 + $0x70] sm:$0xff] }
 0x295   : > { %7621 = vmatprep.subr.mxu1 %v7962_v1  ;;  %7529 = vmatpush3.msra.mxu0 %v10707_v21  ;;  %v7112_v23 = vpop.f32.mrf.mxu0  ;;  %v4982_v21 = vld [vmem:[%s10552_s5 + $0x18] sm:$0xff] }
 0x296   : > { %7622 = vmatpush3.msra.mxu1 %v10708_v22  ;;  %7530 = vmatprep.subr.mxu0 %v7962_v1  ;;  %v7205_v30 = vpop.f32.mrf.mxu1  ;;  %v3734_v33 = vadd.f32 %v10004_v42, %v3644_v12  ;;  %v10725_v42 = vld [vmem:[#allocation55_spill] sm:$0xff]  ;;  %v5946_v22 = vld [vmem:[%s10552_s5 + $0x68] sm:$0xff]  ;;  %v4981_v23 = vld [vmem:[%s10552_s5 + $0x10] sm:$0xff] }
 0x297   : > { %7623 = vmatprep.subr.mxu1 %v7962_v1  ;;  %7531 = vmatpush3.msra.mxu0 %v10709_v26 }
 0x298   : > { %7624 = vmatpush3.msra.mxu1 %v10710_v43  ;;  %7532 = vmatprep.subr.mxu0 %v7962_v1  ;;  %v4980_v43 = vld [vmem:[%s10552_s5 + $0x8] sm:$0xff] }
 0x299   : > { %7625 = vmatprep.subr.mxu1 %v7962_v1  ;;  %7533 = vmatpush3.msra.mxu0 %v10711_v25  ;;  %v5944_v25 = vld [vmem:[%s10552_s5 + $0x58] sm:$0xff] }
 0x29a   : > { %7626 = vmatpush3.msra.mxu1 %v10712_v27  ;;  %7534 = vmatprep.subr.mxu0 %v7962_v1  ;;  %v4979_v27 = vld [vmem:[%s10552_s5] sm:$0xff] }
 0x29b   : > { %7627 = vmatprep.subr.mxu1 %v7962_v1  ;;  %7535 = vmatpush3.msra.mxu0 %v10713_v28  ;;  %v5943_v28 = vld [vmem:[%s10552_s5 + $0x50] sm:$0xff] }
 0x29c   : > { %7628 = vmatpush3.msra.mxu1 %v10714_v31  ;;  %7536 = vmatprep.subr.mxu0 %v7962_v1 }
 0x29d   : > { %7629 = vmatprep.subr.mxu1 %v7962_v1  ;;  %7537 = vmatpush3.msra.mxu0 %v10715_v34 }
 0x29e   : > { %7630 = vmatpush3.msra.mxu1 %v10716_v37  ;;  %7538 = vmatprep.subr.mxu0 %v7962_v1 }
 0x29f   : > { %7631 = vmatprep.subr.mxu1 %v7962_v1  ;;  %7539 = vmatpush3.msra.mxu0 %v9609_v24  ;;  %v10721_v24 = vld [vmem:[#allocation51_spill] sm:$0xff] }
 0x2a0   : > { %7632 = vmatpush3.msra.mxu1 %v10717_v38  ;;  %7540 = vmatprep.subr.mxu0 %v7962_v1 }
 0x2a1   : > { %7633 = vmatprep.subr.mxu1 %v7962_v1  ;;  %7541 = vmatpush3.msra.mxu0 %v10718_v39 }
 0x2a2   : > { %7634 = vmatpush3.msra.mxu1 %v10719_v41  ;;  %7542 = vmatprep.subr.mxu0 %v7962_v1 }
 0x2a3   : > { %7635 = vmatprep.subr.mxu1 %v7962_v1  ;;  %7543 = vmatpush3.msra.mxu0 %v10720_v44 }
 0x2a4   : > { %7544 = vmatprep.mubr.msk.f32.mxu0 %vm7963_vm0, %v7962_v1  ;;  %7636 = vmatpush3.msra.mxu1 %v10721_v24 }
 0x2a5   : > { %7637 = vmatprep.mubr.msk.f32.mxu1 %vm7963_vm0, %v7962_v1  ;;  %7545 = vmatmul.mubr.msk.f32.vlgmr.msra.gmra.mxu0 %vm3408_vm3, %v7899_v46 }
 0x2a6   : > { %7578 = vmatprep.subr.mxu0 %v7962_v1  ;;  %7638 = vmatmul.mubr.msk.f32.vlgmr.msra.gmra.mxu1 %vm3408_vm3, %v10040_v2 }
 0x2a7   : > { %7579 = vmatpush3.msra.mxu0 %v10722_v47  ;;  %7606 = vmatprep.mubr.msk.f32.mxu0 %vm7963_vm0, %v7962_v1 }
 0x2a8   : > { %7580 = vmatprep.subr.mxu0 %v7962_v1  ;;  %7663 = vmatprep.subr.mxu1 %v7962_v1 }
 0x2a9   : > { %7581 = vmatpush3.msra.mxu0 %v10723_v48  ;;  %7683 = vmatprep.mubr.msk.f32.mxu1 %vm7963_vm0, %v7962_v1 }
 0x2aa   : > { %7582 = vmatprep.subr.mxu0 %v7962_v1 }
 0x2ab   : > { %7583 = vmatpush3.msra.mxu0 %v10724_v50 }
 0x2ac   : > { %7584 = vmatprep.subr.mxu0 %v7962_v1 }
 0x2ad   : > { %7585 = vmatpush3.msra.mxu0 %v9692_v36  ;;  %v10728_v36 = vld [vmem:[#allocation58_spill] sm:$0xff] }
 0x2ae   : > { %7586 = vmatprep.subr.mxu0 %v7962_v1 }
 0x2af   : > { %7587 = vmatpush3.msra.mxu0 %v10725_v42 }
 0x2b0   : > { %7588 = vmatprep.subr.mxu0 %v7962_v1 }
 0x2b1   : > { %7589 = vmatpush3.msra.mxu0 %v10726_v35  ;;  %v3820_v45 = vpop.f32.mrf.mxu0 }
 0x2b2   : > { %7590 = vmatprep.subr.mxu0 %v7962_v1  ;;  %v10131_v49 = vadd.f32 %v3820_v45, %v3734_v33  ;;  %v4076_v51 = vpop.f32.mrf.mxu1  ;;  %v5945_v33 = vld [vmem:[%s10552_s5 + $0x60] sm:$0xff] }
 0x2b3   : > { %7591 = vmatpush3.msra.mxu0 %v10727_v13  ;;  %v7174_v52 = vpop.f32.mrf.mxu0 }
 0x2b4   : > { %7592 = vmatprep.subr.mxu0 %v7962_v1  ;;  %v7267_v53 = vpop.f32.mrf.mxu1 }
 0x2b5   : > { %7593 = vmatpush3.msra.mxu0 %v10728_v36 }
 0x2b6   : > { %7594 = vmatprep.subr.mxu0 %v7962_v1 }
 0x2b7   : > { %7595 = vmatpush3.msra.mxu0 %v10729_v54 }
 0x2b8   : > { %7596 = vmatprep.subr.mxu0 %v7962_v1 }
 0x2b9   : > { %7597 = vmatpush3.msra.mxu0 %v10730_v55 }
 0x2ba   : > { %7598 = vmatprep.subr.mxu0 %v7962_v1 }
 0x2bb   : > { %7599 = vmatpush3.msra.mxu0 %v10731_v56  ;;  %v5941_v56 = vld [vmem:[%s10551_s4] ss:$0 sm:$0xff] }
 0x2bc   : > { %7600 = vmatprep.subr.mxu0 %v7962_v1 }
 0x2bd   : > { %7601 = vmatpush3.msra.mxu0 %v10732_v57 }
 0x2be   : > { %7602 = vmatprep.subr.mxu0 %v7962_v1 }
 0x2bf   : > { %7603 = vmatpush3.msra.mxu0 %v9791_v40  ;;  %v4988_v40 = vld [vmem:[%s10552_s5 + $0x48] sm:$0xff] }
 0x2c0   : > { %7604 = vmatprep.subr.mxu0 %v7962_v1 }
 0x2c1   : > { %7605 = vmatpush3.msra.mxu0 %v9802_v29 }
 0x2c2   : > { %7607 = vmatmul.mubr.msk.f32.vlgmr.msra.gmra.mxu0 %vm3408_vm3, %v9448_v32  ;;  %7640 = vmatprep.subr.mxu0 %v7962_v1  ;;  %v5952_v32 = vld [vmem:[%s10552_s5 + $0x98] sm:$0xff] }
 0x2c3   : > { %7660 = vmatprep.mubr.msk.f32.mxu0 %vm7963_vm0, %v7962_v1  ;;  %7641 = vmatpush3.msra.mxu0 %v4988_v40  ;;  %v5973_v40 = vld [vmem:[%s10552_s5 + $0x130] sm:$0xff] }
 0x2c4   : > { %7664 = vmatpush3.msra.mxu1 %v5952_v32  ;;  %7642 = vmatprep.subr.mxu0 %v7962_v1  ;;  %v5961_v32 = vld [vmem:[%s10552_s5 + $0xd8] sm:$0xff] }
 0x2c5   : > { %7665 = vmatprep.subr.mxu1 %v7962_v1  ;;  %7643 = vmatpush3.msra.mxu0 %v4987_v7  ;;  %v5957_v7 = vld [vmem:[%s10552_s5 + $0xb8] sm:$0xff] }
 0x2c6   : > { %7666 = vmatpush3.msra.mxu1 %v5951_v8  ;;  %7644 = vmatprep.subr.mxu0 %v7962_v1  ;;  %v5968_v8 = vld [vmem:[%s10552_s5 + $0x108] sm:$0xff] }
 0x2c7   : > { %7667 = vmatprep.subr.mxu1 %v7962_v1  ;;  %7645 = vmatpush3.msra.mxu0 %v4986_v9  ;;  %v5956_v9 = vld [vmem:[%s10552_s5 + $0xb0] sm:$0xff] }
 0x2c8   : > { %7668 = vmatpush3.msra.mxu1 %v5950_v10  ;;  %7646 = vmatprep.subr.mxu0 %v7962_v1  ;;  %v5967_v10 = vld [vmem:[%s10552_s5 + $0x100] sm:$0xff] }
 0x2c9   : > { %7669 = vmatprep.subr.mxu1 %v7962_v1  ;;  %7647 = vmatpush3.msra.mxu0 %v4985_v11  ;;  %v5955_v11 = vld [vmem:[%s10552_s5 + $0xa8] sm:$0xff] }
 0x2ca   : > { %7670 = vmatpush3.msra.mxu1 %v5949_v14  ;;  %7648 = vmatprep.subr.mxu0 %v7962_v1  ;;  %v5966_v14 = vld [vmem:[%s10552_s5 + $0xf8] sm:$0xff] }
 0x2cb   : > { %7671 = vmatprep.subr.mxu1 %v7962_v1  ;;  %7649 = vmatpush3.msra.mxu0 %v4984_v15  ;;  %v5954_v15 = vld [vmem:[%s10552_s5 + $0xa0] sm:$0xff] }
 0x2cc   : > { %7672 = vmatpush3.msra.mxu1 %v5948_v16  ;;  %7650 = vmatprep.subr.mxu0 %v7962_v1  ;;  %v5965_v16 = vld [vmem:[%s10552_s5 + $0xf0] sm:$0xff] }
 0x2cd   : > { %7673 = vmatprep.subr.mxu1 %v7962_v1  ;;  %7651 = vmatpush3.msra.mxu0 %v4983_v17 }
 0x2ce   : > { %7674 = vmatpush3.msra.mxu1 %v5947_v18  ;;  %7652 = vmatprep.subr.mxu0 %v7962_v1 }
 0x2cf   : > { %v3991_v58 = vpop.f32.mrf.mxu0  ;;  %7675 = vmatprep.subr.mxu1 %v7962_v1  ;;  %7653 = vmatpush3.msra.mxu0 %v4982_v21  ;;  %v5982_v21 = vld [vmem:[%s10552_s5 + $0x170] sm:$0xff] }
 0x2d0   : > { %v3992_v59 = vadd.f32 %v3991_v58, %v10072_v20  ;;  %v4248_v60 = vpop.f32.mrf.mxu1  ;;  %7676 = vmatpush3.msra.mxu1 %v5946_v22  ;;  %7654 = vmatprep.subr.mxu0 %v7962_v1  ;;  %v5981_v22 = vld [vmem:[%s10552_s5 + $0x168] sm:$0xff] }
 0x2d1   : > { %v7236_v61 = vpop.f32.mrf.mxu0  ;;  %7677 = vmatprep.subr.mxu1 %v7962_v1  ;;  %7655 = vmatpush3.msra.mxu0 %v4981_v23  ;;  %v5980_v23 = vld [vmem:[%s10552_s5 + $0x160] sm:$0xff] }
 0x2d2   : > { %v7329_v62 = vpop.f32.mrf.mxu1  ;;  %v4080_v63 = vadd.f32 %v4076_v51, %v3992_v59  ;;  %7678 = vmatpush3.msra.mxu1 %v5945_v33  ;;  %7656 = vmatprep.subr.mxu0 %v7962_v1  ;;  %v5963_v59 = vld [vmem:[%s10552_s5 + $0xe8] sm:$0xff]  ;;  %v5978_v33 = vld [vmem:[%s10552_s5 + $0x150] sm:$0xff] }
 0x2d3   : > { %7679 = vmatprep.subr.mxu1 %v7962_v1  ;;  %7657 = vmatpush3.msra.mxu0 %v4980_v43  ;;  %v5976_v43 = vld [vmem:[%s10552_s5 + $0x140] sm:$0xff] }
 0x2d4   : > { %7680 = vmatpush3.msra.mxu1 %v5944_v25  ;;  %7658 = vmatprep.subr.mxu0 %v7962_v1 }
 0x2d5   : > { %7681 = vmatprep.subr.mxu1 %v7962_v1  ;;  %7659 = vmatpush3.msra.mxu0 %v4979_v27  ;;  %v5424_v27 = vld [vmem:[%s10554_s7 + $0x78] sm:$0xff] }
 0x2d6   : > { %7682 = vmatpush3.msra.mxu1 %v5943_v28  ;;  %7686 = vmatprep.subr.mxu0 %v7962_v1  ;;  %v5423_v28 = vld [vmem:[%s10554_s7 + $0x70] sm:$0xff] }
 0x2d7   : > { %7709 = vmatprep.subr.mxu1 %v7962_v1 }
 0x2ed   : > { %v4162_v29 = vpop.f32.mrf.mxu0 }
 0x2ee   : > { %v4166_v0 = vadd.f32 %v4162_v29, %v4080_v63  ;;  %v4390_v2 = vpop.f32.mrf.mxu1  ;;  %v5962_v63 = vld [vmem:[%s10552_s5 + $0xe0] sm:$0xff]  ;;  %v5972_v29 = vld [vmem:[%s10552_s5 + $0x128] sm:$0xff] }
 0x2ef   : > { %v7298_v3 = vpop.f32.mrf.mxu0 }
 0x2f0   : > { %v10161_v4 = vadd.f32 %v4248_v60, %v4166_v0  ;;  %v7391_v5 = vpop.f32.mrf.mxu1  ;;  %v5974_v60 = vld [vmem:[%s10552_s5 + $0x138] sm:$0xff]  ;;  %v5960_v0 = vld [vmem:[%s10552_s5 + $0xd0] sm:$0xff]  ;;  %v5959_v3 = vld [vmem:[%s10552_s5 + $0xc8] sm:$0xff] }
 0x2f1   : > { %v5958_v5 = vld [vmem:[%s10552_s5 + $0xc0] sm:$0xff] }
 0x2f2   : > { %v4253_v6 = vmax.f32 %v10131_v49, %v10161_v4  ;;  %v5970_v4 = vld [vmem:[%s10552_s5 + $0x118] sm:$0xff] }
 0x30b   : > { %v4320_v19 = vpop.f32.mrf.mxu0 }
 0x30c   : > { %v4391_v12 = vadd.f32 %v4390_v2, %v4320_v19  ;;  %v4531_v20 = vpop.f32.mrf.mxu1  ;;  %v5971_v2 = vld [vmem:[%s10552_s5 + $0x120] sm:$0xff]  ;;  %v5985_v19 = vld [vmem:[%s10552_s5 + $0x188] sm:$0xff] }
 0x30d   : > { %v7360_v30 = vpop.f32.mrf.mxu0 }
 0x30e   : > { %v7453_v26 = vpop.f32.mrf.mxu1  ;;  %v5979_v30 = vld [vmem:[%s10552_s5 + $0x158] sm:$0xff] }
 0x30f   : > { %v5977_v26 = vld [vmem:[%s10552_s5 + $0x148] sm:$0xff] }
 0x329   : > { %v4460_v31 = vpop.f32.mrf.mxu0 }
 0x32a   : > { %v4464_v34 = vadd.f32 %v4460_v31, %v4391_v12  ;;  %v4678_v37 = vpop.f32.mrf.mxu1  ;;  %v5984_v12 = vld [vmem:[%s10552_s5 + $0x180] sm:$0xff]  ;;  %v5422_v31 = vld [vmem:[%s10554_s7 + $0x68] sm:$0xff] }
 0x32b   : > { %v7422_v38 = vpop.f32.mrf.mxu0 }
 0x32c   : > { %v7515_v39 = vpop.f32.mrf.mxu1  ;;  %v4535_v41 = vadd.f32 %v4531_v20, %v4464_v34  ;;  %v5983_v20 = vld [vmem:[%s10552_s5 + $0x178] sm:$0xff]  ;;  %v5421_v34 = vld [vmem:[%s10554_s7 + $0x60] sm:$0xff]  ;;  %v5419_v38 = vld [vmem:[%s10554_s7 + $0x50] sm:$0xff] }
 0x32d   : > { %v5418_v39 = vld [vmem:[%s10554_s7 + $0x48] sm:$0xff] }
 0x347   : > { %v4606_v44 = vpop.f32.mrf.mxu0 }
 0x348   : > { %v4610_v24 = vadd.f32 %v4606_v44, %v4535_v41  ;;  %v4818_v46 = vpop.f32.mrf.mxu1  ;;  %v5417_v41 = vld [vmem:[%s10554_s7 + $0x40] sm:$0xff]  ;;  %v5416_v44 = vld [vmem:[%s10554_s7 + $0x38] sm:$0xff] }
 0x349   : > { %v7484_v47 = vpop.f32.mrf.mxu0 }
 0x34a   : > { %v4611_v48 = vmax.f32 %v4253_v6, %v4610_v24  ;;  %v7577_v50 = vpop.f32.mrf.mxu1  ;;  %v5969_v6 = vld [vmem:[%s10552_s5 + $0x110] sm:$0xff]  ;;  %v5413_v47 = vld [vmem:[%s10554_s7 + $0x20] sm:$0xff] }
 0x34b   : > { %v5415_v24 = vld [vmem:[%s10554_s7 + $0x30] sm:$0xff] }
 0x34c   : > { %v5411_v50 = vld [vmem:[%s10554_s7 + $0x10] sm:$0xff] }
 0x365   : > { %v4748_v42 = vpop.f32.mrf.mxu0 }
 0x366   : > { %v4960_v35 = vpop.f32.mrf.mxu1  ;;  %v4749_v51 = vadd.f32 %v4748_v42, %v4678_v37  ;;  %v5420_v37 = vld [vmem:[%s10554_s7 + $0x58] sm:$0xff]  ;;  %v5410_v42 = vld [vmem:[%s10554_s7 + $0x8] sm:$0xff] }
 0x367   : > { %v7546_v45 = vpop.f32.mrf.mxu0 }
 0x368   : > { %v7639_v13 = vpop.f32.mrf.mxu1  ;;  %v4822_v52 = vadd.f32 %v4818_v46, %v4749_v51  ;;  %v5414_v46 = vld [vmem:[%s10554_s7 + $0x28] sm:$0xff]  ;;  %v5512_v45 = vld [vmem:[%s10556_s9 + $0x78] sm:$0xff] }
 0x369   : > { %v5511_v13 = vld [vmem:[%s10556_s9 + $0x70] sm:$0xff]  ;;  %v5510_v51 = vld [vmem:[%s10556_s9 + $0x68] sm:$0xff] }
 0x382   : > { %v4889_v36 = vpop.f32.mrf.mxu0 }
 0x383   : > { %v4893_v53 = vadd.f32 %v4889_v36, %v4822_v52  ;;  %v5509_v52 = vld [vmem:[%s10556_s9 + $0x60] sm:$0xff]  ;;  %v5508_v36 = vld [vmem:[%s10556_s9 + $0x58] sm:$0xff] }
 0x384   : > { %v7608_v54 = vpop.f32.mrf.mxu0 }
 0x385   : > { %v4964_v55 = vadd.f32 %v4960_v35, %v4893_v53  ;;  %v5409_v35 = vld [vmem:[%s10554_s7] sm:$0xff]  ;;  %v5507_v53 = vld [vmem:[%s10556_s9 + $0x50] sm:$0xff]  ;;  %v5506_v54 = vld [vmem:[%s10556_s9 + $0x48] sm:$0xff] }
 0x387   : > { %v4965_v57 = vmax.f32 %v4611_v48, %v4964_v55  ;;  %v5412_v48 = vld [vmem:[%s10554_s7 + $0x18] sm:$0xff]  ;;  %v5505_v55 = vld [vmem:[%s10556_s9 + $0x40] sm:$0xff] }
 0x389   : > { %v4973_v58 = vadd.f32 %v5941_v56, %v4965_v57  ;;  %v5504_v56 = vld [vmem:[%s10556_s9 + $0x38] sm:$0xff]  ;;  %v5503_v57 = vld [vmem:[%s10556_s9 + $0x30] sm:$0xff] }
 0x38b   : > { %v4974_v49 = vmax.f32 %v4973_v58, 0.0  ;;  %v5502_v58 = vld [vmem:[%s10556_s9 + $0x28] sm:$0xff] }
 0x38d   : > { %4976 = vst.msk [vmem:[#allocation3] sm:$0x1f] %vm4975_vm4, %v4974_v49  ;;  %v5501_v49 = vld [vmem:[%s10556_s9 + $0x20] sm:$0xff] }
 0x394   : > { %v4978_v61 = vld [vmem:[#allocation3] sm:$0x1]  ;;  %v5064_v62 = vld [vmem:[#allocation3 + $0x1] sm:$0x1]  ;;  %v5150_v17 = vld [vmem:[#allocation3 + $0x2] sm:$0x1] }
 0x395   : > { %7661 = vmatmul.mubr.msk.f32.vlgmr.msra.gmra.mxu0 %vm4989_vm5, %v4978_v61  ;;  %7684 = vmatmul.mubr.msk.f32.vlgmr.msra.gmra.mxu1 %vm4989_vm5, %v5064_v62  ;;  %v5236_v18 = vld [vmem:[#allocation3 + $0x3] sm:$0x1]  ;;  %v5322_v25 = vld [vmem:[#allocation3 + $0x4] sm:$0x1] }
 0x396   : > { %7687 = vmatpush3.msra.mxu0 %v5963_v59  ;;  %7710 = vmatpush3.msra.mxu1 %v5974_v60  ;;  %v5500_v59 = vld [vmem:[%s10556_s9 + $0x18] sm:$0xff] }
 0x397   : > { %7688 = vmatprep.subr.mxu0 %v7962_v1  ;;  %7711 = vmatprep.subr.mxu1 %v7962_v1 }
 0x398   : > { %7689 = vmatpush3.msra.mxu0 %v5962_v63  ;;  %7712 = vmatpush3.msra.mxu1 %v5973_v40 }
 0x399   : > { %7690 = vmatprep.subr.mxu0 %v7962_v1  ;;  %7713 = vmatprep.subr.mxu1 %v7962_v1 }
 0x39a   : > { %7691 = vmatpush3.msra.mxu0 %v5961_v32  ;;  %7714 = vmatpush3.msra.mxu1 %v5972_v29 }
 0x39b   : > { %7692 = vmatprep.subr.mxu0 %v7962_v1  ;;  %7715 = vmatprep.subr.mxu1 %v7962_v1 }
 0x39c   : > { %7693 = vmatpush3.msra.mxu0 %v5960_v0  ;;  %7716 = vmatpush3.msra.mxu1 %v5971_v2  ;;  %v4977_v2 = vld [vmem:[%s10553_s6] sm:$0x1] }
 0x39d   : > { %7694 = vmatprep.subr.mxu0 %v7962_v1  ;;  %7717 = vmatprep.subr.mxu1 %v7962_v1 }
 0x39e   : > { %7695 = vmatpush3.msra.mxu0 %v5959_v3  ;;  %7718 = vmatpush3.msra.mxu1 %v5970_v4 }
 0x39f   : > { %7696 = vmatprep.subr.mxu0 %v7962_v1  ;;  %7719 = vmatprep.subr.mxu1 %v7962_v1 }
 0x3a0   : > { %7697 = vmatpush3.msra.mxu0 %v5958_v5  ;;  %7720 = vmatpush3.msra.mxu1 %v5969_v6 }
 0x3a1   : > { %7698 = vmatprep.subr.mxu0 %v7962_v1  ;;  %7721 = vmatprep.subr.mxu1 %v7962_v1 }
 0x3a2   : > { %7699 = vmatpush3.msra.mxu0 %v5957_v7  ;;  %7722 = vmatpush3.msra.mxu1 %v5968_v8 }
 0x3a3   : > { %7700 = vmatprep.subr.mxu0 %v7962_v1  ;;  %7723 = vmatprep.subr.mxu1 %v7962_v1 }
 0x3a4   : > { %7701 = vmatpush3.msra.mxu0 %v5956_v9  ;;  %7724 = vmatpush3.msra.mxu1 %v5967_v10 }
 0x3a5   : > { %7702 = vmatprep.subr.mxu0 %v7962_v1  ;;  %7725 = vmatprep.subr.mxu1 %v7962_v1 }
 0x3a6   : > { %7703 = vmatpush3.msra.mxu0 %v5955_v11  ;;  %7726 = vmatpush3.msra.mxu1 %v5966_v14  ;;  %v5499_v11 = vld [vmem:[%s10556_s9 + $0x10] sm:$0xff]  ;;  %v5498_v14 = vld [vmem:[%s10556_s9 + $0x8] sm:$0xff] }
 0x3a7   : > { %7704 = vmatprep.subr.mxu0 %v7962_v1  ;;  %7727 = vmatprep.subr.mxu1 %v7962_v1 }
 0x3a8   : > { %7705 = vmatpush3.msra.mxu0 %v5954_v15  ;;  %7706 = vmatprep.mubr.msk.f32.mxu0 %vm7963_vm0, %v7962_v1  ;;  %v5497_v15 = vld [vmem:[%s10556_s9] sm:$0xff] }
 0x3a9   : > { %7728 = vmatpush3.msra.mxu1 %v5965_v16  ;;  %7729 = vmatprep.mubr.msk.f32.mxu1 %vm7963_vm0, %v7962_v1  ;;  %v5425_v16 = vld [vmem:[%s10555_s8] sm:$0x1] }
 0x3aa   : > { %7707 = vmatmul.mubr.msk.f32.vlgmr.msra.gmra.mxu0 %vm4989_vm5, %v5150_v17  ;;  %7730 = vmatmul.mubr.msk.f32.vlgmr.msra.gmra.mxu1 %vm4989_vm5, %v5236_v18 }
 0x3ab   : > { %7732 = vmatprep.subr.mxu0 %v7962_v1  ;;  %7752 = vmatprep.mubr.msk.f32.mxu0 %vm7963_vm0, %v7962_v1 }
 0x3ac   : > { %7733 = vmatpush3.msra.mxu0 %v5985_v19  ;;  %7755 = vmatprep.subr.mxu1 %v7962_v1 }
 0x3ad   : > { %7734 = vmatprep.subr.mxu0 %v7962_v1  ;;  %7787 = vmatprep.mubr.msk.f32.mxu1 %vm7963_vm0, %v7962_v1 }
 0x3ae   : > { %7735 = vmatpush3.msra.mxu0 %v5984_v12  ;;  %7756 = vmatpush3.msra.mxu1 %v5424_v27 }
 0x3af   : > { %7736 = vmatprep.subr.mxu0 %v7962_v1  ;;  %7757 = vmatprep.subr.mxu1 %v7962_v1 }
 0x3b0   : > { %7737 = vmatpush3.msra.mxu0 %v5983_v20  ;;  %7758 = vmatpush3.msra.mxu1 %v5423_v28  ;;  %v5513_v20 = vld [vmem:[%s10557_s10] sm:$0x1] }
 0x3b1   : > { %7738 = vmatprep.subr.mxu0 %v7962_v1  ;;  %7759 = vmatprep.subr.mxu1 %v7962_v1 }
 0x3b2   : > { %7739 = vmatpush3.msra.mxu0 %v5982_v21  ;;  %7760 = vmatpush3.msra.mxu1 %v5422_v31 }
 0x3b3   : > { %7740 = vmatprep.subr.mxu0 %v7962_v1  ;;  %7761 = vmatprep.subr.mxu1 %v7962_v1 }
 0x3b4   : > { %7741 = vmatpush3.msra.mxu0 %v5981_v22  ;;  %7762 = vmatpush3.msra.mxu1 %v5421_v34 }
 0x3b5   : > { %7742 = vmatprep.subr.mxu0 %v7962_v1  ;;  %7763 = vmatprep.subr.mxu1 %v7962_v1 }
 0x3b6   : > { %7743 = vmatpush3.msra.mxu0 %v5980_v23  ;;  %7764 = vmatpush3.msra.mxu1 %v5420_v37 }
 0x3b7   : > { %7744 = vmatprep.subr.mxu0 %v7962_v1  ;;  %7765 = vmatprep.subr.mxu1 %v7962_v1 }
 0x3b8   : > { %7745 = vmatpush3.msra.mxu0 %v5979_v30  ;;  %7766 = vmatpush3.msra.mxu1 %v5419_v38 }
 0x3b9   : > { %7746 = vmatprep.subr.mxu0 %v7962_v1  ;;  %7767 = vmatprep.subr.mxu1 %v7962_v1 }
 0x3ba   : > { %7747 = vmatpush3.msra.mxu0 %v5978_v33  ;;  %7768 = vmatpush3.msra.mxu1 %v5418_v39 }
 0x3bb   : > { %7748 = vmatprep.subr.mxu0 %v7962_v1  ;;  %7769 = vmatprep.subr.mxu1 %v7962_v1 }
 0x3bc   : > { %7749 = vmatpush3.msra.mxu0 %v5977_v26  ;;  %7770 = vmatpush3.msra.mxu1 %v5417_v41 }
 0x3bd   : > { %7750 = vmatprep.subr.mxu0 %v7962_v1  ;;  %7771 = vmatprep.subr.mxu1 %v7962_v1 }
 0x3be   : > { %7751 = vmatpush3.msra.mxu0 %v5976_v43  ;;  %7772 = vmatpush3.msra.mxu1 %v5416_v44 }
 0x3bf   : > { %7753 = vmatmul.mubr.msk.f32.vlgmr.msra.gmra.mxu0 %vm4989_vm5, %v5322_v25  ;;  %7790 = vmatprep.subr.mxu0 %v7962_v1 }
 0x3c0   : > { %7822 = vmatprep.mubr.msk.f32.mxu0 %vm7963_vm0, %v7962_v1  ;;  %7773 = vmatprep.subr.mxu1 %v7962_v1 }
 0x3c1   : > { %7774 = vmatpush3.msra.mxu1 %v5415_v24  ;;  %7791 = vmatpush3.msra.mxu0 %v5512_v45 }
 0x3c2   : > { %7775 = vmatprep.subr.mxu1 %v7962_v1  ;;  %7792 = vmatprep.subr.mxu0 %v7962_v1 }
 0x3c3   : > { %7776 = vmatpush3.msra.mxu1 %v5414_v46  ;;  %7793 = vmatpush3.msra.mxu0 %v5511_v13 }
 0x3c4   : > { %7777 = vmatprep.subr.mxu1 %v7962_v1  ;;  %7794 = vmatprep.subr.mxu0 %v7962_v1 }
 0x3c5   : > { %7778 = vmatpush3.msra.mxu1 %v5413_v47  ;;  %7795 = vmatpush3.msra.mxu0 %v5510_v51 }
 0x3c6   : > { %7779 = vmatprep.subr.mxu1 %v7962_v1  ;;  %7796 = vmatprep.subr.mxu0 %v7962_v1 }
 0x3c7   : > { %7780 = vmatpush3.msra.mxu1 %v5412_v48  ;;  %7797 = vmatpush3.msra.mxu0 %v5509_v52 }
 0x3c8   : > { %7781 = vmatprep.subr.mxu1 %v7962_v1  ;;  %7798 = vmatprep.subr.mxu0 %v7962_v1 }
 0x3c9   : > { %7782 = vmatpush3.msra.mxu1 %v5411_v50  ;;  %7799 = vmatpush3.msra.mxu0 %v5508_v36 }
 0x3ca   : > { %7783 = vmatprep.subr.mxu1 %v7962_v1  ;;  %7800 = vmatprep.subr.mxu0 %v7962_v1 }
 0x3cb   : > { %7784 = vmatpush3.msra.mxu1 %v5410_v42  ;;  %7801 = vmatpush3.msra.mxu0 %v5507_v53 }
 0x3cc   : > { %7785 = vmatprep.subr.mxu1 %v7962_v1  ;;  %7802 = vmatprep.subr.mxu0 %v7962_v1 }
 0x3cd   : > { %7786 = vmatpush3.msra.mxu1 %v5409_v35  ;;  %7803 = vmatpush3.msra.mxu0 %v5506_v54 }
 0x3ce   : > { %7804 = vmatprep.subr.mxu0 %v7962_v1 }
 0x3cf   : > { %7805 = vmatpush3.msra.mxu0 %v5505_v55 }
 0x3d0   : > { %7806 = vmatprep.subr.mxu0 %v7962_v1 }
 0x3d1   : > { %7807 = vmatpush3.msra.mxu0 %v5504_v56 }
 0x3d2   : > { %7808 = vmatprep.subr.mxu0 %v7962_v1 }
 0x3d3   : > { %7809 = vmatpush3.msra.mxu0 %v5503_v57 }
 0x3d4   : > { %7810 = vmatprep.subr.mxu0 %v7962_v1 }
 0x3d5   : > { %7811 = vmatpush3.msra.mxu0 %v5502_v58 }
 0x3d6   : > { %7812 = vmatprep.subr.mxu0 %v7962_v1 }
 0x3d7   : > { %7813 = vmatpush3.msra.mxu0 %v5501_v49 }
 0x3d8   : > { %7814 = vmatprep.subr.mxu0 %v7962_v1 }
 0x3d9   : > { %7815 = vmatpush3.msra.mxu0 %v5500_v59 }
 0x3da   : > { %7816 = vmatprep.subr.mxu0 %v7962_v1 }
 0x3db   : > { %7817 = vmatpush3.msra.mxu0 %v5499_v11 }
 0x3dc   : > { %7818 = vmatprep.subr.mxu0 %v7962_v1 }
 0x3dd   : > { %7819 = vmatpush3.msra.mxu0 %v5498_v14 }
 0x3de   : > { %7820 = vmatprep.subr.mxu0 %v7962_v1 }
 0x3df   : > { %7821 = vmatpush3.msra.mxu0 %v5497_v15 }
 0x455   : > { %v5059_v60 = vpop.f32.mrf.mxu0  ;;  %v5145_v61 = vpop.f32.mrf.mxu1 }
 0x456   : > { %v5063_v3 = vadd.f32 %v5059_v60, %v4977_v2 }
 0x457   : > { %v7662_v62 = vpop.f32.mrf.mxu0  ;;  %v7685_v63 = vpop.f32.mrf.mxu1 }
 0x458   : > { %v5149_v4 = vadd.f32 %v5145_v61, %v5063_v3 }
 0x46a   : > { %v5231_v40 = vpop.f32.mrf.mxu0  ;;  %v5317_v32 = vpop.f32.mrf.mxu1 }
 0x46b   : > { %v5235_v5 = vadd.f32 %v5231_v40, %v5149_v4 }
 0x46c   : > { %v7708_v29 = vpop.f32.mrf.mxu0  ;;  %v7731_v0 = vpop.f32.mrf.mxu1 }
 0x46d   : > { %v5321_v6 = vadd.f32 %v5317_v32, %v5235_v5 }
 0x47f   : > { %v5403_v7 = vpop.f32.mrf.mxu0 }
 0x480   : > { %v5407_v8 = vadd.f32 %v5403_v7, %v5321_v6 }
 0x481   : > { %v7754_v9 = vpop.f32.mrf.mxu0 }
 0x482   : > { %v5408_v10 = vmax.f32 %v5407_v8, 0.0 }
 0x484   : > { %7788 = vmatmul.mubr.f32.vlgmr.msra.gmra.mxu1 %v5408_v10 }
 0x544   : > { %v5492_v17 = vpop.f32.mrf.mxu1 }
 0x545   : > { %v5493_v18 = vadd.f32 %v5492_v17, %v5425_v16 }
 0x546   : > { %v7789_v19 = vpop.f32.mrf.mxu1 }
 0x547   : > { %v5496_v12 = vmax.f32 %v5493_v18, 0.0 }
 0x549   : > { %7823 = vmatmul.mubr.f32.vlgmr.msra.gmra.mxu0 %v5496_v12 }
 0x609   : > { %v5580_v1 = vpop.f32.mrf.mxu0 }
 0x60a   : > { %v5581_v21 = vadd.f32 %v5580_v1, %v5513_v20 }
 0x60b   : > { %v7824_v22 = vpop.f32.mrf.mxu0 }
 0x60c   : > { %v5585_v23 = vsel %vm5584_vm6, %v5581_v21, -inf }
 0x60d   : > { %5586 = vmax.xlane.f32.xlu0 %v5585_v23 }
 0x696   : > { %v5587_v30 = vpop.xlane.xlu0 %5586 }
 0x697   : > { %v5588_v33 = vsub.f32 %v5581_v21, %v5587_v30 }
 0x699   : > { %v5589_v26 = vmul.f32 1.442695, %v5588_v33 }
 0x69b   : > { %7866 = vpow2.f32 %v5589_v26 }
 0x6a8   : > { %v7867_v43 = vpop.eup %7866 }
 0x6a9   : > { %v5591_v25 = vsel %vm5584_vm6, %v7867_v43, 0.0 }
 0x6aa   : > { %5592 = vadd.xlane.f32.xlu0 %v5591_v25 }
 0x733   : > { %v5593_v27 = vpop.xlane.xlu0 %5592 }
 0x734   : > { %7868 = vlog2.f32 %v5593_v27 }
 0x741   : > { %v7869_v28 = vpop.eup %7868 }
 0x742   : > { %v5595_v31 = vmul.f32 0.6931472, %v7869_v28 }
 0x744   : > { %v5596_v34 = vsub.f32 %v5588_v33, %v5595_v31 }
 0x746   : > { %5597 = vst [vmem:[%s378_s13] sm:$0x1] %v5596_v34 }
 0x747   : > { %7913 = shalt.err (!%p7910_p3)
}
 0x748   : > { %s7914_s1 = scalar_lea.hbm %s5609_s24, 16  ;;  %s7918_s13 = scalar_lea.hbm %s10558_s11, 32 }
 0x749   : > { %p7915_p4 = scmp.ne.s32.totalorder %s5609_s24, %s7914_s1  ;;  %p7919_p9 = scmp.lt.s32.totalorder %s5609_s24, %s10558_s11 }
 0x74a   : > { %p7920_p10 = scmp.lt.s32.totalorder %s7918_s13, %s7914_s1 }
 0x74b   : > { %p7916_p7 = pnand %p7915_p4, %p8063_p5 }
 0x74c   : > { %p7921_p11 = por %p7920_p10, %p7919_p9 }
 0x74d   : > { %p7917_p8 = pneg %p7916_p7 }
 0x74f   : > { %p7922_p12 = pnand %p7921_p11, %p7917_p8 }
 0x751   : > { %7925 = shalt.err (!%p7922_p12)
}
 0x752   : > { %7825 = dma.vmem_to_hbm [thread:$0]  (%p8063_p5), %s5612_s14, 16, %s5609_s24, %s5599_s16  }
 0x753 PF: > { %p7831_p13 = scmp.ge.s32.totalorder %s7960_s20, 2  ;;  %s5623_s0 = sand.u32 1, %s7948_s17  }
 0x754   : > { %s5624_s29 = scalar_lea.sflag [#allocation5], %s5623_s0 }
 0x755   : > { %p7828_p0 = pnand %p7831_p13, %p8067_p6 }
 0x757   : > { %p7829_p1 = pneg %p7828_p0 }
 0x759   : > { %7943 = dma.done.wait (%p7829_p1), %s5624_s29, 16  }
 0x75a   : > { %7945 = vsyncadd (%p7829_p1), %s5624_s29, 4294967280  ;;  %p21_p2 = scmp.ge.s32.totalorder %s8050_s23, 4   ;;  %s10733_s17 = smov %s7952_s18 }
 0x75b   : > { %s10734_s18 = smov %s7956_s19  ;;  %s10735_s19 = smov %s8061_s26 }
 0x75c   : > { %s10736_s20 = smov %s8050_s23  ;;  %23 = sbr.rel (!%p21_p2) target bundleno = 6 (0x6), region = 125 }
 0x761   :  { %5628 = vsyncpa [#allocation5], 1 }
 0x762   :  { %5630 = vsyncpa [#allocation5 + $0x1], 1 }

</bundles_post_ra>
